<compile_context>
chip_gen: v7x
topology: tpu7x:2x2x1
jax: 0.10.0
libtpu: 0.0.40
codegen_flags: <defaults>
</compile_context>

<pallas_src>
import jax
import jax.numpy as jnp
from jax.experimental import pallas as pl
from jax.experimental.pallas import tpu as pltpu

EPS = 1e-5                     # nn.LayerNorm default eps
INV_SQRT2 = 0.7071067811865476
LANES = 128                    # vreg lane width; everything is padded to it


# ---------------------------------------------------------------------------
# math helpers (reference + kernel)
# ---------------------------------------------------------------------------
def _gelu(x):
    # exact (erf) GELU — PyTorch nn.GELU() default
    return 0.5 * x * (1.0 + jax.lax.erf(x * INV_SQRT2))


def _layernorm(x, gamma, beta):
    mu = jnp.mean(x, axis=-1, keepdims=True)
    var = jnp.mean(jnp.square(x - mu), axis=-1, keepdims=True)   # biased, like torch
    return (x - mu) * jax.lax.rsqrt(var + EPS) * gamma + beta


# ---------------------------------------------------------------------------
# static layout: each weight slot is a full-128-lane (rows,128) tile whose
# columns are placed at their FINAL lane offsets; biases / LN params are rows
# of a second (rows,128) array, zero in all padded lanes so padded activation
# lanes stay exactly 0 through LN/GELU.
# ---------------------------------------------------------------------------
def make_layout(input_num, extra_num, identity, layers, fun_num, adv_out=13):
    assert identity == input_num, "encorder(actions, actions) needs outNum == inputNum"
    assert fun_num == input_num + layers * extra_num
    assert fun_num % 2 == 0 and input_num % 8 == 0
    hid = fun_num // 2
    assert 2 * hid + adv_out <= LANES

    widths = []
    i_n = input_num
    for _ in range(layers):
        widths += [2 * i_n, i_n + extra_num]
        i_n += extra_num
    assert all(w <= LANES for w in widths)

    # weight slots (row-offset table).  "wa"/"wsk" have LHS = raw actions so
    # they only need input_num rows; every other slot is a full 128-row tile
    # so 128-lane activations multiply it without any lane slicing.
    wslots = [("wa", input_num), ("wsk", input_num)]
    wslots += [(f"w{l}_1", LANES) for l in range(1, layers)]
    wslots += [(f"w{l}_2", LANES) for l in range(layers)]
    wslots += [("wh1", LANES), ("wh2", LANES)]
    woff, r = {}, 0
    for name, nrows in wslots:
        woff[name] = (r, nrows)
        r += nrows

    vnames = []
    for l in range(layers):
        vnames += [f"b{l}_b1", f"b{l}_g1", f"b{l}_be1",
                   f"b{l}_catb", f"b{l}_gn", f"b{l}_bn"]
    vnames += ["h_b1", "h_vg", "h_vbe", "h_ag", "h_abe", "h_btail"]
    vrow = {n: i for i, n in enumerate(vnames)}
    vrows = -(-len(vnames) // 8) * 8

    # per-row cost for pl.CostEstimate (real, un-padded dims)
    flops = 2 * (input_num * 2 * input_num + input_num * layers * extra_num)
    trans = 0
    i_n = input_num
    for l in range(layers):
        if l > 0:
            flops += 2 * i_n * 2 * i_n
        flops += 2 * (2 * i_n) * i_n
        trans += 2 * i_n + (i_n + extra_num)
        i_n += extra_num
    flops += 2 * fun_num * (2 * hid + adv_out) + 2 * (2 * hid) * adv_out
    trans += 2 * hid

    return dict(input_num=input_num, extra_num=extra_num, layers=layers,
                fun_num=fun_num, hid=hid, adv_out=adv_out,
                woff=woff, wrows=r, vrow=vrow, vrows=vrows,
                flops_per_row=flops, trans_per_row=trans)


# ---------------------------------------------------------------------------
# fused kernel: encoder blocks + dueling heads for one TILE_B-row slab
# ---------------------------------------------------------------------------
def make_kernel(layout, tile_b):
    inp, ex = layout["input_num"], layout["extra_num"]
    layers, hid = layout["layers"], layout["hid"]
    woff, vrow = layout["woff"], layout["vrow"]

    def kernel(x_ref, w_ref, v_ref, o_ref):
        def W(name):                       # 8-aligned row slice, full 128 lanes
            r0, nr = woff[name]
            return w_ref[r0:r0 + nr, :]

        def V(name):                       # (1,128) row, zero in padded lanes
            i = vrow[name]
            return v_ref[i:i + 1, :]

        lanes = jax.lax.broadcasted_iota(jnp.int32, (tile_b, LANES), 1)

        def ln(x, lo, hi, gamma, beta):
            # LayerNorm over static lane range [lo, hi); gamma/beta are zero
            # outside it, so padded lanes of the result are exactly 0.
            m = (lanes >= lo) & (lanes < hi) if lo else lanes < hi
            inv_w = 1.0 / (hi - lo)
            mu = jnp.sum(jnp.where(m, x, 0.0), axis=-1, keepdims=True) * inv_w
            c = jnp.where(m, x - mu, 0.0)
            var = jnp.sum(c * c, axis=-1, keepdims=True) * inv_w
            return c * jax.lax.rsqrt(var + EPS) * gamma + beta

        acts = x_ref[...]                                        # (tile_b, inp)
        # zero-padded copy of actions for the block-0 residual (off crit-path)
        x3 = jnp.concatenate(
            [acts, jnp.zeros((tile_b, LANES - inp), jnp.float32)], axis=-1)

        # every PolicyResBlock skip s2 shares LHS = actions -> ONE fused dot,
        # output columns already at their final lane offsets (inp .. fun-1).
        skid = jnp.dot(acts, W("wsk"), preferred_element_type=jnp.float32)

        # ---- PolicyModule: chain of PolicyResBlocks --------------------------
        i_n = inp
        for l in range(layers):
            lhs, wname = (acts, "wa") if l == 0 else (x3, f"w{l}_1")
            h = jnp.dot(lhs, W(wname), preferred_element_type=jnp.float32) + V(f"b{l}_b1")
            g = _gelu(ln(h, 0, 2 * i_n, V(f"b{l}_g1"), V(f"b{l}_be1")))
            x = jnp.dot(g, W(f"w{l}_2"), preferred_element_type=jnp.float32)
            right = skid if l == 0 else jnp.where(lanes >= i_n, skid, 0.0)
            # concat([x1 + s1(x1), s2(a)]) is a plain lane-disjoint VPU add here
            cat = x3 + x + right + V(f"b{l}_catb")
            x3 = _gelu(ln(cat, 0, i_n + ex, V(f"b{l}_gn"), V(f"b{l}_bn")))
            i_n += ex

        # ---- fused dueling heads ---------------------------------------------
        # one dot gives [Lin1_value | Lin1_adv | skip_value+adv] (skip folded).
        fh = jnp.dot(x3, W("wh1"), preferred_element_type=jnp.float32) + V("h_b1")
        hv = ln(fh, 0, hid, V("h_vg"), V("h_vbe"))
        ha = ln(fh, hid, 2 * hid, V("h_ag"), V("h_abe"))
        hcat = _gelu(hv + ha)                                    # real lanes [0, 2*hid)
        tot = (jnp.dot(hcat, W("wh2"), preferred_element_type=jnp.float32)
               + fh + V("h_btail"))
        # value column was replicated into the 13 advantage columns at pack
        # time, so lanes [2*hid, 2*hid+13) already hold value + advantage.
        o_ref[...] = tot                                         # lane-dense store

    return kernel


def make_forward(layout, tile_b=128):
    inp, hid, adv = layout["input_num"], layout["hid"], layout["adv_out"]
    wrows, vrows = layout["wrows"], layout["vrows"]
    kernel = make_kernel(layout, tile_b)

    def forward(actions, w_pack, v_pack):
        n = actions.shape[0]                     # timesteps * envs, flattened
        g = -(-n // tile_b)
        n_pad = g * tile_b
        if n_pad != n:
            actions = jnp.pad(actions, ((0, n_pad - n), (0, 0)))
        out = pl.pallas_call(
            kernel,
            out_shape=jax.ShapeDtypeStruct((n_pad, LANES), jnp.float32),
            grid=(g,),
            in_specs=[
                # per-step slab of rows
                pl.BlockSpec((tile_b, inp), lambda i: (i, 0)),
                # parameters: constant block index -> DMA'd once, VMEM-resident
                pl.BlockSpec((wrows, LANES), lambda i: (0, 0)),
                pl.BlockSpec((vrows, LANES), lambda i: (0, 0)),
            ],
            out_specs=pl.BlockSpec((tile_b, LANES), lambda i: (i, 0)),
            compiler_params=pltpu.CompilerParams(
                dimension_semantics=("parallel",)),   # v7x: both TCs get slabs
            cost_estimate=pl.CostEstimate(
                flops=int(layout["flops_per_row"]) * n_pad,
                transcendentals=int(layout["trans_per_row"]) * n_pad,
                bytes_accessed=4 * (n_pad * inp + n_pad * LANES
                                    + wrows * LANES + vrows * LANES)),
        )(actions, w_pack, v_pack)
        # Q-values live at lanes [2*hid, 2*hid+adv); slice outside the kernel
        return out[:n, 2 * hid:2 * hid + adv]

    return forward


# ---------------------------------------------------------------------------
# parameter init (PyTorch-style fan-in uniform, weights pre-transposed to
# (in,out)) and one-time packing into the two VMEM-resident arrays.
# ---------------------------------------------------------------------------
def init_linear(key, fan_in, fan_out):
    kw, kb = jax.random.split(key)
    bound = 1.0 / float(fan_in) ** 0.5
    w = jax.random.uniform(kw, (fan_in, fan_out), jnp.float32, -bound, bound)
    b = jax.random.uniform(kb, (1, fan_out), jnp.float32, -bound, bound)
    return w, b


def init_classifier(key, in_n, out_n):
    k = jax.random.split(key, 3)
    hid = in_n // 2
    w1, b1 = init_linear(k[0], in_n, hid)
    w2, b2 = init_linear(k[1], hid, out_n)
    ws, bs = init_linear(k[2], in_n, out_n)
    return dict(w1=w1, b1=b1,
                g=jnp.ones((1, hid), jnp.float32), be=jnp.zeros((1, hid), jnp.float32),
                w2=w2, b2=b2, ws=ws, bs=bs)


def init_rem_params(key, input_num, extra_num, identity, layers, fun_num):
    keys = jax.random.split(key, layers + 2)
    blocks = []
    i_n = input_num
    for i in range(layers):
        kk = jax.random.split(keys[i], 3)
        w1, b1 = init_linear(kk[0], i_n, 2 * i_n)
        w2, b2 = init_linear(kk[1], 2 * i_n, i_n)
        ws, bs = init_linear(kk[2], identity, extra_num)
        blocks.append(dict(
            w1=w1, b1=b1,
            g1=jnp.ones((1, 2 * i_n), jnp.float32),
            be1=jnp.zeros((1, 2 * i_n), jnp.float32),
            w2=w2, b2=b2, ws=ws, bs=bs,
            gn=jnp.ones((1, i_n + extra_num), jnp.float32),
            bn=jnp.zeros((1, i_n + extra_num), jnp.float32)))
        i_n += extra_num
    assert i_n == fun_num
    return dict(blocks=blocks,
                value=init_classifier(keys[layers], fun_num, 1),
                adv=init_classifier(keys[layers + 1], fun_num, 13))


def pack_params(params, layout):
    inp, ex, layers = layout["input_num"], layout["extra_num"], layout["layers"]
    hid, adv = layout["hid"], layout["adv_out"]
    Wp = jnp.zeros((layout["wrows"], LANES), jnp.float32)
    Vp = jnp.zeros((layout["vrows"], LANES), jnp.float32)

    def putw(Wp, name, mat, row0=0, col0=0):
        r0, nr = layout["woff"][name]
        rr, cc = mat.shape
        assert row0 + rr <= nr and col0 + cc <= LANES, (name, mat.shape)
        return Wp.at[r0 + row0:r0 + row0 + rr, col0:col0 + cc].set(mat)

    def putv(Vp, name, vec, col0=0):
        i = layout["vrow"][name]
        vec = jnp.reshape(vec, (-1,))
        assert col0 + vec.shape[0] <= LANES, (name, vec.shape)
        return Vp.at[i, col0:col0 + vec.shape[0]].set(vec)

    i_n = inp
    for l, blk in enumerate(params["blocks"]):
        Wp = putw(Wp, "wa" if l == 0 else f"w{l}_1", blk["w1"])
        Wp = putw(Wp, f"w{l}_2", blk["w2"])
        Wp = putw(Wp, "wsk", blk["ws"], col0=i_n)          # skip cols at final lanes
        Vp = putv(Vp, f"b{l}_b1", blk["b1"])
        Vp = putv(Vp, f"b{l}_g1", blk["g1"])
        Vp = putv(Vp, f"b{l}_be1", blk["be1"])
        Vp = putv(Vp, f"b{l}_catb", blk["b2"])             # Lin2 bias @ [0, i_n)
        Vp = putv(Vp, f"b{l}_catb", blk["bs"], col0=i_n)   # skip bias @ [i_n, i_n+ex)
        Vp = putv(Vp, f"b{l}_gn", blk["gn"])
        Vp = putv(Vp, f"b{l}_bn", blk["bn"])
        i_n += ex

    vp, ap = params["value"], params["adv"]
    # head first layer + skip (shared LHS n): [vw1 | aw1 | vws+aws]
    Wp = putw(Wp, "wh1", vp["w1"])
    Wp = putw(Wp, "wh1", ap["w1"], col0=hid)
    Wp = putw(Wp, "wh1", vp["ws"] + ap["ws"], col0=2 * hid)
    # head second layer with the dueling value column replicated into all 13
    # advantage columns -> kernel emits value + advantage directly.
    Wp = putw(Wp, "wh2", jnp.broadcast_to(vp["w2"], (hid, adv)), row0=0, col0=2 * hid)
    Wp = putw(Wp, "wh2", ap["w2"], row0=hid, col0=2 * hid)
    Vp = putv(Vp, "h_b1", vp["b1"])
    Vp = putv(Vp, "h_b1", ap["b1"], col0=hid)
    Vp = putv(Vp, "h_vg", vp["g"])
    Vp = putv(Vp, "h_vbe", vp["be"])
    Vp = putv(Vp, "h_ag", ap["g"], col0=hid)
    Vp = putv(Vp, "h_abe", ap["be"], col0=hid)
    btail = (jnp.reshape(vp["b2"], ()) + jnp.reshape(ap["b2"], (-1,))
             + jnp.reshape(vp["bs"], ()) + jnp.reshape(ap["bs"], (-1,)))
    Vp = putv(Vp, "h_btail", btail, col0=2 * hid)
    return Wp, Vp


# ---------------------------------------------------------------------------
# pure-JAX reference (unfused, un-packed, f32-precision dots) for validation
# ---------------------------------------------------------------------------
def reference_forward(params, actions):
    def lin(x, w, b):
        return jnp.dot(x, w, precision=jax.lax.Precision.HIGHEST) + b

    x3 = actions
    for blk in params["blocks"]:
        h = _gelu(_layernorm(lin(x3, blk["w1"], blk["b1"]), blk["g1"], blk["be1"]))
        x = lin(h, blk["w2"], blk["b2"])
        right = lin(actions, blk["ws"], blk["bs"])
        cat = jnp.concatenate([x3 + x, right], axis=-1)
        x3 = _gelu(_layernorm(cat, blk["gn"], blk["bn"]))

    def classifier(p, x):
        h = _gelu(_layernorm(lin(x, p["w1"], p["b1"]), p["g"], p["be"]))
        return lin(h, p["w2"], p["b2"]) + lin(x, p["ws"], p["bs"])

    return classifier(params["value"], x3) + classifier(params["adv"], x3)


# ---------------------------------------------------------------------------
if __name__ == "__main__":
    INPUT_NUM, EXTRA_NUM, OUT_NUM, LAYERS, FUN_NUM = 32, 16, 32, 2, 64
    TILE_B = 128      # rows per grid step (MXU-friendly M)
    N_ROWS = 256      # e.g. timesteps x envs flattened -> grid of 2 steps

    key = jax.random.PRNGKey(0)
    kp, kx = jax.random.split(key)
    params = init_rem_params(kp, INPUT_NUM, EXTRA_NUM, OUT_NUM, LAYERS, FUN_NUM)
    actions = jax.random.normal(kx, (N_ROWS, INPUT_NUM), jnp.float32)

    layout = make_layout(INPUT_NUM, EXTRA_NUM, OUT_NUM, LAYERS, FUN_NUM, adv_out=13)
    w_pack, v_pack = pack_params(params, layout)           # pack once, outside jit
    forward = jax.jit(make_forward(layout, tile_b=TILE_B))

    out = forward(actions, w_pack, v_pack)
    jax.block_until_ready(out)

    assert out.shape == (N_ROWS, 13) and out.dtype == jnp.float32
    assert bool(jnp.all(jnp.isfinite(out)))

    ref = reference_forward(params, actions)
    err = float(jnp.max(jnp.abs(out - ref)))
    # kernel dots use default TPU MXU precision (bf16 operand rounding) while
    # the reference uses Precision.HIGHEST, hence the loose-ish tolerance.
    assert bool(jnp.allclose(out, ref, atol=3e-3, rtol=3e-3)), err
    print("KERNEL_OK")
</pallas_src>

<mosaic_0001>
module attributes {stable_mosaic.version = 11 : i64} {
  func.func @kernel(%arg0: i32, %arg1: memref<128x32xf32, #tpu.memory_space<vmem>>, %arg2: memref<704x128xf32, #tpu.memory_space<vmem>>, %arg3: memref<24x128xf32, #tpu.memory_space<vmem>>, %arg4: memref<128x128xf32, #tpu.memory_space<vmem>>) attributes {dimension_semantics = [#tpu.dimension_semantics<parallel>], iteration_bounds = array<i64: 2>, scalar_prefetch = 0 : i64, scratch_operands = 0 : i64, tpu.core_type = #tpu.core_type<tc>, window_params = [{transform_indices = @transform_0, window_bounds = array<i64: 128, 32>}, {pipeline_mode = #tpu.pipeline_mode<synchronous>, transform_indices = @transform_1, window_bounds = array<i64: 704, 128>}, {pipeline_mode = #tpu.pipeline_mode<synchronous>, transform_indices = @transform_2, window_bounds = array<i64: 24, 128>}, {transform_indices = @transform_3, window_bounds = array<i64: 128, 128>}]} {
    %0 = tpu.iota {dimensions = array<i32: 1>} : vector<128x128xi32>
    %c0 = arith.constant 0 : index
    %c0_0 = arith.constant 0 : index
    %1 = vector.load %arg1[%c0, %c0_0] : memref<128x32xf32, #tpu.memory_space<vmem>>, vector<128x32xf32>
    %cst = arith.constant 0.000000e+00 : f32
    %2 = vector.broadcast %cst : f32 to vector<128x96xf32>
    %3 = tpu.concatenate %1, %2 in 1 : vector<128x32xf32>, vector<128x96xf32> -> vector<128x128xf32>
    %c32 = arith.constant 32 : index
    %c0_1 = arith.constant 0 : index
    %4 = vector.load %arg2[%c32, %c0_1] : memref<704x128xf32, #tpu.memory_space<vmem>>, vector<32x128xf32>
    %cst_2 = arith.constant dense<0.000000e+00> : vector<128x128xf32>
    %5 = tpu.matmul %1, %4, %cst_2 {dimension_numbers = #tpu.dot_dimension_numbers<[1], [0], [0], [1], [0, 0, 1, 1], [], []>} : vector<128x32xf32>, vector<32x128xf32>, vector<128x128xf32> -> vector<128x128xf32>
    %c0_3 = arith.constant 0 : index
    %c0_4 = arith.constant 0 : index
    %6 = vector.load %arg2[%c0_3, %c0_4] : memref<704x128xf32, #tpu.memory_space<vmem>>, vector<32x128xf32>
    %cst_5 = arith.constant dense<0.000000e+00> : vector<128x128xf32>
    %7 = tpu.matmul %1, %6, %cst_5 {dimension_numbers = #tpu.dot_dimension_numbers<[1], [0], [0], [1], [0, 0, 1, 1], [], []>} : vector<128x32xf32>, vector<32x128xf32>, vector<128x128xf32> -> vector<128x128xf32>
    %c0_6 = arith.constant 0 : index
    %c0_7 = arith.constant 0 : index
    %8 = vector.load %arg3[%c0_6, %c0_7] : memref<24x128xf32, #tpu.memory_space<vmem>>, vector<1x128xf32>
    %9 = vector.broadcast %8 : vector<1x128xf32> to vector<128x128xf32>
    %10 = arith.addf %7, %9 : vector<128x128xf32>
    %c1 = arith.constant 1 : index
    %c0_8 = arith.constant 0 : index
    %11 = vector.load %arg3[%c1, %c0_8] : memref<24x128xf32, #tpu.memory_space<vmem>>, vector<1x128xf32>
    %c2 = arith.constant 2 : index
    %c0_9 = arith.constant 0 : index
    %12 = vector.load %arg3[%c2, %c0_9] : memref<24x128xf32, #tpu.memory_space<vmem>>, vector<1x128xf32>
    %c64_i32 = arith.constant 64 : i32
    %13 = vector.broadcast %c64_i32 : i32 to vector<128x128xi32>
    %14 = arith.cmpi slt, %0, %13 : vector<128x128xi32>
    %cst_10 = arith.constant 0.000000e+00 : f32
    %15 = vector.broadcast %cst_10 : f32 to vector<128x128xf32>
    %16 = arith.select %14, %10, %15 : vector<128x128xi1>, vector<128x128xf32>
    %cst_11 = arith.constant dense<0.000000e+00> : vector<128xf32>
    %17 = vector.multi_reduction <add>, %16, %cst_11 [1] : vector<128x128xf32> to vector<128xf32>
    %18 = vector.shape_cast %17 : vector<128xf32> to vector<128x1xf32>
    %cst_12 = arith.constant 1.562500e-02 : f32
    %19 = vector.broadcast %cst_12 : f32 to vector<128x1xf32>
    %20 = arith.mulf %18, %19 : vector<128x1xf32>
    %21 = vector.broadcast %20 : vector<128x1xf32> to vector<128x128xf32>
    %22 = arith.subf %10, %21 : vector<128x128xf32>
    %cst_13 = arith.constant 0.000000e+00 : f32
    %23 = vector.broadcast %cst_13 : f32 to vector<128x128xf32>
    %24 = arith.select %14, %22, %23 : vector<128x128xi1>, vector<128x128xf32>
    %25 = arith.mulf %24, %24 : vector<128x128xf32>
    %cst_14 = arith.constant dense<0.000000e+00> : vector<128xf32>
    %26 = vector.multi_reduction <add>, %25, %cst_14 [1] : vector<128x128xf32> to vector<128xf32>
    %27 = vector.shape_cast %26 : vector<128xf32> to vector<128x1xf32>
    %cst_15 = arith.constant 1.562500e-02 : f32
    %28 = vector.broadcast %cst_15 : f32 to vector<128x1xf32>
    %29 = arith.mulf %27, %28 : vector<128x1xf32>
    %cst_16 = arith.constant 9.99999974E-6 : f32
    %30 = vector.broadcast %cst_16 : f32 to vector<128x1xf32>
    %31 = arith.addf %29, %30 : vector<128x1xf32>
    %32 = math.rsqrt %31 : vector<128x1xf32>
    %33 = vector.broadcast %32 : vector<128x1xf32> to vector<128x128xf32>
    %34 = arith.mulf %24, %33 : vector<128x128xf32>
    %35 = vector.broadcast %11 : vector<1x128xf32> to vector<128x128xf32>
    %36 = arith.mulf %34, %35 : vector<128x128xf32>
    %37 = vector.broadcast %12 : vector<1x128xf32> to vector<128x128xf32>
    %38 = arith.addf %36, %37 : vector<128x128xf32>
    %cst_17 = arith.constant 5.000000e-01 : f32
    %39 = vector.broadcast %cst_17 : f32 to vector<128x128xf32>
    %40 = arith.mulf %39, %38 : vector<128x128xf32>
    %cst_18 = arith.constant 0.707106769 : f32
    %41 = vector.broadcast %cst_18 : f32 to vector<128x128xf32>
    %42 = arith.mulf %38, %41 : vector<128x128xf32>
    %43 = math.erf %42 : vector<128x128xf32>
    %cst_19 = arith.constant 1.000000e+00 : f32
    %44 = vector.broadcast %cst_19 : f32 to vector<128x128xf32>
    %45 = arith.addf %44, %43 : vector<128x128xf32>
    %46 = arith.mulf %40, %45 : vector<128x128xf32>
    %c192 = arith.constant 192 : index
    %c0_20 = arith.constant 0 : index
    %47 = vector.load %arg2[%c192, %c0_20] : memref<704x128xf32, #tpu.memory_space<vmem>>, vector<128x128xf32>
    %cst_21 = arith.constant dense<0.000000e+00> : vector<128x128xf32>
    %48 = tpu.matmul %46, %47, %cst_21 {dimension_numbers = #tpu.dot_dimension_numbers<[1], [0], [0], [1], [0, 0, 1, 1], [], []>} : vector<128x128xf32>, vector<128x128xf32>, vector<128x128xf32> -> vector<128x128xf32>
    %49 = arith.addf %3, %48 : vector<128x128xf32>
    %50 = arith.addf %49, %5 : vector<128x128xf32>
    %c3 = arith.constant 3 : index
    %c0_22 = arith.constant 0 : index
    %51 = vector.load %arg3[%c3, %c0_22] : memref<24x128xf32, #tpu.memory_space<vmem>>, vector<1x128xf32>
    %52 = vector.broadcast %51 : vector<1x128xf32> to vector<128x128xf32>
    %53 = arith.addf %50, %52 : vector<128x128xf32>
    %c4 = arith.constant 4 : index
    %c0_23 = arith.constant 0 : index
    %54 = vector.load %arg3[%c4, %c0_23] : memref<24x128xf32, #tpu.memory_space<vmem>>, vector<1x128xf32>
    %c5 = arith.constant 5 : index
    %c0_24 = arith.constant 0 : index
    %55 = vector.load %arg3[%c5, %c0_24] : memref<24x128xf32, #tpu.memory_space<vmem>>, vector<1x128xf32>
    %c48_i32 = arith.constant 48 : i32
    %56 = vector.broadcast %c48_i32 : i32 to vector<128x128xi32>
    %57 = arith.cmpi slt, %0, %56 : vector<128x128xi32>
    %cst_25 = arith.constant 0.000000e+00 : f32
    %58 = vector.broadcast %cst_25 : f32 to vector<128x128xf32>
    %59 = arith.select %57, %53, %58 : vector<128x128xi1>, vector<128x128xf32>
    %cst_26 = arith.constant dense<0.000000e+00> : vector<128xf32>
    %60 = vector.multi_reduction <add>, %59, %cst_26 [1] : vector<128x128xf32> to vector<128xf32>
    %61 = vector.shape_cast %60 : vector<128xf32> to vector<128x1xf32>
    %cst_27 = arith.constant 0.020833334 : f32
    %62 = vector.broadcast %cst_27 : f32 to vector<128x1xf32>
    %63 = arith.mulf %61, %62 : vector<128x1xf32>
    %64 = vector.broadcast %63 : vector<128x1xf32> to vector<128x128xf32>
    %65 = arith.subf %53, %64 : vector<128x128xf32>
    %cst_28 = arith.constant 0.000000e+00 : f32
    %66 = vector.broadcast %cst_28 : f32 to vector<128x128xf32>
    %67 = arith.select %57, %65, %66 : vector<128x128xi1>, vector<128x128xf32>
    %68 = arith.mulf %67, %67 : vector<128x128xf32>
    %cst_29 = arith.constant dense<0.000000e+00> : vector<128xf32>
    %69 = vector.multi_reduction <add>, %68, %cst_29 [1] : vector<128x128xf32> to vector<128xf32>
    %70 = vector.shape_cast %69 : vector<128xf32> to vector<128x1xf32>
    %cst_30 = arith.constant 0.020833334 : f32
    %71 = vector.broadcast %cst_30 : f32 to vector<128x1xf32>
    %72 = arith.mulf %70, %71 : vector<128x1xf32>
    %cst_31 = arith.constant 9.99999974E-6 : f32
    %73 = vector.broadcast %cst_31 : f32 to vector<128x1xf32>
    %74 = arith.addf %72, %73 : vector<128x1xf32>
    %75 = math.rsqrt %74 : vector<128x1xf32>
    %76 = vector.broadcast %75 : vector<128x1xf32> to vector<128x128xf32>
    %77 = arith.mulf %67, %76 : vector<128x128xf32>
    %78 = vector.broadcast %54 : vector<1x128xf32> to vector<128x128xf32>
    %79 = arith.mulf %77, %78 : vector<128x128xf32>
    %80 = vector.broadcast %55 : vector<1x128xf32> to vector<128x128xf32>
    %81 = arith.addf %79, %80 : vector<128x128xf32>
    %cst_32 = arith.constant 5.000000e-01 : f32
    %82 = vector.broadcast %cst_32 : f32 to vector<128x128xf32>
    %83 = arith.mulf %82, %81 : vector<128x128xf32>
    %cst_33 = arith.constant 0.707106769 : f32
    %84 = vector.broadcast %cst_33 : f32 to vector<128x128xf32>
    %85 = arith.mulf %81, %84 : vector<128x128xf32>
    %86 = math.erf %85 : vector<128x128xf32>
    %cst_34 = arith.constant 1.000000e+00 : f32
    %87 = vector.broadcast %cst_34 : f32 to vector<128x128xf32>
    %88 = arith.addf %87, %86 : vector<128x128xf32>
    %89 = arith.mulf %83, %88 : vector<128x128xf32>
    %c64 = arith.constant 64 : index
    %c0_35 = arith.constant 0 : index
    %90 = vector.load %arg2[%c64, %c0_35] : memref<704x128xf32, #tpu.memory_space<vmem>>, vector<128x128xf32>
    %cst_36 = arith.constant dense<0.000000e+00> : vector<128x128xf32>
    %91 = tpu.matmul %89, %90, %cst_36 {dimension_numbers = #tpu.dot_dimension_numbers<[1], [0], [0], [1], [0, 0, 1, 1], [], []>} : vector<128x128xf32>, vector<128x128xf32>, vector<128x128xf32> -> vector<128x128xf32>
    %c6 = arith.constant 6 : index
    %c0_37 = arith.constant 0 : index
    %92 = vector.load %arg3[%c6, %c0_37] : memref<24x128xf32, #tpu.memory_space<vmem>>, vector<1x128xf32>
    %93 = vector.broadcast %92 : vector<1x128xf32> to vector<128x128xf32>
    %94 = arith.addf %91, %93 : vector<128x128xf32>
    %c7 = arith.constant 7 : index
    %c0_38 = arith.constant 0 : index
    %95 = vector.load %arg3[%c7, %c0_38] : memref<24x128xf32, #tpu.memory_space<vmem>>, vector<1x128xf32>
    %c8 = arith.constant 8 : index
    %c0_39 = arith.constant 0 : index
    %96 = vector.load %arg3[%c8, %c0_39] : memref<24x128xf32, #tpu.memory_space<vmem>>, vector<1x128xf32>
    %c96_i32 = arith.constant 96 : i32
    %97 = vector.broadcast %c96_i32 : i32 to vector<128x128xi32>
    %98 = arith.cmpi slt, %0, %97 : vector<128x128xi32>
    %cst_40 = arith.constant 0.000000e+00 : f32
    %99 = vector.broadcast %cst_40 : f32 to vector<128x128xf32>
    %100 = arith.select %98, %94, %99 : vector<128x128xi1>, vector<128x128xf32>
    %cst_41 = arith.constant dense<0.000000e+00> : vector<128xf32>
    %101 = vector.multi_reduction <add>, %100, %cst_41 [1] : vector<128x128xf32> to vector<128xf32>
    %102 = vector.shape_cast %101 : vector<128xf32> to vector<128x1xf32>
    %cst_42 = arith.constant 0.010416667 : f32
    %103 = vector.broadcast %cst_42 : f32 to vector<128x1xf32>
    %104 = arith.mulf %102, %103 : vector<128x1xf32>
    %105 = vector.broadcast %104 : vector<128x1xf32> to vector<128x128xf32>
    %106 = arith.subf %94, %105 : vector<128x128xf32>
    %cst_43 = arith.constant 0.000000e+00 : f32
    %107 = vector.broadcast %cst_43 : f32 to vector<128x128xf32>
    %108 = arith.select %98, %106, %107 : vector<128x128xi1>, vector<128x128xf32>
    %109 = arith.mulf %108, %108 : vector<128x128xf32>
    %cst_44 = arith.constant dense<0.000000e+00> : vector<128xf32>
    %110 = vector.multi_reduction <add>, %109, %cst_44 [1] : vector<128x128xf32> to vector<128xf32>
    %111 = vector.shape_cast %110 : vector<128xf32> to vector<128x1xf32>
    %cst_45 = arith.constant 0.010416667 : f32
    %112 = vector.broadcast %cst_45 : f32 to vector<128x1xf32>
    %113 = arith.mulf %111, %112 : vector<128x1xf32>
    %cst_46 = arith.constant 9.99999974E-6 : f32
    %114 = vector.broadcast %cst_46 : f32 to vector<128x1xf32>
    %115 = arith.addf %113, %114 : vector<128x1xf32>
    %116 = math.rsqrt %115 : vector<128x1xf32>
    %117 = vector.broadcast %116 : vector<128x1xf32> to vector<128x128xf32>
    %118 = arith.mulf %108, %117 : vector<128x128xf32>
    %119 = vector.broadcast %95 : vector<1x128xf32> to vector<128x128xf32>
    %120 = arith.mulf %118, %119 : vector<128x128xf32>
    %121 = vector.broadcast %96 : vector<1x128xf32> to vector<128x128xf32>
    %122 = arith.addf %120, %121 : vector<128x128xf32>
    %cst_47 = arith.constant 5.000000e-01 : f32
    %123 = vector.broadcast %cst_47 : f32 to vector<128x128xf32>
    %124 = arith.mulf %123, %122 : vector<128x128xf32>
    %cst_48 = arith.constant 0.707106769 : f32
    %125 = vector.broadcast %cst_48 : f32 to vector<128x128xf32>
    %126 = arith.mulf %122, %125 : vector<128x128xf32>
    %127 = math.erf %126 : vector<128x128xf32>
    %cst_49 = arith.constant 1.000000e+00 : f32
    %128 = vector.broadcast %cst_49 : f32 to vector<128x128xf32>
    %129 = arith.addf %128, %127 : vector<128x128xf32>
    %130 = arith.mulf %124, %129 : vector<128x128xf32>
    %c320 = arith.constant 320 : index
    %c0_50 = arith.constant 0 : index
    %131 = vector.load %arg2[%c320, %c0_50] : memref<704x128xf32, #tpu.memory_space<vmem>>, vector<128x128xf32>
    %cst_51 = arith.constant dense<0.000000e+00> : vector<128x128xf32>
    %132 = tpu.matmul %130, %131, %cst_51 {dimension_numbers = #tpu.dot_dimension_numbers<[1], [0], [0], [1], [0, 0, 1, 1], [], []>} : vector<128x128xf32>, vector<128x128xf32>, vector<128x128xf32> -> vector<128x128xf32>
    %c48_i32_52 = arith.constant 48 : i32
    %133 = vector.broadcast %c48_i32_52 : i32 to vector<128x128xi32>
    %134 = arith.cmpi sge, %0, %133 : vector<128x128xi32>
    %cst_53 = arith.constant 0.000000e+00 : f32
    %135 = vector.broadcast %cst_53 : f32 to vector<128x128xf32>
    %136 = arith.select %134, %5, %135 : vector<128x128xi1>, vector<128x128xf32>
    %137 = arith.addf %89, %132 : vector<128x128xf32>
    %138 = arith.addf %137, %136 : vector<128x128xf32>
    %c9 = arith.constant 9 : index
    %c0_54 = arith.constant 0 : index
    %139 = vector.load %arg3[%c9, %c0_54] : memref<24x128xf32, #tpu.memory_space<vmem>>, vector<1x128xf32>
    %140 = vector.broadcast %139 : vector<1x128xf32> to vector<128x128xf32>
    %141 = arith.addf %138, %140 : vector<128x128xf32>
    %c10 = arith.constant 10 : index
    %c0_55 = arith.constant 0 : index
    %142 = vector.load %arg3[%c10, %c0_55] : memref<24x128xf32, #tpu.memory_space<vmem>>, vector<1x128xf32>
    %c11 = arith.constant 11 : index
    %c0_56 = arith.constant 0 : index
    %143 = vector.load %arg3[%c11, %c0_56] : memref<24x128xf32, #tpu.memory_space<vmem>>, vector<1x128xf32>
    %c64_i32_57 = arith.constant 64 : i32
    %144 = vector.broadcast %c64_i32_57 : i32 to vector<128x128xi32>
    %145 = arith.cmpi slt, %0, %144 : vector<128x128xi32>
    %cst_58 = arith.constant 0.000000e+00 : f32
    %146 = vector.broadcast %cst_58 : f32 to vector<128x128xf32>
    %147 = arith.select %145, %141, %146 : vector<128x128xi1>, vector<128x128xf32>
    %cst_59 = arith.constant dense<0.000000e+00> : vector<128xf32>
    %148 = vector.multi_reduction <add>, %147, %cst_59 [1] : vector<128x128xf32> to vector<128xf32>
    %149 = vector.shape_cast %148 : vector<128xf32> to vector<128x1xf32>
    %cst_60 = arith.constant 1.562500e-02 : f32
    %150 = vector.broadcast %cst_60 : f32 to vector<128x1xf32>
    %151 = arith.mulf %149, %150 : vector<128x1xf32>
    %152 = vector.broadcast %151 : vector<128x1xf32> to vector<128x128xf32>
    %153 = arith.subf %141, %152 : vector<128x128xf32>
    %cst_61 = arith.constant 0.000000e+00 : f32
    %154 = vector.broadcast %cst_61 : f32 to vector<128x128xf32>
    %155 = arith.select %145, %153, %154 : vector<128x128xi1>, vector<128x128xf32>
    %156 = arith.mulf %155, %155 : vector<128x128xf32>
    %cst_62 = arith.constant dense<0.000000e+00> : vector<128xf32>
    %157 = vector.multi_reduction <add>, %156, %cst_62 [1] : vector<128x128xf32> to vector<128xf32>
    %158 = vector.shape_cast %157 : vector<128xf32> to vector<128x1xf32>
    %cst_63 = arith.constant 1.562500e-02 : f32
    %159 = vector.broadcast %cst_63 : f32 to vector<128x1xf32>
    %160 = arith.mulf %158, %159 : vector<128x1xf32>
    %cst_64 = arith.constant 9.99999974E-6 : f32
    %161 = vector.broadcast %cst_64 : f32 to vector<128x1xf32>
    %162 = arith.addf %160, %161 : vector<128x1xf32>
    %163 = math.rsqrt %162 : vector<128x1xf32>
    %164 = vector.broadcast %163 : vector<128x1xf32> to vector<128x128xf32>
    %165 = arith.mulf %155, %164 : vector<128x128xf32>
    %166 = vector.broadcast %142 : vector<1x128xf32> to vector<128x128xf32>
    %167 = arith.mulf %165, %166 : vector<128x128xf32>
    %168 = vector.broadcast %143 : vector<1x128xf32> to vector<128x128xf32>
    %169 = arith.addf %167, %168 : vector<128x128xf32>
    %cst_65 = arith.constant 5.000000e-01 : f32
    %170 = vector.broadcast %cst_65 : f32 to vector<128x128xf32>
    %171 = arith.mulf %170, %169 : vector<128x128xf32>
    %cst_66 = arith.constant 0.707106769 : f32
    %172 = vector.broadcast %cst_66 : f32 to vector<128x128xf32>
    %173 = arith.mulf %169, %172 : vector<128x128xf32>
    %174 = math.erf %173 : vector<128x128xf32>
    %cst_67 = arith.constant 1.000000e+00 : f32
    %175 = vector.broadcast %cst_67 : f32 to vector<128x128xf32>
    %176 = arith.addf %175, %174 : vector<128x128xf32>
    %177 = arith.mulf %171, %176 : vector<128x128xf32>
    %c448 = arith.constant 448 : index
    %c0_68 = arith.constant 0 : index
    %178 = vector.load %arg2[%c448, %c0_68] : memref<704x128xf32, #tpu.memory_space<vmem>>, vector<128x128xf32>
    %cst_69 = arith.constant dense<0.000000e+00> : vector<128x128xf32>
    %179 = tpu.matmul %177, %178, %cst_69 {dimension_numbers = #tpu.dot_dimension_numbers<[1], [0], [0], [1], [0, 0, 1, 1], [], []>} : vector<128x128xf32>, vector<128x128xf32>, vector<128x128xf32> -> vector<128x128xf32>
    %c12 = arith.constant 12 : index
    %c0_70 = arith.constant 0 : index
    %180 = vector.load %arg3[%c12, %c0_70] : memref<24x128xf32, #tpu.memory_space<vmem>>, vector<1x128xf32>
    %181 = vector.broadcast %180 : vector<1x128xf32> to vector<128x128xf32>
    %182 = arith.addf %179, %181 : vector<128x128xf32>
    %c13 = arith.constant 13 : index
    %c0_71 = arith.constant 0 : index
    %183 = vector.load %arg3[%c13, %c0_71] : memref<24x128xf32, #tpu.memory_space<vmem>>, vector<1x128xf32>
    %c14 = arith.constant 14 : index
    %c0_72 = arith.constant 0 : index
    %184 = vector.load %arg3[%c14, %c0_72] : memref<24x128xf32, #tpu.memory_space<vmem>>, vector<1x128xf32>
    %c32_i32 = arith.constant 32 : i32
    %185 = vector.broadcast %c32_i32 : i32 to vector<128x128xi32>
    %186 = arith.cmpi slt, %0, %185 : vector<128x128xi32>
    %cst_73 = arith.constant 0.000000e+00 : f32
    %187 = vector.broadcast %cst_73 : f32 to vector<128x128xf32>
    %188 = arith.select %186, %182, %187 : vector<128x128xi1>, vector<128x128xf32>
    %cst_74 = arith.constant dense<0.000000e+00> : vector<128xf32>
    %189 = vector.multi_reduction <add>, %188, %cst_74 [1] : vector<128x128xf32> to vector<128xf32>
    %190 = vector.shape_cast %189 : vector<128xf32> to vector<128x1xf32>
    %cst_75 = arith.constant 3.125000e-02 : f32
    %191 = vector.broadcast %cst_75 : f32 to vector<128x1xf32>
    %192 = arith.mulf %190, %191 : vector<128x1xf32>
    %193 = vector.broadcast %192 : vector<128x1xf32> to vector<128x128xf32>
    %194 = arith.subf %182, %193 : vector<128x128xf32>
    %cst_76 = arith.constant 0.000000e+00 : f32
    %195 = vector.broadcast %cst_76 : f32 to vector<128x128xf32>
    %196 = arith.select %186, %194, %195 : vector<128x128xi1>, vector<128x128xf32>
    %197 = arith.mulf %196, %196 : vector<128x128xf32>
    %cst_77 = arith.constant dense<0.000000e+00> : vector<128xf32>
    %198 = vector.multi_reduction <add>, %197, %cst_77 [1] : vector<128x128xf32> to vector<128xf32>
    %199 = vector.shape_cast %198 : vector<128xf32> to vector<128x1xf32>
    %cst_78 = arith.constant 3.125000e-02 : f32
    %200 = vector.broadcast %cst_78 : f32 to vector<128x1xf32>
    %201 = arith.mulf %199, %200 : vector<128x1xf32>
    %cst_79 = arith.constant 9.99999974E-6 : f32
    %202 = vector.broadcast %cst_79 : f32 to vector<128x1xf32>
    %203 = arith.addf %201, %202 : vector<128x1xf32>
    %204 = math.rsqrt %203 : vector<128x1xf32>
    %205 = vector.broadcast %204 : vector<128x1xf32> to vector<128x128xf32>
    %206 = arith.mulf %196, %205 : vector<128x128xf32>
    %207 = vector.broadcast %183 : vector<1x128xf32> to vector<128x128xf32>
    %208 = arith.mulf %206, %207 : vector<128x128xf32>
    %209 = vector.broadcast %184 : vector<1x128xf32> to vector<128x128xf32>
    %210 = arith.addf %208, %209 : vector<128x128xf32>
    %c15 = arith.constant 15 : index
    %c0_80 = arith.constant 0 : index
    %211 = vector.load %arg3[%c15, %c0_80] : memref<24x128xf32, #tpu.memory_space<vmem>>, vector<1x128xf32>
    %c16 = arith.constant 16 : index
    %c0_81 = arith.constant 0 : index
    %212 = vector.load %arg3[%c16, %c0_81] : memref<24x128xf32, #tpu.memory_space<vmem>>, vector<1x128xf32>
    %c32_i32_82 = arith.constant 32 : i32
    %213 = vector.broadcast %c32_i32_82 : i32 to vector<128x128xi32>
    %214 = arith.cmpi sge, %0, %213 : vector<128x128xi32>
    %c64_i32_83 = arith.constant 64 : i32
    %215 = vector.broadcast %c64_i32_83 : i32 to vector<128x128xi32>
    %216 = arith.cmpi slt, %0, %215 : vector<128x128xi32>
    %217 = arith.andi %214, %216 : vector<128x128xi1>
    %cst_84 = arith.constant 0.000000e+00 : f32
    %218 = vector.broadcast %cst_84 : f32 to vector<128x128xf32>
    %219 = arith.select %217, %182, %218 : vector<128x128xi1>, vector<128x128xf32>
    %cst_85 = arith.constant dense<0.000000e+00> : vector<128xf32>
    %220 = vector.multi_reduction <add>, %219, %cst_85 [1] : vector<128x128xf32> to vector<128xf32>
    %221 = vector.shape_cast %220 : vector<128xf32> to vector<128x1xf32>
    %cst_86 = arith.constant 3.125000e-02 : f32
    %222 = vector.broadcast %cst_86 : f32 to vector<128x1xf32>
    %223 = arith.mulf %221, %222 : vector<128x1xf32>
    %224 = vector.broadcast %223 : vector<128x1xf32> to vector<128x128xf32>
    %225 = arith.subf %182, %224 : vector<128x128xf32>
    %cst_87 = arith.constant 0.000000e+00 : f32
    %226 = vector.broadcast %cst_87 : f32 to vector<128x128xf32>
    %227 = arith.select %217, %225, %226 : vector<128x128xi1>, vector<128x128xf32>
    %228 = arith.mulf %227, %227 : vector<128x128xf32>
    %cst_88 = arith.constant dense<0.000000e+00> : vector<128xf32>
    %229 = vector.multi_reduction <add>, %228, %cst_88 [1] : vector<128x128xf32> to vector<128xf32>
    %230 = vector.shape_cast %229 : vector<128xf32> to vector<128x1xf32>
    %cst_89 = arith.constant 3.125000e-02 : f32
    %231 = vector.broadcast %cst_89 : f32 to vector<128x1xf32>
    %232 = arith.mulf %230, %231 : vector<128x1xf32>
    %cst_90 = arith.constant 9.99999974E-6 : f32
    %233 = vector.broadcast %cst_90 : f32 to vector<128x1xf32>
    %234 = arith.addf %232, %233 : vector<128x1xf32>
    %235 = math.rsqrt %234 : vector<128x1xf32>
    %236 = vector.broadcast %235 : vector<128x1xf32> to vector<128x128xf32>
    %237 = arith.mulf %227, %236 : vector<128x128xf32>
    %238 = vector.broadcast %211 : vector<1x128xf32> to vector<128x128xf32>
    %239 = arith.mulf %237, %238 : vector<128x128xf32>
    %240 = vector.broadcast %212 : vector<1x128xf32> to vector<128x128xf32>
    %241 = arith.addf %239, %240 : vector<128x128xf32>
    %242 = arith.addf %210, %241 : vector<128x128xf32>
    %cst_91 = arith.constant 5.000000e-01 : f32
    %243 = vector.broadcast %cst_91 : f32 to vector<128x128xf32>
    %244 = arith.mulf %243, %242 : vector<128x128xf32>
    %cst_92 = arith.constant 0.707106769 : f32
    %245 = vector.broadcast %cst_92 : f32 to vector<128x128xf32>
    %246 = arith.mulf %242, %245 : vector<128x128xf32>
    %247 = math.erf %246 : vector<128x128xf32>
    %cst_93 = arith.constant 1.000000e+00 : f32
    %248 = vector.broadcast %cst_93 : f32 to vector<128x128xf32>
    %249 = arith.addf %248, %247 : vector<128x128xf32>
    %250 = arith.mulf %244, %249 : vector<128x128xf32>
    %c576 = arith.constant 576 : index
    %c0_94 = arith.constant 0 : index
    %251 = vector.load %arg2[%c576, %c0_94] : memref<704x128xf32, #tpu.memory_space<vmem>>, vector<128x128xf32>
    %cst_95 = arith.constant dense<0.000000e+00> : vector<128x128xf32>
    %252 = tpu.matmul %250, %251, %cst_95 {dimension_numbers = #tpu.dot_dimension_numbers<[1], [0], [0], [1], [0, 0, 1, 1], [], []>} : vector<128x128xf32>, vector<128x128xf32>, vector<128x128xf32> -> vector<128x128xf32>
    %253 = arith.addf %252, %182 : vector<128x128xf32>
    %c17 = arith.constant 17 : index
    %c0_96 = arith.constant 0 : index
    %254 = vector.load %arg3[%c17, %c0_96] : memref<24x128xf32, #tpu.memory_space<vmem>>, vector<1x128xf32>
    %255 = vector.broadcast %254 : vector<1x128xf32> to vector<128x128xf32>
    %256 = arith.addf %253, %255 : vector<128x128xf32>
    %c0_97 = arith.constant 0 : index
    %c0_98 = arith.constant 0 : index
    %257 = vector.load %arg4[%c0_97, %c0_98] : memref<128x128xf32, #tpu.memory_space<vmem>>, vector<128x128xf32>
    tpu.vector_store %arg4[%c0_97, %c0_98], %256 {strides = array<i32>} : memref<128x128xf32, #tpu.memory_space<vmem>>, vector<128x128xf32>,
    return
  }
  func.func @transform_0(%arg0: i32) -> (i32, i32) {
    %c0_i32 = arith.constant 0 : i32
    %c0_i32_0 = arith.constant 0 : i32
    return %arg0, %c0_i32 : i32, i32
  }
  func.func @transform_1(%arg0: i32) -> (i32, i32) {
    %c0_i32 = arith.constant 0 : i32
    %c0_i32_0 = arith.constant 0 : i32
    %c0_i32_1 = arith.constant 0 : i32
    return %c0_i32, %c0_i32_0 : i32, i32
  }
  func.func @transform_2(%arg0: i32) -> (i32, i32) {
    %c0_i32 = arith.constant 0 : i32
    %c0_i32_0 = arith.constant 0 : i32
    %c0_i32_1 = arith.constant 0 : i32
    return %c0_i32, %c0_i32_0 : i32, i32
  }
  func.func @transform_3(%arg0: i32) -> (i32, i32) {
    %c0_i32 = arith.constant 0 : i32
    %c0_i32_0 = arith.constant 0 : i32
    return %arg0, %c0_i32 : i32, i32
  }
}

</mosaic_0001>

<bundles_post_ra>
// kernel: forward.1
= control target key start
LH: loop header
LB: loop body
LE: loop exit
PB: predicated region body
PF: predicated region fallthrough
CT: control target
= control target key end

     0   :  { %8 = vsyncpa [#allocation3], 0  ;;  %s4791_s12 = smov 0   ;;  %s6906_s0 = inlined_call_operand.vmem [shape: f32[256,32], index: 0, kind: input, shape index: {}]   ;;  %s6907_s1 = inlined_call_operand.hbm [shape: f32[704,128], index: 1, kind: input, shape index: {}]   ;;  %s6908_s2 = inlined_call_operand.vmem [shape: f32[24,128], index: 2, kind: input, shape index: {}]   ;;  %s6909_s3 = inlined_call_operand.vmem [shape: f32[256,128], index: 3, kind: output, shape index: {}]  }
   0x1 LB: > { %s3540_s13 = sadd.s32 4294967295, %s4766_s12   ;;  %p3542_p0 = scmp.ge.s32.totalorder %s4766_s12, 1  ;;  %s4766_s12 = sphi %s4791_s12, %s14_s12  }
   0x2   : > { %p113_p1 = scmp.lt.s32.totalorder %s4766_s12, 3  ;;  %s4768_s14 = smov [#allocation2]  }
   0x3   : > { %s125_s15 = sshll.u32 %s4768_s14, 4  ;;  %p4805_p3 = scmp.eq.s32.totalorder %s3540_s13, 0  ;;  %s126_s15 = int_to_ptr.vmem [resolvable:$true] %s125_s15 }
   0x4   : > { %p4799_p2 = pnand %p3542_p0, %p113_p1  ;;  %s4728_s21 = scalar_lea.hbm %s6907_s1, 11264 }
   0x5   : > { %s6926_s17 = scalar_select %p4805_p3, 1, 0 }
   0x6   : > { %s6925_s16 = scalar_select %p4799_p2, 1, 0 }
   0x7   : > { %p4343_p4 = pneg %p4799_p2  ;;  %p4729_p6 = scmp.ne.s32.totalorder %s6907_s1, %s4728_s21 }
   0x8   : > { %p4735_p10 = scmp.lt.u32.totalorder %s4728_s21, %s6907_s1 }
   0x9   : > { %p4813_p5 = pnand %p4805_p3, %p4343_p4 }
   0xb   : > { %p4730_p7 = pneg %p4813_p5 }
   0xd   : > { %p4731_p8 = pnand %p4730_p7, %p4729_p6 }
   0xf   : > { %p4732_p9 = pneg %p4731_p8 }
  0x11   : > { %p4737_p11 = pnand %p4735_p10, %p4732_p9 }
  0x13   : > { %4740 = shalt.err (!%p4737_p11)
}
  0x14   : > { %s4741_s26 = scalar_lea.vmem %s126_s15, 11264  ;;  %p4749_p1 = scmp.lt.s32.totalorder %s126_s15, %s126_s15 }
  0x15   : > { %p4742_p12 = scmp.ne.s32.totalorder %s126_s15, %s4741_s26  ;;  %p4750_p4 = scmp.lt.s32.totalorder %s4741_s26, %s4741_s26 }
  0x17   : > { %p4744_p13 = pnand %p4742_p12, %p4730_p7  ;;  %p4751_p3 = por %p4750_p4, %p4749_p1 }
  0x19   : > { %p4745_p0 = pneg %p4744_p13 }
  0x1b   : > { %p4752_p2 = pnand %p4751_p3, %p4745_p0 }
  0x1d   : > { %4755 = shalt.err (!%p4752_p2)
}
  0x1e   : > { %s4769_s27 = smov 128   ;;  %s4770_s28 = smov 8  }
  0x1f   : > { %4346 = dma.hbm_to_vmem [thread:$0]  (!%p4813_p5), %s6907_s1, 11264, %s126_s15, [#allocation3], %s4769_s27, %s4769_s27, %s4770_s28  }
  0x20   : > { %p6928_p6 = scmp.ne.s32.totalorder %s6925_s16, 0 }
  0x22   : > { %153 = sbr.rel (%p6928_p6) target bundleno = 3096 (0xc18), region = 32 }
  0x29   : > { %p6929_p8 = scmp.ne.s32.totalorder %s6926_s17, 0 }
  0x2b   : > { %4761 = dma.done.wait (%p6929_p8), [#allocation3], 11264  }
  0x2c   : > { %4763 = vsyncadd (%p6929_p8), [#allocation3], 4294956032  ;;  %s3547_s4 = sshll.u32 %s3540_s13, 4  ;;  %vm207_vm0 = vcmask 261120   ;;  %v421_v0 = vld [vmem:[#allocation2] sm:$0xff]  ;;  %v422_v1 = vld [vmem:[#allocation2 + $0x8] sm:$0xff]  ;;  %v189_v22 = vlaneseq }
  0x2d   : > { %p178_p2 = scmp.lt.s32.totalorder %s3547_s4, 31  ;;  %v423_v2 = vld [vmem:[#allocation2 + $0x10] sm:$0xff]  ;;  %v4155_v3 = vpack.c.bf16 %v422_v1, %v421_v0  ;;  %v424_v4 = vld [vmem:[#allocation2 + $0x18] sm:$0xff]  ;;  %v3567_v24 = vld [vmem:[%s6908_s2] ss:$0 sm:$0xff] }
  0x2e   : > { %v4159_v6 = vpack.c.bf16 %v424_v4, %v423_v2  ;;  %v4929_v23 = vand.u32 127, %v189_v22 }
  0x2f   : > { %s6957_s4 = smov (!%p178_p2, %s3547_s4), 31  ;;  %4156 = vmatprep.subr.bf16.mxu1 %v4155_v3 }
  0x30   : > { %s3548_s5 = sshll.u32 %s6957_s4, 3  ;;  %4158 = vmatpush3.bf16.msra.mxu1 %v4155_v3  ;;  %vm577_vm1 = vcmp.lt.s32.totalorder %v4929_v23, 64  ;;  %vm1122_vm2 = vcmp.lt.s32.totalorder %v4929_v23, 48  ;;  %vm1619_vm3 = vcmp.lt.s32.totalorder %v4929_v23, 96  ;;  %vm2109_vm4 = vcmp.ge.s32.totalorder %v4929_v23, 48 }
  0x31   : > { %s4849_s8 = scalar_lea.vmem %s6906_s0, %s3548_s5  ;;  %4160 = vmatprep.subr.bf16.mxu1 %v4159_v6  ;;  %vm2677_vm5 = vcmp.lt.s32.totalorder %v4929_v23, 32  ;;  %vm2928_vm6 = vcmp.ge.s32.totalorder %v4929_v23, 32  ;;  %s6870_s24 = scalar_lea.vmem %s6909_s3, %s3548_s5 }
  0x32   : > { %v191_v5 = vld [vmem:[%s4849_s8] sm:$0xff]  ;;  %v4855_v7 = vld [vmem:[%s4849_s8 + $0x8] sm:$0xff]  ;;  %v4858_v8 = vld [vmem:[%s4849_s8 + $0x10] sm:$0xff] }
  0x33   : > { %3843 = vmatprep.mubr.msk.f32.mxu1 %vm207_vm0, %v191_v5  ;;  %3811 = vmatprep.mubr.msk.f32.mxu0 %vm207_vm0, %v191_v5  ;;  %v4865_v9 = vld [vmem:[%s4849_s8 + $0x18] sm:$0xff]  ;;  %v4868_v10 = vld [vmem:[%s4849_s8 + $0x20] sm:$0xff]  ;;  %v4875_v11 = vld [vmem:[%s4849_s8 + $0x28] sm:$0xff] }
  0x34   : > { %4162 = vmatpush3.bf16.msra.mxu1 %v4159_v6  ;;  %v4878_v12 = vld [vmem:[%s4849_s8 + $0x30] sm:$0xff]  ;;  %v4885_v13 = vld [vmem:[%s4849_s8 + $0x38] sm:$0xff]  ;;  %v4888_v14 = vld [vmem:[%s4849_s8 + $0x40] sm:$0xff] }
  0x35   : > { %v4895_v15 = vld [vmem:[%s4849_s8 + $0x48] sm:$0xff]  ;;  %v4898_v16 = vld [vmem:[%s4849_s8 + $0x50] sm:$0xff]  ;;  %v4905_v17 = vld [vmem:[%s4849_s8 + $0x58] sm:$0xff] }
  0x36   : > { %v4908_v18 = vld [vmem:[%s4849_s8 + $0x60] sm:$0xff]  ;;  %v4915_v19 = vld [vmem:[%s4849_s8 + $0x68] sm:$0xff]  ;;  %v4918_v20 = vld [vmem:[%s4849_s8 + $0x70] sm:$0xff] }
  0x37   : > { %3844 = vmatmul.mubr.msk.f32.vlgmr.msra.gmra.mrb[0].mxu1 %vm207_vm0, %v4855_v7  ;;  %v4925_v21 = vld [vmem:[%s4849_s8 + $0x78] sm:$0xff]  ;;  %vm6356_vm7 = vmand %vm2928_vm6, %vm577_vm1 }
  0x38   : > { %3846 = vmatprep.mubr.msk.f32.mxu1 %vm207_vm0, %v4858_v8 }
  0x3b   : > { %3847 = vmatmul.mubr.msk.f32.gmra.mrb[2].mxu1 %vm207_vm0, %v4865_v9 }
  0x3c   : > { %3849 = vmatprep.mubr.msk.f32.mxu1 %vm207_vm0, %v4868_v10 }
  0x3f   : > { %3850 = vmatmul.mubr.msk.f32.gmra.mrb[4].mxu1 %vm207_vm0, %v4875_v11 }
  0x40   : > { %3852 = vmatprep.mubr.msk.f32.mxu1 %vm207_vm0, %v4878_v12 }
  0x43   : > { %3853 = vmatmul.mubr.msk.f32.gmra.mrb[6].mxu1 %vm207_vm0, %v4885_v13 }
  0x44   : > { %3855 = vmatprep.mubr.msk.f32.mxu1 %vm207_vm0, %v4888_v14 }
  0x47   : > { %3856 = vmatmul.mubr.msk.f32.gmra.mrb[8].mxu1 %vm207_vm0, %v4895_v15 }
  0x48   : > { %3858 = vmatprep.mubr.msk.f32.mxu1 %vm207_vm0, %v4898_v16 }
  0x4b   : > { %3859 = vmatmul.mubr.msk.f32.gmra.mrb[10].mxu1 %vm207_vm0, %v4905_v17 }
  0x4c   : > { %3861 = vmatprep.mubr.msk.f32.mxu1 %vm207_vm0, %v4908_v18 }
  0x4f   : > { %3862 = vmatmul.mubr.msk.f32.gmra.mrb[12].mxu1 %vm207_vm0, %v4915_v19 }
  0x50   : > { %3864 = vmatprep.mubr.msk.f32.mxu1 %vm207_vm0, %v4918_v20 }
  0x53   : > { %3865 = vmatmul.mubr.msk.f32.gmra.mrb[14].mxu1 %vm207_vm0, %v4925_v21 }
 0x10a   : > { %v3845_v25 = vpop.f32.mrb[0].mxu1 }
 0x10b   : > { %v496_v26 = vpop.f32.mrb[1].mxu1  ;;  %v4937_v28 = vadd.f32 %v3845_v25, %v3567_v24 }
 0x10c   : > { %v4935_v27 = vadd.f32 %v3567_v24, %v496_v26 }
 0x10d   : > { %v579_v36 = vsel %vm577_vm1, %v4937_v28, 0.0 }
 0x10e   : > { %v3848_v29 = vpop.f32.mrb[2].mxu1  ;;  %v578_v30 = vsel %vm577_vm1, %v4935_v27, 0.0 }
 0x10f   : > { %v506_v31 = vpop.f32.mrb[3].mxu1  ;;  %594 = vadd.xlane.f32.xlu0 %v578_v30  ;;  %v4944_v33 = vadd.f32 %v3848_v29, %v3567_v24 }
 0x110   : > { %v4942_v32 = vadd.f32 %v3567_v24, %v506_v31 }
 0x111   : > { %v581_v41 = vsel %vm577_vm1, %v4944_v33, 0.0 }
 0x112   : > { %v3851_v34 = vpop.f32.mrb[4].mxu1  ;;  %v580_v35 = vsel %vm577_vm1, %v4942_v32, 0.0 }
 0x113   : > { %v516_v37 = vpop.f32.mrb[5].mxu1  ;;  %598 = vadd.xlane.f32.xlu1 %v580_v35  ;;  %596 = vadd.xlane.f32.xlu0 %v579_v36  ;;  %v4954_v39 = vadd.f32 %v3851_v34, %v3567_v24 }
 0x114   : > { %v4952_v38 = vadd.f32 %v3567_v24, %v516_v37 }
 0x115   : > { %v583_v47 = vsel %vm577_vm1, %v4954_v39, 0.0 }
 0x116   : > { %v3854_v40 = vpop.f32.mrb[6].mxu1  ;;  %v582_v42 = vsel %vm577_vm1, %v4952_v38, 0.0 }
 0x117   : > { %v526_v43 = vpop.f32.mrb[7].mxu1  ;;  %600 = vadd.xlane.f32.xlu1 %v581_v41  ;;  %602 = vadd.xlane.f32.xlu0 %v582_v42  ;;  %v4964_v45 = vadd.f32 %v3854_v40, %v3567_v24 }
 0x118   : > { %v4962_v44 = vadd.f32 %v3567_v24, %v526_v43 }
 0x119   : > { %v585_v53 = vsel %vm577_vm1, %v4964_v45, 0.0 }
 0x11a   : > { %v3857_v46 = vpop.f32.mrb[8].mxu1  ;;  %v584_v48 = vsel %vm577_vm1, %v4962_v44, 0.0 }
 0x11b   : > { %v536_v49 = vpop.f32.mrb[9].mxu1  ;;  %604 = vadd.xlane.f32.xlu1 %v583_v47  ;;  %606 = vadd.xlane.f32.xlu0 %v584_v48  ;;  %v4974_v51 = vadd.f32 %v3857_v46, %v3567_v24 }
 0x11c   : > { %v4972_v50 = vadd.f32 %v3567_v24, %v536_v49 }
 0x11d   : > { %v587_v59 = vsel %vm577_vm1, %v4974_v51, 0.0 }
 0x11e   : > { %v3860_v52 = vpop.f32.mrb[10].mxu1  ;;  %v586_v54 = vsel %vm577_vm1, %v4972_v50, 0.0 }
 0x11f   : > { %v546_v55 = vpop.f32.mrb[11].mxu1  ;;  %608 = vadd.xlane.f32.xlu1 %v585_v53  ;;  %610 = vadd.xlane.f32.xlu0 %v586_v54  ;;  %v4982_v56 = vadd.f32 %v3860_v52, %v3567_v24 }
 0x120   : > { %v4984_v57 = vadd.f32 %v3567_v24, %v546_v55 }
 0x121   : > { %v589_v0 = vsel %vm577_vm1, %v4982_v56, 0.0 }
 0x122   : > { %v3863_v58 = vpop.f32.mrb[12].mxu1  ;;  %v588_v60 = vsel %vm577_vm1, %v4984_v57, 0.0 }
 0x123   : > { %v556_v61 = vpop.f32.mrb[13].mxu1  ;;  %612 = vadd.xlane.f32.xlu1 %v587_v59  ;;  %614 = vadd.xlane.f32.xlu0 %v588_v60  ;;  %v4992_v62 = vadd.f32 %v3863_v58, %v3567_v24 }
 0x124   : > { %v4994_v63 = vadd.f32 %v3567_v24, %v556_v61 }
 0x125   : > { %v591_v6 = vsel %vm577_vm1, %v4992_v62, 0.0 }
 0x126   : > { %v3866_v1 = vpop.f32.mrb[14].mxu1  ;;  %v590_v2 = vsel %vm577_vm1, %v4994_v63, 0.0 }
 0x127   : > { %v566_v3 = vpop.f32.mrb[15].mxu1  ;;  %616 = vadd.xlane.f32.xlu1 %v589_v0  ;;  %618 = vadd.xlane.f32.xlu0 %v590_v2  ;;  %v5002_v4 = vadd.f32 %v3866_v1, %v3567_v24 }
 0x128   : > { %v5004_v5 = vadd.f32 %v3567_v24, %v566_v3 }
 0x129   : > { %v593_v25 = vsel %vm577_vm1, %v5002_v4, 0.0 }
 0x12a   : > { %v592_v22 = vsel %vm577_vm1, %v5004_v5, 0.0 }
 0x12b   : > { %620 = vadd.xlane.f32.xlu1 %v591_v6  ;;  %622 = vadd.xlane.f32.xlu0 %v592_v22 }
 0x12f   : > { %624 = vadd.xlane.f32.xlu1 %v593_v25 }
 0x19c   : > { %v595_v26 = vpop.xlane.xlu0 %594 }
 0x19d   : > { %v626_v29 = vmul.f32 0.015625, %v595_v26 }
 0x19f   : > { %v642_v24 = vsub.f32 %v4935_v27, %v626_v29 }
 0x1a0   : > { %v599_v30 = vpop.xlane.xlu1 %598  ;;  %v597_v31 = vpop.xlane.xlu0 %596 }
 0x1a1   : > { %v628_v34 = vmul.f32 0.015625, %v599_v30  ;;  %v627_v35 = vmul.f32 0.015625, %v597_v31  ;;  %v5018_v36 = vsel %vm577_vm1, %v642_v24, 0.0  ;;  %v224_v31 = vld [vmem:[#allocation2 + $0x20] sm:$0xff] }
 0x1a2   : > { %v674_v37 = vmul.f32 %v5018_v36, %v5018_v36 }
 0x1a3   : > { %v644_v40 = vsub.f32 %v4942_v32, %v628_v34  ;;  %v643_v41 = vsub.f32 %v4937_v28, %v627_v35  ;;  %v225_v34 = vld [vmem:[#allocation2 + $0x28] sm:$0xff] }
 0x1a4   : > { %v601_v42 = vpop.xlane.xlu1 %600  ;;  %690 = vadd.xlane.f32.xlu0 %v674_v37  ;;  %v603_v43 = vpop.xlane.xlu0 %602 }
 0x1a5   : > { %v629_v46 = vmul.f32 0.015625, %v601_v42  ;;  %v630_v27 = vmul.f32 0.015625, %v603_v43  ;;  %v5026_v47 = vsel %vm577_vm1, %v644_v40, 0.0  ;;  %v5030_v48 = vsel %vm577_vm1, %v643_v41, 0.0 }
 0x1a6   : > { %v676_v49 = vmul.f32 %v5026_v47, %v5026_v47  ;;  %v675_v32 = vmul.f32 %v5030_v48, %v5030_v48  ;;  %v4147_v42 = vpack.c.bf16 %v225_v34, %v224_v31 }
 0x1a7   : > { %v645_v28 = vsub.f32 %v4944_v33, %v629_v46  ;;  %v646_v52 = vsub.f32 %v4952_v38, %v630_v27 }
 0x1a8   : > { %v605_v53 = vpop.xlane.xlu1 %604  ;;  %694 = vadd.xlane.f32.xlu0 %v676_v49  ;;  %692 = vadd.xlane.f32.xlu1 %v675_v32  ;;  %v607_v54 = vpop.xlane.xlu0 %606 }
 0x1a9   : > { %v631_v55 = vmul.f32 0.015625, %v605_v53  ;;  %v632_v58 = vmul.f32 0.015625, %v607_v54  ;;  %v5040_v59 = vsel %vm577_vm1, %v645_v28, 0.0  ;;  %v5044_v60 = vsel %vm577_vm1, %v646_v52, 0.0  ;;  %4148 = vmatprep.subr.bf16.mxu0 %v4147_v42  ;;  %v226_v54 = vld [vmem:[#allocation2 + $0x30] sm:$0xff] }
 0x1aa   : > { %v677_v61 = vmul.f32 %v5040_v59, %v5040_v59  ;;  %v678_v33 = vmul.f32 %v5044_v60, %v5044_v60  ;;  %4150 = vmatpush3.bf16.msra.mxu0 %v4147_v42 }
 0x1ab   : > { %v647_v38 = vsub.f32 %v4954_v39, %v631_v55  ;;  %v648_v0 = vsub.f32 %v4962_v44, %v632_v58  ;;  %v227_v55 = vld [vmem:[#allocation2 + $0x38] sm:$0xff] }
 0x1ac   : > { %v609_v1 = vpop.xlane.xlu1 %608  ;;  %696 = vadd.xlane.f32.xlu1 %v677_v61  ;;  %698 = vadd.xlane.f32.xlu0 %v678_v33  ;;  %v611_v2 = vpop.xlane.xlu0 %610  ;;  %v4151_v58 = vpack.c.bf16 %v227_v55, %v226_v54 }
 0x1ad   : > { %v633_v3 = vmul.f32 0.015625, %v609_v1  ;;  %v634_v6 = vmul.f32 0.015625, %v611_v2  ;;  %v5054_v22 = vsel %vm577_vm1, %v647_v38, 0.0  ;;  %v5058_v25 = vsel %vm577_vm1, %v648_v0, 0.0 }
 0x1ae   : > { %v679_v26 = vmul.f32 %v5054_v22, %v5054_v22  ;;  %v680_v39 = vmul.f32 %v5058_v25, %v5058_v25  ;;  %4152 = vmatprep.subr.bf16.mxu0 %v4151_v58 }
 0x1af   : > { %v649_v44 = vsub.f32 %v4964_v45, %v633_v3  ;;  %v650_v29 = vsub.f32 %v4972_v50, %v634_v6  ;;  %4154 = vmatpush3.bf16.msra.mxu0 %v4151_v58 }
 0x1b0   : > { %v613_v24 = vpop.xlane.xlu1 %612  ;;  %700 = vadd.xlane.f32.xlu1 %v679_v26  ;;  %702 = vadd.xlane.f32.xlu0 %v680_v39  ;;  %v615_v30 = vpop.xlane.xlu0 %614  ;;  %v906_v26 = vld [vmem:[#allocation2 + $0xc0] sm:$0xff]  ;;  %v907_v39 = vld [vmem:[#allocation2 + $0xc8] sm:$0xff] }
 0x1b1   : > { %v635_v35 = vmul.f32 0.015625, %v613_v24  ;;  %v636_v37 = vmul.f32 0.015625, %v615_v30  ;;  %v5068_v40 = vsel %vm577_vm1, %v649_v44, 0.0  ;;  %v5072_v41 = vsel %vm577_vm1, %v650_v29, 0.0 }
 0x1b2   : > { %v681_v45 = vmul.f32 %v5068_v40, %v5068_v40  ;;  %v682_v50 = vmul.f32 %v5072_v41, %v5072_v41  ;;  %v4163_v24 = vpack.c.bf16 %v907_v39, %v906_v26  ;;  %3812 = vmatmul.mubr.msk.f32.vlgmr.msra.gmra.mrb[0].mxu0 %vm207_vm0, %v4855_v7 }
 0x1b3   : > { %v651_v43 = vsub.f32 %v4974_v51, %v635_v35  ;;  %v652_v46 = vsub.f32 %v4984_v57, %v636_v37  ;;  %3814 = vmatprep.mubr.msk.f32.mxu0 %vm207_vm0, %v4858_v8  ;;  %v908_v37 = vld [vmem:[#allocation2 + $0xd0] sm:$0xff]  ;;  %v910_v8 = vld [vmem:[#allocation2 + $0xe0] sm:$0xff] }
 0x1b4   : > { %v617_v27 = vpop.xlane.xlu1 %616  ;;  %704 = vadd.xlane.f32.xlu1 %v681_v45  ;;  %706 = vadd.xlane.f32.xlu0 %v682_v50  ;;  %v619_v49 = vpop.xlane.xlu0 %618  ;;  %v909_v45 = vld [vmem:[#allocation2 + $0xd8] sm:$0xff] }
 0x1b5   : > { %v637_v32 = vmul.f32 0.015625, %v617_v27  ;;  %v638_v28 = vmul.f32 0.015625, %v619_v49  ;;  %v5082_v52 = vsel %vm577_vm1, %v651_v43, 0.0  ;;  %v5086_v53 = vsel %vm577_vm1, %v652_v46, 0.0  ;;  %4164 = vmatprep.subr.bf16.mxu0 %v4163_v24  ;;  %v913_v27 = vld [vmem:[#allocation2 + $0xf8] sm:$0xff] }
 0x1b6   : > { %v683_v51 = vmul.f32 %v5082_v52, %v5082_v52  ;;  %v684_v57 = vmul.f32 %v5086_v53, %v5086_v53  ;;  %4166 = vmatpush3.bf16.msra.mxu0 %v4163_v24  ;;  %v4167_v42 = vpack.c.bf16 %v909_v45, %v908_v37 }
 0x1b7   : > { %v653_v61 = vsub.f32 %v4982_v56, %v637_v32  ;;  %v654_v33 = vsub.f32 %v4994_v63, %v638_v28  ;;  %3815 = vmatmul.mubr.msk.f32.gmra.mrb[2].mxu0 %vm207_vm0, %v4865_v9  ;;  %v912_v9 = vld [vmem:[#allocation2 + $0xf0] sm:$0xff]  ;;  %v915_v32 = vld [vmem:[#allocation2 + $0x108] sm:$0xff] }
 0x1b8   : > { %v621_v38 = vpop.xlane.xlu1 %620  ;;  %708 = vadd.xlane.f32.xlu1 %v683_v51  ;;  %710 = vadd.xlane.f32.xlu0 %v684_v57  ;;  %v623_v0 = vpop.xlane.xlu0 %622  ;;  %v4175_v49 = vpack.c.bf16 %v913_v27, %v912_v9 }
 0x1b9   : > { %v639_v1 = vmul.f32 0.015625, %v621_v38  ;;  %v640_v2 = vmul.f32 0.015625, %v623_v0  ;;  %v5096_v3 = vsel %vm577_vm1, %v653_v61, 0.0  ;;  %v5100_v6 = vsel %vm577_vm1, %v654_v33, 0.0  ;;  %4168 = vmatprep.subr.bf16.mxu0 %v4167_v42  ;;  %3817 = vmatprep.mubr.msk.f32.mxu0 %vm207_vm0, %v4868_v10  ;;  %v914_v10 = vld [vmem:[#allocation2 + $0x100] sm:$0xff] }
 0x1ba   : > { %v685_v56 = vmul.f32 %v5096_v3, %v5096_v3  ;;  %v686_v63 = vmul.f32 %v5100_v6, %v5100_v6  ;;  %4170 = vmatpush3.bf16.msra.mxu0 %v4167_v42  ;;  %v4179_v28 = vpack.c.bf16 %v915_v32, %v914_v10 }
 0x1bb   : > { %v655_v44 = vsub.f32 %v4992_v62, %v639_v1  ;;  %v656_v29 = vsub.f32 %v5004_v5, %v640_v2  ;;  %3818 = vmatmul.mubr.msk.f32.gmra.mrb[4].mxu0 %vm207_vm0, %v4875_v11  ;;  %v916_v11 = vld [vmem:[#allocation2 + $0x110] sm:$0xff] }
 0x1bc   : > { %v625_v30 = vpop.xlane.xlu1 %624  ;;  %712 = vadd.xlane.f32.xlu1 %v685_v56  ;;  %714 = vadd.xlane.f32.xlu0 %v686_v63 }
 0x1bd   : > { %v641_v31 = vmul.f32 0.015625, %v625_v30  ;;  %v5110_v34 = vsel %vm577_vm1, %v655_v44, 0.0  ;;  %v5114_v35 = vsel %vm577_vm1, %v656_v29, 0.0  ;;  %3820 = vmatprep.mubr.msk.f32.mxu0 %vm207_vm0, %v4878_v12  ;;  %v917_v12 = vld [vmem:[#allocation2 + $0x118] sm:$0xff]  ;;  %v5160_v30 = vld [vmem:[%s6908_s2 + $0x1] ss:$0 sm:$0xff] }
 0x1be   : > { %v687_v62 = vmul.f32 %v5110_v34, %v5110_v34  ;;  %v688_v5 = vmul.f32 %v5114_v35, %v5114_v35  ;;  %v4183_v54 = vpack.c.bf16 %v917_v12, %v916_v11 }
 0x1bf   : > { %v657_v50 = vsub.f32 %v5002_v4, %v641_v31  ;;  %v911_v4 = vld [vmem:[#allocation2 + $0xe8] sm:$0xff]  ;;  %3821 = vmatmul.mubr.msk.f32.gmra.mrb[6].mxu0 %vm207_vm0, %v4885_v13  ;;  %v918_v13 = vld [vmem:[#allocation2 + $0x120] sm:$0xff] }
 0x1c0   : > { %716 = vadd.xlane.f32.xlu1 %v687_v62  ;;  %718 = vadd.xlane.f32.xlu0 %v688_v5  ;;  %v4171_v46 = vpack.c.bf16 %v911_v4, %v910_v8 }
 0x1c1   : > { %v5127_v7 = vsel %vm577_vm1, %v657_v50, 0.0  ;;  %3823 = vmatprep.mubr.msk.f32.mxu0 %vm207_vm0, %v4888_v14  ;;  %v919_v14 = vld [vmem:[#allocation2 + $0x128] sm:$0xff] }
 0x1c2   : > { %v689_v43 = vmul.f32 %v5127_v7, %v5127_v7  ;;  %4172 = vmatprep.subr.bf16.mxu0 %v4171_v46  ;;  %v4187_v55 = vpack.c.bf16 %v919_v14, %v918_v13 }
 0x1c3   : > { %4174 = vmatpush3.bf16.msra.mxu0 %v4171_v46 }
 0x1c4   : > { %720 = vadd.xlane.f32.xlu1 %v689_v43  ;;  %4176 = vmatprep.subr.bf16.mxu0 %v4175_v49  ;;  %v5166_v43 = vld [vmem:[%s6908_s2 + $0x2] ss:$0 sm:$0xff] }
 0x1c5   : > { %3824 = vmatmul.mubr.msk.f32.gmra.mrb[8].mxu0 %vm207_vm0, %v4895_v15  ;;  %v920_v15 = vld [vmem:[#allocation2 + $0x130] sm:$0xff] }
 0x1c6   : > { %3826 = vmatprep.mubr.msk.f32.mxu0 %vm207_vm0, %v4898_v16  ;;  %v921_v16 = vld [vmem:[#allocation2 + $0x138] sm:$0xff] }
 0x1c7   : > { %4178 = vmatpush3.bf16.msra.mxu0 %v4175_v49  ;;  %v4191_v51 = vpack.c.bf16 %v921_v16, %v920_v15 }
 0x1c8   : > { %4180 = vmatprep.subr.bf16.mxu0 %v4179_v28 }
 0x1c9   : > { %3827 = vmatmul.mubr.msk.f32.gmra.mrb[10].mxu0 %vm207_vm0, %v4905_v17 }
 0x1ca   : > { %3829 = vmatprep.mubr.msk.f32.mxu0 %vm207_vm0, %v4908_v18 }
 0x1cb   : > { %4182 = vmatpush3.bf16.msra.mxu0 %v4179_v28 }
 0x1cc   : > { %4184 = vmatprep.subr.bf16.mxu0 %v4183_v54 }
 0x1cd   : > { %3830 = vmatmul.mubr.msk.f32.gmra.mrb[12].mxu0 %vm207_vm0, %v4915_v19 }
 0x1ce   : > { %3832 = vmatprep.mubr.msk.f32.mxu0 %vm207_vm0, %v4918_v20 }
 0x1cf   : > { %4186 = vmatpush3.bf16.msra.mxu0 %v4183_v54 }
 0x1d0   : > { %4188 = vmatprep.subr.bf16.mxu0 %v4187_v55 }
 0x1d1   : > { %3833 = vmatmul.mubr.msk.f32.gmra.mrb[14].mxu0 %vm207_vm0, %v4925_v21 }
 0x1d3   : > { %4190 = vmatpush3.bf16.msra.mxu0 %v4187_v55 }
 0x1d4   : > { %4192 = vmatprep.subr.bf16.mxu0 %v4191_v51 }
 0x1d7   : > { %4194 = vmatpush3.bf16.msra.mxu0 %v4191_v51 }
 0x231   : > { %v691_v17 = vpop.xlane.xlu0 %690 }
 0x232   : > { %v722_v18 = vmul.f32 0.015625, %v691_v17 }
 0x234   : > { %v738_v57 = vadd.f32 1e-05, %v722_v18 }
 0x235   : > { %v693_v58 = vpop.xlane.xlu1 %692  ;;  %v695_v61 = vpop.xlane.xlu0 %694 }
 0x236   : > { %4360 = vrsqrt.f32 %v738_v57  ;;  %v723_v19 = vmul.f32 0.015625, %v693_v58  ;;  %v724_v33 = vmul.f32 0.015625, %v695_v61 }
 0x238   : > { %v739_v38 = vadd.f32 1e-05, %v723_v19  ;;  %v740_v0 = vadd.f32 1e-05, %v724_v33 }
 0x239   : > { %v697_v1 = vpop.xlane.xlu1 %696  ;;  %v699_v20 = vpop.xlane.xlu0 %698 }
 0x23a   : > { %4362 = vrsqrt.f32 %v739_v38  ;;  %v725_v2 = vmul.f32 0.015625, %v697_v1  ;;  %v726_v56 = vmul.f32 0.015625, %v699_v20 }
 0x23b   : > { %4364 = vrsqrt.f32 %v740_v0 }
 0x23c   : > { %v741_v63 = vadd.f32 1e-05, %v725_v2  ;;  %v742_v21 = vadd.f32 1e-05, %v726_v56 }
 0x23d   : > { %v701_v26 = vpop.xlane.xlu1 %700  ;;  %v703_v39 = vpop.xlane.xlu0 %702 }
 0x23e   : > { %4366 = vrsqrt.f32 %v741_v63  ;;  %v727_v44 = vmul.f32 0.015625, %v701_v26  ;;  %v728_v29 = vmul.f32 0.015625, %v703_v39 }
 0x23f   : > { %4368 = vrsqrt.f32 %v742_v21 }
 0x240   : > { %v4361_v24 = vpop.eup %4360  ;;  %v743_v31 = vadd.f32 1e-05, %v727_v44  ;;  %v744_v62 = vadd.f32 1e-05, %v728_v29 }
 0x241   : > { %v705_v5 = vpop.xlane.xlu1 %704  ;;  %v707_v37 = vpop.xlane.xlu0 %706  ;;  %v770_v45 = vmul.f32 %v4361_v24, %v5018_v36 }
 0x242   : > { %4370 = vrsqrt.f32 %v743_v31  ;;  %v729_v50 = vmul.f32 0.015625, %v705_v5  ;;  %v730_v42 = vmul.f32 0.015625, %v707_v37 }
 0x243   : > { %v790_v8 = vmul.f32 %v5160_v30, %v770_v45  ;;  %4372 = vrsqrt.f32 %v744_v62 }
 0x244   : > { %v4363_v4 = vpop.eup %4362  ;;  %v745_v46 = vadd.f32 1e-05, %v729_v50  ;;  %v746_v9 = vadd.f32 1e-05, %v730_v42 }
 0x245   : > { %v4365_v27 = vpop.eup %4364  ;;  %v771_v49 = vmul.f32 %v4363_v4, %v5030_v48  ;;  %v709_v10 = vpop.xlane.xlu1 %708  ;;  %v810_v36 = vadd.f32 %v5166_v43, %v790_v8 }
 0x246   : > { %v711_v32 = vpop.xlane.xlu0 %710  ;;  %4374 = vrsqrt.f32 %v745_v46  ;;  %v731_v28 = vmul.f32 0.015625, %v709_v10  ;;  %v772_v12 = vmul.f32 %v4365_v27, %v5026_v47 }
 0x247   : > { %v732_v11 = vmul.f32 0.015625, %v711_v32  ;;  %v791_v54 = vmul.f32 %v5160_v30, %v771_v49  ;;  %v842_v13 = vmul.f32 0.70710677, %v810_v36  ;;  %4376 = vrsqrt.f32 %v746_v9 }
 0x248   : > { %v4367_v14 = vpop.eup %4366  ;;  %v747_v55 = vadd.f32 1e-05, %v731_v28  ;;  %v792_v16 = vmul.f32 %v5160_v30, %v772_v12  ;;  %v826_v27 = vmul.f32 0.5, %v810_v36 }
 0x249   : > { %v748_v15 = vadd.f32 1e-05, %v732_v11  ;;  %v4369_v51 = vpop.eup %4368  ;;  %v713_v48 = vpop.xlane.xlu1 %712  ;;  %4378 = verf.f32 %v842_v13  ;;  %v5175_v18 = vadd.f32 %v5166_v43, %v791_v54  ;;  %v773_v57 = vmul.f32 %v4367_v14, %v5040_v59 }
 0x24a   : > { %v715_v17 = vpop.xlane.xlu0 %714  ;;  %4380 = vrsqrt.f32 %v747_v55  ;;  %v733_v47 = vmul.f32 0.015625, %v713_v48  ;;  %v5179_v61 = vadd.f32 %v5166_v43, %v792_v16  ;;  %v774_v20 = vmul.f32 %v4369_v51, %v5044_v60 }
 0x24b   : > { %v734_v58 = vmul.f32 0.015625, %v715_v17  ;;  %4382 = vrsqrt.f32 %v748_v15  ;;  %v843_v19 = vmul.f32 0.70710677, %v5175_v18  ;;  %v793_v33 = vmul.f32 %v5160_v30, %v773_v57 }
 0x24c   : > { %v4371_v38 = vpop.eup %4370  ;;  %v749_v0 = vadd.f32 1e-05, %v733_v47  ;;  %v844_v59 = vmul.f32 0.70710677, %v5179_v61  ;;  %v794_v29 = vmul.f32 %v5160_v30, %v774_v20 }
 0x24d   : > { %v750_v1 = vadd.f32 1e-05, %v734_v58  ;;  %v717_v2 = vpop.xlane.xlu1 %716  ;;  %4384 = verf.f32 %v843_v19  ;;  %v5186_v63 = vadd.f32 %v5166_v43, %v793_v33  ;;  %v775_v21 = vmul.f32 %v4371_v38, %v5054_v22  ;;  %v4373_v26 = vpop.eup %4372 }
 0x24e   : > { %v719_v56 = vpop.xlane.xlu0 %718  ;;  %4386 = vrsqrt.f32 %v749_v0  ;;  %v735_v39 = vmul.f32 0.015625, %v717_v2  ;;  %v814_v37 = vadd.f32 %v5166_v43, %v794_v29  ;;  %v776_v50 = vmul.f32 %v4373_v26, %v5058_v25 }
 0x24f   : > { %v736_v44 = vmul.f32 0.015625, %v719_v56  ;;  %4388 = vrsqrt.f32 %v750_v1  ;;  %v845_v24 = vmul.f32 0.70710677, %v5186_v63  ;;  %v795_v60 = vmul.f32 %v5160_v30, %v775_v21 }
 0x250   : > { %v4375_v31 = vpop.eup %4374  ;;  %v751_v62 = vadd.f32 1e-05, %v735_v39  ;;  %4390 = verf.f32 %v844_v59  ;;  %v846_v46 = vmul.f32 0.70710677, %v814_v37  ;;  %v796_v10 = vmul.f32 %v5160_v30, %v776_v50 }
 0x251   : > { %v752_v5 = vadd.f32 1e-05, %v736_v44  ;;  %v721_v45 = vpop.xlane.xlu1 %720  ;;  %4392 = verf.f32 %v845_v24  ;;  %v5194_v22 = vadd.f32 %v5166_v43, %v795_v60  ;;  %v777_v42 = vmul.f32 %v4375_v31, %v5068_v40  ;;  %v4377_v8 = vpop.eup %4376 }
 0x252   : > { %4394 = vrsqrt.f32 %v751_v62  ;;  %v737_v4 = vmul.f32 0.015625, %v721_v45  ;;  %v5202_v40 = vadd.f32 %v5166_v43, %v796_v10  ;;  %v778_v54 = vmul.f32 %v4377_v8, %v5072_v41 }
 0x253   : > { %v4379_v9 = vpop.eup %4378  ;;  %4396 = vrsqrt.f32 %v752_v5  ;;  %v847_v49 = vmul.f32 0.70710677, %v5194_v22  ;;  %v797_v12 = vmul.f32 %v5160_v30, %v777_v42  ;;  %v827_v41 = vmul.f32 0.5, %v5175_v18 }
 0x254   : > { %v4381_v32 = vpop.eup %4380  ;;  %v753_v28 = vadd.f32 1e-05, %v737_v4  ;;  %v874_v11 = vadd.f32 1.0, %v4379_v9  ;;  %4398 = verf.f32 %v846_v46  ;;  %v848_v16 = vmul.f32 0.70710677, %v5202_v40 }
 0x255   : > { %v4383_v25 = vpop.eup %4382  ;;  %4400 = verf.f32 %v847_v49  ;;  %v779_v13 = vmul.f32 %v4381_v32, %v5082_v52  ;;  %v5207_v14 = vadd.f32 %v5166_v43, %v797_v12  ;;  %v798_v51 = vmul.f32 %v5160_v30, %v778_v54 }
 0x256   : > { %4402 = vrsqrt.f32 %v753_v28  ;;  %v890_v36 = vmul.f32 %v874_v11, %v826_v27  ;;  %v780_v55 = vmul.f32 %v4383_v25, %v5086_v53  ;;  %v828_v2 = vmul.f32 0.5, %v5179_v61 }
 0x257   : > { %v4385_v15 = vpop.eup %4384  ;;  %v799_v48 = vmul.f32 %v5160_v30, %v779_v13  ;;  %v849_v52 = vmul.f32 0.70710677, %v5207_v14  ;;  %4404 = verf.f32 %v848_v16  ;;  %v5217_v53 = vadd.f32 %v5166_v43, %v798_v51 }
 0x258   : > { %v4387_v17 = vpop.eup %4386  ;;  %3899 = vmatprep.mubr.f32.mxu0 %v890_v36  ;;  %v875_v57 = vadd.f32 1.0, %v4385_v15  ;;  %v800_v47 = vmul.f32 %v5160_v30, %v780_v55  ;;  %v829_v59 = vmul.f32 0.5, %v5186_v63  ;;  %v831_v4 = vmul.f32 0.5, %v5194_v22 }
 0x259   : > { %v4389_v58 = vpop.eup %4388  ;;  %v5220_v19 = vadd.f32 %v5166_v43, %v799_v48  ;;  %v781_v33 = vmul.f32 %v4387_v17, %v5096_v3  ;;  %4406 = verf.f32 %v849_v52  ;;  %v850_v21 = vmul.f32 0.70710677, %v5217_v53 }
 0x25a   : > { %v4391_v38 = vpop.eup %4390  ;;  %v891_v0 = vmul.f32 %v875_v57, %v827_v41  ;;  %v5224_v18 = vadd.f32 %v5166_v43, %v800_v47  ;;  %v782_v1 = vmul.f32 %v4389_v58, %v5100_v6  ;;  %v830_v3 = vmul.f32 0.5, %v814_v37 }
 0x25b   : > { %v4393_v20 = vpop.eup %4392  ;;  %v876_v56 = vadd.f32 1.0, %v4391_v38  ;;  %v851_v44 = vmul.f32 0.70710677, %v5220_v19  ;;  %4408 = verf.f32 %v850_v21  ;;  %v801_v6 = vmul.f32 %v5160_v30, %v781_v33 }
 0x25c   : > { %v4395_v26 = vpop.eup %4394  ;;  %3900 = vmatmul.mubr.f32.vlgmr.msra.gmra.mrb[16].mxu0 %v891_v0  ;;  %v877_v39 = vadd.f32 1.0, %v4393_v20  ;;  %v852_v29 = vmul.f32 0.70710677, %v5224_v18  ;;  %v802_v61 = vmul.f32 %v5160_v30, %v782_v1  ;;  %v832_v22 = vmul.f32 0.5, %v5202_v40 }
 0x25d   : > { %v4397_v24 = vpop.eup %4396  ;;  %v892_v60 = vmul.f32 %v876_v56, %v828_v2  ;;  %4410 = verf.f32 %v851_v44  ;;  %v783_v63 = vmul.f32 %v4395_v26, %v5110_v34  ;;  %v821_v50 = vadd.f32 %v5166_v43, %v801_v6 }
 0x25e   : > { %v4399_v31 = vpop.eup %4398  ;;  %v893_v62 = vmul.f32 %v877_v39, %v829_v59  ;;  %v784_v5 = vmul.f32 %v4397_v24, %v5114_v35  ;;  %4412 = verf.f32 %v852_v29  ;;  %v822_v42 = vadd.f32 %v5166_v43, %v802_v61 }
 0x25f   : > { %v4401_v45 = vpop.eup %4400  ;;  %3902 = vmatprep.mubr.f32.mxu0 %v892_v60  ;;  %v878_v37 = vadd.f32 1.0, %v4399_v31  ;;  %v803_v9 = vmul.f32 %v5160_v30, %v783_v63  ;;  %v853_v49 = vmul.f32 0.70710677, %v821_v50  ;;  %v833_v36 = vmul.f32 0.5, %v5207_v14 }
 0x260   : > { %v4403_v8 = vpop.eup %4402  ;;  %3903 = vmatmul.mubr.f32.gmra.mrb[18].mxu0 %v893_v62  ;;  %v879_v46 = vadd.f32 1.0, %v4401_v45  ;;  %v804_v27 = vmul.f32 %v5160_v30, %v784_v5  ;;  %v854_v10 = vmul.f32 0.70710677, %v822_v42  ;;  %v834_v40 = vmul.f32 0.5, %v5217_v53 }
 0x261   : > { %v894_v34 = vmul.f32 %v878_v37, %v830_v3  ;;  %v823_v32 = vadd.f32 %v5166_v43, %v803_v9  ;;  %v4405_v11 = vpop.eup %4404  ;;  %4414 = verf.f32 %v853_v49  ;;  %v785_v12 = vmul.f32 %v4403_v8, %v5127_v7 }
 0x262   : > { %v895_v35 = vmul.f32 %v879_v46, %v831_v4  ;;  %v824_v28 = vadd.f32 %v5166_v43, %v804_v27  ;;  %v880_v54 = vadd.f32 1.0, %v4405_v11  ;;  %4416 = verf.f32 %v854_v10 }
 0x263   : > { %3905 = vmatprep.mubr.f32.mxu0 %v894_v34  ;;  %v4407_v25 = vpop.eup %4406  ;;  %v855_v13 = vmul.f32 0.70710677, %v823_v32  ;;  %v805_v16 = vmul.f32 %v5160_v30, %v785_v12  ;;  %v835_v14 = vmul.f32 0.5, %v5220_v19  ;;  %v836_v30 = vmul.f32 0.5, %v5224_v18  ;;  %v4713_v12 = vld [vmem:[%s4849_s8] sm:$0xff] }
 0x264   : > { %3906 = vmatmul.mubr.f32.gmra.mrb[20].mxu0 %v895_v35  ;;  %v881_v55 = vadd.f32 1.0, %v4407_v25  ;;  %v856_v15 = vmul.f32 0.70710677, %v824_v28  ;;  %v896_v51 = vmul.f32 %v880_v54, %v832_v22  ;;  %v837_v53 = vmul.f32 0.5, %v821_v50 }
 0x265   : > { %4418 = verf.f32 %v855_v13  ;;  %v4409_v48 = vpop.eup %4408  ;;  %v825_v7 = vadd.f32 %v5166_v43, %v805_v16  ;;  %v838_v56 = vmul.f32 0.5, %v822_v42  ;;  %v839_v3 = vmul.f32 0.5, %v823_v32  ;;  %v5292_v16 = vld [vmem:[%s6908_s2 + $0x3] ss:$0 sm:$0xff] }
 0x266   : > { %v897_v17 = vmul.f32 %v881_v55, %v833_v36  ;;  %4420 = verf.f32 %v856_v15  ;;  %3908 = vmatprep.mubr.f32.mxu0 %v896_v51  ;;  %v882_v57 = vadd.f32 1.0, %v4409_v48  ;;  %v840_v18 = vmul.f32 0.5, %v824_v28  ;;  %v4712_v28 = vld [vmem:[%s4849_s8 + $0x8] sm:$0xff]  ;;  %v4714_v55 = vld [vmem:[%s4849_s8 + $0x18] sm:$0xff]  ;;  %v4715_v48 = vld [vmem:[%s4849_s8 + $0x10] sm:$0xff] }
 0x267   : > { %v4411_v41 = vpop.eup %4410  ;;  %v857_v58 = vmul.f32 0.70710677, %v825_v7  ;;  %v841_v61 = vmul.f32 0.5, %v825_v7  ;;  %v209_v11 = vsel %vm207_vm0, %v4712_v28, 0.0  ;;  %v208_v25 = vsel %vm207_vm0, %v4713_v12, 0.0 }
 0x268   : > { %v4413_v52 = vpop.eup %4412  ;;  %3909 = vmatmul.mubr.f32.gmra.mrb[22].mxu0 %v897_v17  ;;  %v883_v47 = vadd.f32 1.0, %v4411_v41  ;;  %v898_v33 = vmul.f32 %v882_v57, %v834_v40  ;;  %v211_v15 = vsel %vm207_vm0, %v4714_v55, 0.0  ;;  %v210_v17 = vsel %vm207_vm0, %v4715_v48, 0.0 }
 0x269   : > { %v884_v38 = vadd.f32 1.0, %v4413_v52  ;;  %4422 = verf.f32 %v857_v58 }
 0x26a   : > { %v899_v0 = vmul.f32 %v883_v47, %v835_v14  ;;  %3911 = vmatprep.mubr.f32.mxu0 %v898_v33  ;;  %v4716_v47 = vld [vmem:[%s4849_s8 + $0x28] sm:$0xff] }
 0x26b   : > { %v900_v1 = vmul.f32 %v884_v38, %v836_v30  ;;  %v4415_v43 = vpop.eup %4414  ;;  %v213_v58 = vsel %vm207_vm0, %v4716_v47, 0.0  ;;  %v4722_v47 = vld [vmem:[%s4849_s8 + $0x58] sm:$0xff] }
 0x26c   : > { %3912 = vmatmul.mubr.f32.gmra.mrb[24].mxu0 %v899_v0  ;;  %v4417_v20 = vpop.eup %4416  ;;  %v885_v2 = vadd.f32 1.0, %v4415_v43  ;;  %v4717_v0 = vld [vmem:[%s4849_s8 + $0x20] sm:$0xff] }
 0x26d   : > { %3914 = vmatprep.mubr.f32.mxu0 %v900_v1  ;;  %v886_v59 = vadd.f32 1.0, %v4417_v20  ;;  %v212_v1 = vsel %vm207_vm0, %v4717_v0, 0.0 }
 0x26e   : > { %v901_v19 = vmul.f32 %v885_v2, %v837_v53 }
 0x26f   : > { %v4419_v21 = vpop.eup %4418  ;;  %v902_v39 = vmul.f32 %v886_v59, %v838_v56 }
 0x270   : > { %v4421_v26 = vpop.eup %4420  ;;  %v887_v44 = vadd.f32 1.0, %v4419_v21  ;;  %3915 = vmatmul.mubr.f32.gmra.mrb[26].mxu0 %v901_v19 }
 0x271   : > { %v888_v29 = vadd.f32 1.0, %v4421_v26  ;;  %3917 = vmatprep.mubr.f32.mxu0 %v902_v39 }
 0x272   : > { %v903_v24 = vmul.f32 %v887_v44, %v839_v3  ;;  %v4718_v3 = vld [vmem:[%s4849_s8 + $0x38] sm:$0xff] }
 0x273   : > { %v904_v60 = vmul.f32 %v888_v29, %v840_v18  ;;  %v4423_v6 = vpop.eup %4422  ;;  %v215_v44 = vsel %vm207_vm0, %v4718_v3, 0.0  ;;  %v4719_v29 = vld [vmem:[%s4849_s8 + $0x30] sm:$0xff] }
 0x274   : > { %3918 = vmatmul.mubr.f32.gmra.mrb[28].mxu0 %v903_v24  ;;  %v889_v31 = vadd.f32 1.0, %v4423_v6  ;;  %v214_v24 = vsel %vm207_vm0, %v4719_v29, 0.0 }
 0x275   : > { %3920 = vmatprep.mubr.f32.mxu0 %v904_v60 }
 0x276   : > { %v905_v62 = vmul.f32 %v889_v31, %v841_v61 }
 0x278   : > { %3921 = vmatmul.mubr.f32.gmra.mrb[30].mxu0 %v905_v62 }
 0x285   : > { %v5251_v63 = vpop.f32.mrb[0].mxu0 }
 0x286   : > { %v5253_v5 = vpop.f32.mrb[1].mxu0 }
 0x28a   : > { %v5255_v45 = vpop.f32.mrb[2].mxu0 }
 0x28b   : > { %v5257_v37 = vpop.f32.mrb[3].mxu0 }
 0x28e   : > { %v5259_v50 = vpop.f32.mrb[4].mxu0 }
 0x28f   : > { %v5261_v42 = vpop.f32.mrb[5].mxu0 }
 0x292   : > { %v5263_v8 = vpop.f32.mrb[6].mxu0 }
 0x293   : > { %v5265_v4 = vpop.f32.mrb[7].mxu0 }
 0x298   : > { %v5267_v46 = vpop.f32.mrb[8].mxu0 }
 0x299   : > { %v5269_v9 = vpop.f32.mrb[9].mxu0 }
 0x29c   : > { %v5271_v27 = vpop.f32.mrb[10].mxu0 }
 0x29d   : > { %v5273_v34 = vpop.f32.mrb[11].mxu0 }
 0x2a0   : > { %v5275_v49 = vpop.f32.mrb[12].mxu0 }
 0x2a1   : > { %v5277_v35 = vpop.f32.mrb[13].mxu0 }
 0x2a2   : > { %6930 = vst [vmem:[#allocation5_spill] sm:$0xff] %v5277_v35 }
 0x2a4   : > { %v5279_v10 = vpop.f32.mrb[14].mxu0 }
 0x2a5   : > { %6931 = vst [vmem:[#allocation6_spill] sm:$0xff] %v5279_v10  ;;  %v5281_v32 = vpop.f32.mrb[15].mxu0 }
 0x2a6   : > { %6932 = vst [vmem:[#allocation7_spill] sm:$0xff] %v5281_v32 }
 0x32f   : > { %v3901_v22 = vpop.f32.mrb[16].mxu0 }
 0x330   : > { %v1068_v54 = vadd.f32 %v3901_v22, %v209_v11  ;;  %v988_v13 = vpop.f32.mrb[17].mxu0 }
 0x331   : > { %v1067_v36 = vadd.f32 %v988_v13, %v208_v25  ;;  %v4720_v25 = vld [vmem:[%s4849_s8 + $0x48] sm:$0xff]  ;;  %v4721_v13 = vld [vmem:[%s4849_s8 + $0x40] sm:$0xff] }
 0x332   : > { %v1084_v51 = vadd.f32 %v5251_v63, %v1068_v54  ;;  %v217_v22 = vsel %vm207_vm0, %v4720_v25, 0.0  ;;  %v4726_v25 = vld [vmem:[%s4849_s8 + $0x78] sm:$0xff] }
 0x333   : > { %v1083_v7 = vadd.f32 %v1067_v36, %v5253_v5  ;;  %v3904_v41 = vpop.f32.mrb[18].mxu0  ;;  %v216_v36 = vsel %vm207_vm0, %v4721_v13, 0.0 }
 0x334   : > { %v1070_v40 = vadd.f32 %v3904_v41, %v211_v15  ;;  %v998_v57 = vpop.f32.mrb[19].mxu0  ;;  %v5300_v52 = vadd.f32 %v5292_v16, %v1084_v51 }
 0x335   : > { %v1069_v14 = vadd.f32 %v998_v57, %v210_v17  ;;  %v5305_v33 = vadd.f32 %v5292_v16, %v1083_v7 }
 0x336   : > { %v1086_v30 = vadd.f32 %v5255_v45, %v1070_v40  ;;  %v1124_v38 = vsel %vm1122_vm2, %v5300_v52, 0.0 }
 0x337   : > { %v1085_v43 = vadd.f32 %v1069_v14, %v5257_v37  ;;  %1141 = vadd.xlane.f32.xlu1 %v1124_v38  ;;  %v3907_v20 = vpop.f32.mrb[20].mxu0  ;;  %v1123_v53 = vsel %vm1122_vm2, %v5305_v33, 0.0  ;;  %v4723_v38 = vld [vmem:[%s4849_s8 + $0x50] sm:$0xff] }
 0x338   : > { %v1072_v2 = vadd.f32 %v3907_v20, %v213_v58  ;;  %v1008_v56 = vpop.f32.mrb[21].mxu0  ;;  %1139 = vadd.xlane.f32.xlu0 %v1123_v53  ;;  %v5318_v59 = vadd.f32 %v5292_v16, %v1086_v30  ;;  %v219_v58 = vsel %vm207_vm0, %v4722_v47, 0.0  ;;  %v218_v0 = vsel %vm207_vm0, %v4723_v38, 0.0 }
 0x339   : > { %v1071_v21 = vadd.f32 %v1008_v56, %v212_v1  ;;  %v5321_v19 = vadd.f32 %v5292_v16, %v1085_v43 }
 0x33a   : > { %v1088_v26 = vadd.f32 %v5259_v50, %v1072_v2  ;;  %v1126_v39 = vsel %vm1122_vm2, %v5318_v59, 0.0 }
 0x33b   : > { %v1087_v18 = vadd.f32 %v1071_v21, %v5261_v42  ;;  %1145 = vadd.xlane.f32.xlu1 %v1126_v39  ;;  %v1125_v60 = vsel %vm1122_vm2, %v5321_v19, 0.0  ;;  %v3910_v6 = vpop.f32.mrb[22].mxu0  ;;  %v4724_v39 = vld [vmem:[%s4849_s8 + $0x68] sm:$0xff] }
 0x33c   : > { %1143 = vadd.xlane.f32.xlu0 %v1125_v60  ;;  %v5336_v61 = vadd.f32 %v5292_v16, %v1088_v26  ;;  %v1074_v31 = vadd.f32 %v3910_v6, %v215_v44  ;;  %v1018_v62 = vpop.f32.mrb[23].mxu0  ;;  %v221_v3 = vsel %vm207_vm0, %v4724_v39, 0.0 }
 0x33d   : > { %v5339_v28 = vadd.f32 %v5292_v16, %v1087_v18  ;;  %v1073_v11 = vadd.f32 %v1018_v62, %v214_v24  ;;  %v4725_v18 = vld [vmem:[%s4849_s8 + $0x60] sm:$0xff] }
 0x33e   : > { %v1128_v12 = vsel %vm1122_vm2, %v5336_v61, 0.0  ;;  %v1090_v54 = vadd.f32 %v5263_v8, %v1074_v31  ;;  %v220_v29 = vsel %vm207_vm0, %v4725_v18, 0.0 }
 0x33f   : > { %1149 = vadd.xlane.f32.xlu1 %v1128_v12  ;;  %v1127_v55 = vsel %vm1122_vm2, %v5339_v28, 0.0  ;;  %v1089_v15 = vadd.f32 %v1073_v11, %v5265_v4  ;;  %v3913_v51 = vpop.f32.mrb[24].mxu0 }
 0x340   : > { %1147 = vadd.xlane.f32.xlu0 %v1127_v55  ;;  %v1076_v48 = vadd.f32 %v3913_v51, %v217_v22  ;;  %v1028_v17 = vpop.f32.mrb[25].mxu0  ;;  %v5354_v7 = vadd.f32 %v5292_v16, %v1090_v54  ;;  %v223_v22 = vsel %vm207_vm0, %v4726_v25, 0.0  ;;  %v4727_v55 = vld [vmem:[%s4849_s8 + $0x70] sm:$0xff] }
 0x341   : > { %v1075_v41 = vadd.f32 %v1028_v17, %v216_v36  ;;  %v5357_v40 = vadd.f32 %v5292_v16, %v1089_v15  ;;  %v222_v15 = vsel %vm207_vm0, %v4727_v55, 0.0 }
 0x342   : > { %v1092_v57 = vadd.f32 %v5267_v46, %v1076_v48  ;;  %v1130_v14 = vsel %vm1122_vm2, %v5354_v7, 0.0 }
 0x343   : > { %v1091_v30 = vadd.f32 %v1075_v41, %v5269_v9  ;;  %1153 = vadd.xlane.f32.xlu1 %v1130_v14  ;;  %v1129_v1 = vsel %vm1122_vm2, %v5357_v40, 0.0  ;;  %v3916_v43 = vpop.f32.mrb[26].mxu0 }
 0x344   : > { %1151 = vadd.xlane.f32.xlu0 %v1129_v1  ;;  %v5372_v20 = vadd.f32 %v5292_v16, %v1092_v57  ;;  %v1078_v53 = vadd.f32 %v3916_v43, %v219_v58  ;;  %v1038_v2 = vpop.f32.mrb[27].mxu0 }
 0x345   : > { %v5375_v56 = vadd.f32 %v5292_v16, %v1091_v30  ;;  %v1077_v21 = vadd.f32 %v1038_v2, %v218_v0 }
 0x346   : > { %v1132_v26 = vsel %vm1122_vm2, %v5372_v20, 0.0  ;;  %v1094_v44 = vadd.f32 %v5271_v27, %v1078_v53 }
 0x347   : > { %1157 = vadd.xlane.f32.xlu1 %v1132_v26  ;;  %v1131_v24 = vsel %vm1122_vm2, %v5375_v56, 0.0  ;;  %v1093_v60 = vadd.f32 %v1077_v21, %v5273_v34  ;;  %v3919_v6 = vpop.f32.mrb[28].mxu0 }
 0x348   : > { %1155 = vadd.xlane.f32.xlu0 %v1131_v24  ;;  %v1080_v31 = vadd.f32 %v3919_v6, %v221_v3  ;;  %v1048_v62 = vpop.f32.mrb[29].mxu0  ;;  %v5390_v11 = vadd.f32 %v5292_v16, %v1094_v44 }
 0x349   : > { %v1079_v12 = vadd.f32 %v1048_v62, %v220_v29  ;;  %v5395_v54 = vadd.f32 %v5292_v16, %v1093_v60 }
 0x34a   : > { %v1096_v13 = vadd.f32 %v5275_v49, %v1080_v31  ;;  %v1134_v36 = vsel %vm1122_vm2, %v5390_v11, 0.0 }
 0x34b   : > { %v1095_v51 = vadd.f32 %v1079_v12, %v5277_v35  ;;  %1161 = vadd.xlane.f32.xlu1 %v1134_v36  ;;  %v3922_v48 = vpop.f32.mrb[30].mxu0  ;;  %v1133_v17 = vsel %vm1122_vm2, %v5395_v54, 0.0 }
 0x34c   : > { %v1082_v41 = vadd.f32 %v3922_v48, %v223_v22  ;;  %v1058_v57 = vpop.f32.mrb[31].mxu0  ;;  %1159 = vadd.xlane.f32.xlu0 %v1133_v17  ;;  %v5408_v14 = vadd.f32 %v5292_v16, %v1096_v13 }
 0x34d   : > { %v1081_v47 = vadd.f32 %v1058_v57, %v222_v15  ;;  %v5411_v58 = vadd.f32 %v5292_v16, %v1095_v51 }
 0x34e   : > { %v1098_v30 = vadd.f32 %v5279_v10, %v1082_v41  ;;  %v1136_v38 = vsel %vm1122_vm2, %v5408_v14, 0.0 }
 0x34f   : > { %v1097_v0 = vadd.f32 %v1081_v47, %v5281_v32  ;;  %1165 = vadd.xlane.f32.xlu1 %v1136_v38  ;;  %v1135_v1 = vsel %vm1122_vm2, %v5411_v58, 0.0 }
 0x350   : > { %1163 = vadd.xlane.f32.xlu0 %v1135_v1  ;;  %v5422_v43 = vadd.f32 %v5292_v16, %v1098_v30 }
 0x351   : > { %v5425_v53 = vadd.f32 %v5292_v16, %v1097_v0 }
 0x352   : > { %v1138_v2 = vsel %vm1122_vm2, %v5422_v43, 0.0 }
 0x353   : > { %1169 = vadd.xlane.f32.xlu1 %v1138_v2  ;;  %v1137_v21 = vsel %vm1122_vm2, %v5425_v53, 0.0 }
 0x354   : > { %1167 = vadd.xlane.f32.xlu0 %v1137_v21 }
 0x3c4   : > { %v1142_v26 = vpop.xlane.xlu1 %1141 }
 0x3c5   : > { %v1172_v39 = vmul.f32 0.020833334, %v1142_v26  ;;  %v1140_v3 = vpop.xlane.xlu0 %1139 }
 0x3c6   : > { %v1171_v44 = vmul.f32 0.020833334, %v1140_v3 }
 0x3c7   : > { %v1188_v18 = vsub.f32 %v5300_v52, %v1172_v39 }
 0x3c8   : > { %v1187_v29 = vsub.f32 %v5305_v33, %v1171_v44  ;;  %v1146_v16 = vpop.xlane.xlu1 %1145 }
 0x3c9   : > { %v1174_v24 = vmul.f32 0.020833334, %v1146_v16  ;;  %v1144_v60 = vpop.xlane.xlu0 %1143  ;;  %v5437_v6 = vsel %vm1122_vm2, %v1188_v18, 0.0 }
 0x3ca   : > { %v1173_v31 = vmul.f32 0.020833334, %v1144_v60  ;;  %v1220_v62 = vmul.f32 %v5437_v6, %v5437_v6  ;;  %v5443_v12 = vsel %vm1122_vm2, %v1187_v29, 0.0 }
 0x3cb   : > { %v1190_v25 = vsub.f32 %v5318_v59, %v1174_v24  ;;  %v1219_v52 = vmul.f32 %v5443_v12, %v5443_v12 }
 0x3cc   : > { %v1189_v33 = vsub.f32 %v5321_v19, %v1173_v31  ;;  %v1150_v22 = vpop.xlane.xlu1 %1149  ;;  %1237 = vadd.xlane.f32.xlu1 %v1220_v62 }
 0x3cd   : > { %v1176_v13 = vmul.f32 0.020833334, %v1150_v22  ;;  %1235 = vadd.xlane.f32.xlu0 %v1219_v52  ;;  %v1148_v36 = vpop.xlane.xlu0 %1147  ;;  %v5451_v55 = vsel %vm1122_vm2, %v1190_v25, 0.0 }
 0x3ce   : > { %v1175_v15 = vmul.f32 0.020833334, %v1148_v36  ;;  %v1222_v51 = vmul.f32 %v5451_v55, %v5451_v55  ;;  %v5457_v59 = vsel %vm1122_vm2, %v1189_v33, 0.0 }
 0x3cf   : > { %v1192_v48 = vsub.f32 %v5336_v61, %v1176_v13  ;;  %v1221_v19 = vmul.f32 %v5457_v59, %v5457_v59 }
 0x3d0   : > { %v1191_v17 = vsub.f32 %v5339_v28, %v1175_v15  ;;  %1241 = vadd.xlane.f32.xlu1 %v1222_v51  ;;  %v1154_v41 = vpop.xlane.xlu1 %1153 }
 0x3d1   : > { %1239 = vadd.xlane.f32.xlu0 %v1221_v19  ;;  %v5465_v57 = vsel %vm1122_vm2, %v1192_v48, 0.0  ;;  %v1178_v47 = vmul.f32 0.020833334, %v1154_v41  ;;  %v1152_v30 = vpop.xlane.xlu0 %1151 }
 0x3d2   : > { %v1224_v38 = vmul.f32 %v5465_v57, %v5465_v57  ;;  %v5471_v61 = vsel %vm1122_vm2, %v1191_v17, 0.0  ;;  %v1177_v0 = vmul.f32 0.020833334, %v1152_v30 }
 0x3d3   : > { %v1223_v28 = vmul.f32 %v5471_v61, %v5471_v61  ;;  %v1194_v1 = vsub.f32 %v5354_v7, %v1178_v47 }
 0x3d4   : > { %1245 = vadd.xlane.f32.xlu1 %v1224_v38  ;;  %v1193_v2 = vsub.f32 %v5357_v40, %v1177_v0  ;;  %v1158_v21 = vpop.xlane.xlu1 %1157 }
 0x3d5   : > { %1243 = vadd.xlane.f32.xlu0 %v1223_v28  ;;  %v1180_v26 = vmul.f32 0.020833334, %v1158_v21  ;;  %v1156_v39 = vpop.xlane.xlu0 %1155  ;;  %v5479_v3 = vsel %vm1122_vm2, %v1194_v1, 0.0  ;;  %v1451_v28 = vld [vmem:[#allocation2 + $0x40] sm:$0xff]  ;;  %v1452_v1 = vld [vmem:[#allocation2 + $0x48] sm:$0xff] }
 0x3d6   : > { %v1179_v44 = vmul.f32 0.020833334, %v1156_v39  ;;  %v1226_v18 = vmul.f32 %v5479_v3, %v5479_v3  ;;  %v5485_v29 = vsel %vm1122_vm2, %v1193_v2, 0.0 }
 0x3d7   : > { %v1196_v7 = vsub.f32 %v5372_v20, %v1180_v26  ;;  %v1225_v40 = vmul.f32 %v5485_v29, %v5485_v29 }
 0x3d8   : > { %v1195_v16 = vsub.f32 %v5375_v56, %v1179_v44  ;;  %1249 = vadd.xlane.f32.xlu1 %v1226_v18  ;;  %v1162_v24 = vpop.xlane.xlu1 %1161 }
 0x3d9   : > { %1247 = vadd.xlane.f32.xlu0 %v1225_v40  ;;  %v5493_v60 = vsel %vm1122_vm2, %v1196_v7, 0.0  ;;  %v1182_v31 = vmul.f32 0.020833334, %v1162_v24  ;;  %v1160_v62 = vpop.xlane.xlu0 %1159  ;;  %v1453_v7 = vld [vmem:[#allocation2 + $0x50] sm:$0xff]  ;;  %v1454_v40 = vld [vmem:[#allocation2 + $0x58] sm:$0xff] }
 0x3da   : > { %v1228_v25 = vmul.f32 %v5493_v60, %v5493_v60  ;;  %v5499_v20 = vsel %vm1122_vm2, %v1195_v16, 0.0  ;;  %v1181_v52 = vmul.f32 0.020833334, %v1160_v62  ;;  %v4199_v24 = vpack.c.bf16 %v1454_v40, %v1453_v7  ;;  %v1456_v62 = vld [vmem:[#allocation2 + $0x68] sm:$0xff] }
 0x3db   : > { %v1227_v56 = vmul.f32 %v5499_v20, %v5499_v20  ;;  %v1198_v33 = vsub.f32 %v5390_v11, %v1182_v31  ;;  %v1455_v31 = vld [vmem:[#allocation2 + $0x60] sm:$0xff] }
 0x3dc   : > { %1253 = vadd.xlane.f32.xlu1 %v1228_v25  ;;  %v1197_v22 = vsub.f32 %v5395_v54, %v1181_v52  ;;  %v1166_v13 = vpop.xlane.xlu1 %1165  ;;  %v4203_v25 = vpack.c.bf16 %v1456_v62, %v1455_v31  ;;  %v1457_v52 = vld [vmem:[#allocation2 + $0x70] sm:$0xff] }
 0x3dd   : > { %1251 = vadd.xlane.f32.xlu0 %v1227_v56  ;;  %v1184_v36 = vmul.f32 0.020833334, %v1166_v13  ;;  %v1164_v15 = vpop.xlane.xlu0 %1163  ;;  %v5507_v51 = vsel %vm1122_vm2, %v1198_v33, 0.0  ;;  %v1458_v56 = vld [vmem:[#allocation2 + $0x78] sm:$0xff]  ;;  %v1460_v13 = vld [vmem:[#allocation2 + $0x88] sm:$0xff] }
 0x3de   : > { %v1183_v48 = vmul.f32 0.020833334, %v1164_v15  ;;  %v1230_v19 = vmul.f32 %v5507_v51, %v5507_v51  ;;  %v5513_v17 = vsel %vm1122_vm2, %v1197_v22, 0.0  ;;  %v4207_v33 = vpack.c.bf16 %v1458_v56, %v1457_v52  ;;  %v1459_v22 = vld [vmem:[#allocation2 + $0x80] sm:$0xff]  ;;  %v1461_v15 = vld [vmem:[#allocation2 + $0x90] sm:$0xff] }
 0x3df   : > { %v1200_v11 = vsub.f32 %v5408_v14, %v1184_v36  ;;  %v1229_v54 = vmul.f32 %v5513_v17, %v5513_v17  ;;  %v4211_v36 = vpack.c.bf16 %v1460_v13, %v1459_v22 }
 0x3e0   : > { %v1199_v41 = vsub.f32 %v5411_v58, %v1183_v48  ;;  %1257 = vadd.xlane.f32.xlu1 %v1230_v19  ;;  %v1170_v47 = vpop.xlane.xlu1 %1169  ;;  %v4195_v58 = vpack.c.bf16 %v1452_v1, %v1451_v28  ;;  %v1462_v48 = vld [vmem:[#allocation2 + $0x98] sm:$0xff] }
 0x3e1   : > { %v1186_v30 = vmul.f32 0.020833334, %v1170_v47  ;;  %1255 = vadd.xlane.f32.xlu0 %v1229_v54  ;;  %v1168_v38 = vpop.xlane.xlu0 %1167  ;;  %v5521_v0 = vsel %vm1122_vm2, %v1200_v11, 0.0  ;;  %v4215_v19 = vpack.c.bf16 %v1462_v48, %v1461_v15  ;;  %v1463_v11 = vld [vmem:[#allocation2 + $0xa0] sm:$0xff]  ;;  %v1464_v54 = vld [vmem:[#allocation2 + $0xa8] sm:$0xff]  ;;  %v1465_v47 = vld [vmem:[#allocation2 + $0xb0] sm:$0xff] }
 0x3e2   : > { %v1185_v2 = vmul.f32 0.020833334, %v1168_v38  ;;  %v1232_v14 = vmul.f32 %v5521_v0, %v5521_v0  ;;  %v5527_v21 = vsel %vm1122_vm2, %v1199_v41, 0.0  ;;  %4196 = vmatprep.subr.bf16.mxu1 %v4195_v58  ;;  %v4219_v41 = vpack.c.bf16 %v1464_v54, %v1463_v11  ;;  %v5548_v15 = vld [vmem:[%s6908_s2 + $0x4] ss:$0 sm:$0xff] }
 0x3e3   : > { %v1202_v26 = vsub.f32 %v5422_v43, %v1186_v30  ;;  %v1231_v39 = vmul.f32 %v5527_v21, %v5527_v21  ;;  %4198 = vmatpush3.bf16.msra.mxu1 %v4195_v58  ;;  %v1466_v30 = vld [vmem:[#allocation2 + $0xb8] sm:$0xff] }
 0x3e4   : > { %v1201_v44 = vsub.f32 %v5425_v53, %v1185_v2  ;;  %1261 = vadd.xlane.f32.xlu1 %v1232_v14  ;;  %4200 = vmatprep.subr.bf16.mxu1 %v4199_v24  ;;  %v4223_v38 = vpack.c.bf16 %v1466_v30, %v1465_v47  ;;  %v5554_v30 = vld [vmem:[%s6908_s2 + $0x5] ss:$0 sm:$0xff] }
 0x3e5   : > { %1259 = vadd.xlane.f32.xlu0 %v1231_v39  ;;  %v5535_v18 = vsel %vm1122_vm2, %v1202_v26, 0.0 }
 0x3e6   : > { %v1234_v16 = vmul.f32 %v5535_v18, %v5535_v18  ;;  %v5541_v43 = vsel %vm1122_vm2, %v1201_v44, 0.0 }
 0x3e7   : > { %v1233_v53 = vmul.f32 %v5541_v43, %v5541_v43  ;;  %4202 = vmatpush3.bf16.msra.mxu1 %v4199_v24 }
 0x3e8   : > { %1265 = vadd.xlane.f32.xlu1 %v1234_v16  ;;  %4204 = vmatprep.subr.bf16.mxu1 %v4203_v25 }
 0x3e9   : > { %1263 = vadd.xlane.f32.xlu0 %v1233_v53 }
 0x3eb   : > { %4206 = vmatpush3.bf16.msra.mxu1 %v4203_v25 }
 0x3ec   : > { %4208 = vmatprep.subr.bf16.mxu1 %v4207_v33 }
 0x3ef   : > { %4210 = vmatpush3.bf16.msra.mxu1 %v4207_v33 }
 0x3f0   : > { %4212 = vmatprep.subr.bf16.mxu1 %v4211_v36 }
 0x3f3   : > { %4214 = vmatpush3.bf16.msra.mxu1 %v4211_v36 }
 0x3f4   : > { %4216 = vmatprep.subr.bf16.mxu1 %v4215_v19 }
 0x3f7   : > { %4218 = vmatpush3.bf16.msra.mxu1 %v4215_v19 }
 0x3f8   : > { %4220 = vmatprep.subr.bf16.mxu1 %v4219_v41 }
 0x3fb   : > { %4222 = vmatpush3.bf16.msra.mxu1 %v4219_v41 }
 0x3fc   : > { %4224 = vmatprep.subr.bf16.mxu1 %v4223_v38 }
 0x3ff   : > { %4226 = vmatpush3.bf16.msra.mxu1 %v4223_v38 }
 0x459   : > { %v1238_v28 = vpop.xlane.xlu1 %1237 }
 0x45a   : > { %v1268_v1 = vmul.f32 0.020833334, %v1238_v28  ;;  %v1236_v2 = vpop.xlane.xlu0 %1235 }
 0x45b   : > { %v1267_v14 = vmul.f32 0.020833334, %v1236_v2 }
 0x45c   : > { %v1284_v58 = vadd.f32 1e-05, %v1268_v1 }
 0x45d   : > { %v1283_v26 = vadd.f32 1e-05, %v1267_v14  ;;  %v1242_v39 = vpop.xlane.xlu1 %1241 }
 0x45e   : > { %4424 = vrsqrt.f32 %v1284_v58  ;;  %v1270_v44 = vmul.f32 0.020833334, %v1242_v39  ;;  %v1240_v7 = vpop.xlane.xlu0 %1239 }
 0x45f   : > { %4426 = vrsqrt.f32 %v1283_v26  ;;  %v1269_v40 = vmul.f32 0.020833334, %v1240_v7 }
 0x460   : > { %v1286_v16 = vadd.f32 1e-05, %v1270_v44 }
 0x461   : > { %v1285_v24 = vadd.f32 1e-05, %v1269_v40  ;;  %v1246_v53 = vpop.xlane.xlu1 %1245 }
 0x462   : > { %4428 = vrsqrt.f32 %v1286_v16  ;;  %v1272_v31 = vmul.f32 0.020833334, %v1246_v53  ;;  %v1244_v62 = vpop.xlane.xlu0 %1243 }
 0x463   : > { %4430 = vrsqrt.f32 %v1285_v24  ;;  %v1271_v25 = vmul.f32 0.020833334, %v1244_v62 }
 0x464   : > { %v1288_v52 = vadd.f32 1e-05, %v1272_v31 }
 0x465   : > { %v1287_v56 = vadd.f32 1e-05, %v1271_v25  ;;  %v1250_v33 = vpop.xlane.xlu1 %1249 }
 0x466   : > { %4432 = vrsqrt.f32 %v1288_v52  ;;  %v1274_v22 = vmul.f32 0.020833334, %v1250_v33  ;;  %v1248_v13 = vpop.xlane.xlu0 %1247 }
 0x467   : > { %4434 = vrsqrt.f32 %v1287_v56  ;;  %v1273_v48 = vmul.f32 0.020833334, %v1248_v13 }
 0x468   : > { %v4425_v36 = vpop.eup %4424  ;;  %v1290_v54 = vadd.f32 1e-05, %v1274_v22 }
 0x469   : > { %v4427_v19 = vpop.eup %4426  ;;  %v1316_v11 = vmul.f32 %v4425_v36, %v5437_v6  ;;  %v1289_v41 = vadd.f32 1e-05, %v1273_v48  ;;  %v1254_v47 = vpop.xlane.xlu1 %1253 }
 0x46a   : > { %v1315_v38 = vmul.f32 %v4427_v19, %v5443_v12  ;;  %4436 = vrsqrt.f32 %v1290_v54  ;;  %v1276_v1 = vmul.f32 0.020833334, %v1254_v47  ;;  %v1252_v2 = vpop.xlane.xlu0 %1251 }
 0x46b   : > { %v1336_v28 = vmul.f32 %v5548_v15, %v1316_v11  ;;  %4438 = vrsqrt.f32 %v1289_v41  ;;  %v1275_v58 = vmul.f32 0.020833334, %v1252_v2 }
 0x46c   : > { %v4429_v14 = vpop.eup %4428  ;;  %v1335_v6 = vmul.f32 %v5548_v15, %v1315_v38  ;;  %v1292_v39 = vadd.f32 1e-05, %v1276_v1 }
 0x46d   : > { %v4431_v26 = vpop.eup %4430  ;;  %v5560_v44 = vadd.f32 %v5554_v30, %v1336_v28  ;;  %v1318_v7 = vmul.f32 %v4429_v14, %v5451_v55  ;;  %v1291_v40 = vadd.f32 1e-05, %v1275_v58  ;;  %v1258_v24 = vpop.xlane.xlu1 %1257 }
 0x46e   : > { %v1355_v12 = vadd.f32 %v5554_v30, %v1335_v6  ;;  %v1317_v16 = vmul.f32 %v4431_v26, %v5457_v59  ;;  %4440 = vrsqrt.f32 %v1292_v39  ;;  %v1278_v25 = vmul.f32 0.020833334, %v1258_v24  ;;  %v1256_v52 = vpop.xlane.xlu0 %1255 }
 0x46f   : > { %v1388_v53 = vmul.f32 0.70710677, %v5560_v44  ;;  %v1338_v31 = vmul.f32 %v5548_v15, %v1318_v7  ;;  %4442 = vrsqrt.f32 %v1291_v40  ;;  %v1277_v22 = vmul.f32 0.020833334, %v1256_v52 }
 0x470   : > { %v4433_v62 = vpop.eup %4432  ;;  %v1387_v56 = vmul.f32 0.70710677, %v1355_v12  ;;  %v1337_v55 = vmul.f32 %v5548_v15, %v1317_v16  ;;  %v1294_v59 = vadd.f32 1e-05, %v1278_v25  ;;  %v1371_v52 = vmul.f32 0.5, %v1355_v12 }
 0x471   : > { %v4435_v33 = vpop.eup %4434  ;;  %4444 = verf.f32 %v1388_v53  ;;  %v5569_v13 = vadd.f32 %v5554_v30, %v1338_v31  ;;  %v1320_v48 = vmul.f32 %v4433_v62, %v5465_v57  ;;  %v1293_v19 = vadd.f32 1e-05, %v1277_v22  ;;  %v1262_v11 = vpop.xlane.xlu1 %1261 }
 0x472   : > { %4446 = verf.f32 %v1387_v56  ;;  %v1319_v36 = vmul.f32 %v4435_v33, %v5471_v61  ;;  %v5574_v54 = vadd.f32 %v5554_v30, %v1337_v55  ;;  %v1280_v47 = vmul.f32 0.020833334, %v1262_v11  ;;  %v1260_v38 = vpop.xlane.xlu0 %1259 }
 0x473   : > { %v1390_v41 = vmul.f32 0.70710677, %v5569_v13  ;;  %4448 = vrsqrt.f32 %v1294_v59  ;;  %v1340_v1 = vmul.f32 %v5548_v15, %v1320_v48  ;;  %v1279_v14 = vmul.f32 0.020833334, %v1260_v38 }
 0x474   : > { %v1339_v28 = vmul.f32 %v5548_v15, %v1319_v36  ;;  %v4437_v2 = vpop.eup %4436  ;;  %4450 = vrsqrt.f32 %v1293_v19  ;;  %v1389_v61 = vmul.f32 0.70710677, %v5574_v54  ;;  %v1296_v58 = vadd.f32 1e-05, %v1280_v47 }
 0x475   : > { %v4439_v57 = vpop.eup %4438  ;;  %4452 = verf.f32 %v1390_v41  ;;  %v5582_v26 = vadd.f32 %v5554_v30, %v1340_v1  ;;  %v1295_v39 = vadd.f32 1e-05, %v1279_v14  ;;  %v1266_v7 = vpop.xlane.xlu1 %1265  ;;  %v1322_v16 = vmul.f32 %v4437_v2, %v5479_v3 }
 0x476   : > { %v1359_v6 = vadd.f32 %v5554_v30, %v1339_v28  ;;  %4454 = verf.f32 %v1389_v61  ;;  %v1321_v40 = vmul.f32 %v4439_v57, %v5485_v29  ;;  %v1282_v24 = vmul.f32 0.020833334, %v1266_v7  ;;  %v1264_v53 = vpop.xlane.xlu0 %1263 }
 0x477   : > { %4456 = vrsqrt.f32 %v1296_v58  ;;  %v1281_v25 = vmul.f32 0.020833334, %v1264_v53  ;;  %v1392_v56 = vmul.f32 0.70710677, %v5582_v26  ;;  %v1342_v59 = vmul.f32 %v5548_v15, %v1322_v16 }
 0x478   : > { %v1391_v31 = vmul.f32 0.70710677, %v1359_v6  ;;  %v4441_v62 = vpop.eup %4440  ;;  %4458 = vrsqrt.f32 %v1295_v39  ;;  %v1298_v22 = vadd.f32 1e-05, %v1282_v24  ;;  %v1341_v55 = vmul.f32 %v5548_v15, %v1321_v40 }
 0x479   : > { %v4443_v33 = vpop.eup %4442  ;;  %v1297_v36 = vadd.f32 1e-05, %v1281_v25  ;;  %v1324_v48 = vmul.f32 %v4441_v62, %v5493_v60  ;;  %v5595_v41 = vadd.f32 %v5554_v30, %v1342_v59  ;;  %v1374_v24 = vmul.f32 0.5, %v5569_v13 }
 0x47a   : > { %4460 = verf.f32 %v1391_v31  ;;  %v1323_v3 = vmul.f32 %v4443_v33, %v5499_v20  ;;  %v5592_v12 = vadd.f32 %v5554_v30, %v1341_v55  ;;  %v1372_v20 = vmul.f32 0.5, %v5560_v44 }
 0x47b   : > { %v4445_v29 = vpop.eup %4444  ;;  %4462 = verf.f32 %v1392_v56  ;;  %v1344_v28 = vmul.f32 %v5548_v15, %v1324_v48  ;;  %v1394_v61 = vmul.f32 0.70710677, %v5595_v41  ;;  %v1373_v25 = vmul.f32 0.5, %v5574_v54 }
 0x47c   : > { %v4447_v19 = vpop.eup %4446  ;;  %4464 = vrsqrt.f32 %v1298_v22  ;;  %v1420_v11 = vadd.f32 1.0, %v4445_v29  ;;  %v1343_v38 = vmul.f32 %v5548_v15, %v1323_v3  ;;  %v1393_v60 = vmul.f32 0.70710677, %v5592_v12 }
 0x47d   : > { %4466 = vrsqrt.f32 %v1297_v36  ;;  %v1419_v47 = vadd.f32 1.0, %v4447_v19  ;;  %v4449_v1 = vpop.eup %4448  ;;  %v5608_v58 = vadd.f32 %v5554_v30, %v1344_v28  ;;  %v1375_v33 = vmul.f32 0.5, %v1359_v6 }
 0x47e   : > { %v4451_v2 = vpop.eup %4450  ;;  %v5605_v57 = vadd.f32 %v5554_v30, %v1343_v38  ;;  %v5610_v7 = vmul.f32 %v1420_v11, %v1372_v20  ;;  %4468 = verf.f32 %v1393_v60  ;;  %v1326_v44 = vmul.f32 %v4449_v1, %v5507_v51 }
 0x47f   : > { %v5601_v14 = vmul.f32 %v1419_v47, %v1371_v52  ;;  %v4453_v39 = vpop.eup %4452  ;;  %v1325_v40 = vmul.f32 %v4451_v2, %v5513_v17  ;;  %4470 = verf.f32 %v1394_v61  ;;  %v1396_v56 = vmul.f32 0.70710677, %v5608_v58 }
 0x480   : > { %v4455_v16 = vpop.eup %4454  ;;  %v1422_v53 = vadd.f32 1.0, %v4453_v39  ;;  %v1395_v31 = vmul.f32 0.70710677, %v5605_v57  ;;  %v1346_v22 = vmul.f32 %v5548_v15, %v1326_v44 }
 0x481   : > { %3955 = vmatprep.mubr.f32.mxu1 %v5601_v14  ;;  %v4457_v62 = vpop.eup %4456  ;;  %v1421_v52 = vadd.f32 1.0, %v4455_v16  ;;  %v1345_v17 = vmul.f32 %v5548_v15, %v1325_v40 }
 0x482   : > { %3956 = vmatmul.mubr.f32.vlgmr.msra.gmra.mrb[16].mxu1 %v5610_v7  ;;  %v4459_v51 = vpop.eup %4458  ;;  %4472 = verf.f32 %v1395_v31  ;;  %v1328_v13 = vmul.f32 %v4457_v62, %v5521_v0  ;;  %v5627_v3 = vmul.f32 %v1422_v53, %v1374_v24  ;;  %v1366_v19 = vadd.f32 %v5554_v30, %v1346_v22 }
 0x483   : > { %v5623_v59 = vmul.f32 %v1421_v52, %v1373_v25  ;;  %4474 = verf.f32 %v1396_v56  ;;  %v1365_v29 = vadd.f32 %v5554_v30, %v1345_v17  ;;  %v1327_v54 = vmul.f32 %v4459_v51, %v5527_v21 }
 0x484   : > { %v4461_v55 = vpop.eup %4460  ;;  %v1348_v6 = vmul.f32 %v5548_v15, %v1328_v13  ;;  %v1376_v21 = vmul.f32 0.5, %v5582_v26  ;;  %v1398_v20 = vmul.f32 0.70710677, %v1366_v19  ;;  %v1377_v31 = vmul.f32 0.5, %v5592_v12 }
 0x485   : > { %v4463_v36 = vpop.eup %4462  ;;  %v1423_v48 = vadd.f32 1.0, %v4461_v55  ;;  %3958 = vmatprep.mubr.f32.mxu1 %v5623_v59  ;;  %v1397_v47 = vmul.f32 0.70710677, %v1365_v29  ;;  %v1347_v38 = vmul.f32 %v5548_v15, %v1327_v54  ;;  %v1378_v25 = vmul.f32 0.5, %v5595_v41 }
 0x486   : > { %v4465_v11 = vpop.eup %4464  ;;  %v1424_v0 = vadd.f32 1.0, %v4463_v36  ;;  %3959 = vmatmul.mubr.f32.gmra.mrb[18].mxu1 %v5627_v3  ;;  %v1368_v60 = vadd.f32 %v5554_v30, %v1348_v6  ;;  %v1379_v12 = vmul.f32 0.5, %v5605_v57  ;;  %v1380_v36 = vmul.f32 0.5, %v5608_v58 }
 0x487   : > { %v4467_v28 = vpop.eup %4466  ;;  %v5634_v1 = vmul.f32 %v1423_v48, %v1375_v33  ;;  %4476 = verf.f32 %v1397_v47  ;;  %v1367_v2 = vadd.f32 %v5554_v30, %v1347_v38  ;;  %v1330_v44 = vmul.f32 %v4465_v11, %v5535_v18 }
 0x488   : > { %v1329_v61 = vmul.f32 %v4467_v28, %v5541_v43  ;;  %v5641_v39 = vmul.f32 %v1424_v0, %v1376_v21  ;;  %4478 = verf.f32 %v1398_v20  ;;  %v1400_v40 = vmul.f32 0.70710677, %v1368_v60  ;;  %v4469_v16 = vpop.eup %4468 }
 0x489   : > { %3961 = vmatprep.mubr.f32.mxu1 %v5634_v1  ;;  %v1399_v24 = vmul.f32 0.70710677, %v1367_v2  ;;  %v4471_v53 = vpop.eup %4470  ;;  %v1425_v62 = vadd.f32 1.0, %v4469_v16  ;;  %v1350_v43 = vmul.f32 %v5548_v15, %v1330_v44  ;;  %v1381_v6 = vmul.f32 0.5, %v1365_v29 }
 0x48a   : > { %v1349_v26 = vmul.f32 %v5548_v15, %v1329_v61  ;;  %3962 = vmatmul.mubr.f32.gmra.mrb[20].mxu1 %v5641_v39  ;;  %4480 = verf.f32 %v1400_v40  ;;  %v1426_v52 = vadd.f32 1.0, %v4471_v53  ;;  %v1382_v0 = vmul.f32 0.5, %v1366_v19 }
 0x48b   : > { %4482 = verf.f32 %v1399_v24  ;;  %v5650_v17 = vmul.f32 %v1425_v62, %v1377_v31  ;;  %v1370_v51 = vadd.f32 %v5554_v30, %v1350_v43  ;;  %v1383_v61 = vmul.f32 0.5, %v1367_v2 }
 0x48c   : > { %v1369_v56 = vadd.f32 %v5554_v30, %v1349_v26  ;;  %v4473_v18 = vpop.eup %4472  ;;  %v5653_v22 = vmul.f32 %v1426_v52, %v1378_v25  ;;  %v1384_v44 = vmul.f32 0.5, %v1368_v60  ;;  %v3589_v60 = vld [vmem:[%s6908_s2 + $0x6] ss:$0 sm:$0xff] }
 0x48d   : > { %v4475_v33 = vpop.eup %4474  ;;  %v1427_v13 = vadd.f32 1.0, %v4473_v18  ;;  %3964 = vmatprep.mubr.f32.mxu1 %v5650_v17  ;;  %v1402_v41 = vmul.f32 0.70710677, %v1370_v51  ;;  %v1386_v31 = vmul.f32 0.5, %v1370_v51 }
 0x48e   : > { %v1401_v55 = vmul.f32 0.70710677, %v1369_v56  ;;  %v1428_v15 = vadd.f32 1.0, %v4475_v33  ;;  %3965 = vmatmul.mubr.f32.gmra.mrb[22].mxu1 %v5653_v22  ;;  %v1385_v26 = vmul.f32 0.5, %v1369_v56 }
 0x48f   : > { %v5658_v54 = vmul.f32 %v1427_v13, %v1379_v12 }
 0x490   : > { %4484 = verf.f32 %v1401_v55  ;;  %v5662_v48 = vmul.f32 %v1428_v15, %v1380_v36 }
 0x491   : > { %4486 = verf.f32 %v1402_v41  ;;  %v4477_v30 = vpop.eup %4476  ;;  %3967 = vmatprep.mubr.f32.mxu1 %v5658_v54 }
 0x492   : > { %v4479_v57 = vpop.eup %4478  ;;  %v1429_v11 = vadd.f32 1.0, %v4477_v30  ;;  %3968 = vmatmul.mubr.f32.gmra.mrb[24].mxu1 %v5662_v48 }
 0x493   : > { %v1430_v47 = vadd.f32 1.0, %v4479_v57 }
 0x494   : > { %v4481_v38 = vpop.eup %4480  ;;  %v5665_v28 = vmul.f32 %v1429_v11, %v1381_v6 }
 0x495   : > { %v4483_v21 = vpop.eup %4482  ;;  %v5667_v20 = vmul.f32 %v1430_v47, %v1382_v0  ;;  %v1432_v58 = vadd.f32 1.0, %v4481_v38 }
 0x496   : > { %3970 = vmatprep.mubr.f32.mxu1 %v5665_v28  ;;  %v1431_v40 = vadd.f32 1.0, %v4483_v21 }
 0x497   : > { %3971 = vmatmul.mubr.f32.gmra.mrb[26].mxu1 %v5667_v20  ;;  %v5673_v24 = vmul.f32 %v1432_v58, %v1384_v44 }
 0x498   : > { %v5671_v29 = vmul.f32 %v1431_v40, %v1383_v61 }
 0x49a   : > { %v4485_v16 = vpop.eup %4484  ;;  %3973 = vmatprep.mubr.f32.mxu1 %v5671_v29 }
 0x49b   : > { %v4487_v19 = vpop.eup %4486  ;;  %v1433_v53 = vadd.f32 1.0, %v4485_v16  ;;  %3974 = vmatmul.mubr.f32.gmra.mrb[28].mxu1 %v5673_v24 }
 0x49c   : > { %v1434_v62 = vadd.f32 1.0, %v4487_v19 }
 0x49d   : > { %v5677_v43 = vmul.f32 %v1433_v53, %v1385_v26 }
 0x49e   : > { %v5679_v2 = vmul.f32 %v1434_v62, %v1386_v31 }
 0x49f   : > { %6933 = vst [vmem:[#allocation8_spill] sm:$0xff] %v5677_v43  ;;  %3976 = vmatprep.mubr.f32.mxu1 %v5677_v43 }
 0x4a0   : > { %6934 = vst [vmem:[#allocation9_spill] sm:$0xff] %v5679_v2  ;;  %3977 = vmatmul.mubr.f32.gmra.mrb[30].mxu1 %v5679_v2 }
 0x555   : > { %v3957_v25 = vpop.f32.mrb[16].mxu1 }
 0x556   : > { %v5687_v52 = vadd.f32 %v3957_v25, %v3589_v60  ;;  %v1538_v56 = vpop.f32.mrb[17].mxu1 }
 0x557   : > { %v5689_v18 = vadd.f32 %v3589_v60, %v1538_v56 }
 0x558   : > { %v1621_v51 = vsel %vm1619_vm3, %v5687_v52, 0.0 }
 0x559   : > { %1638 = vadd.xlane.f32.xlu1 %v1621_v51  ;;  %v1620_v33 = vsel %vm1619_vm3, %v5689_v18, 0.0  ;;  %v3960_v12 = vpop.f32.mrb[18].mxu1 }
 0x55a   : > { %1636 = vadd.xlane.f32.xlu0 %v1620_v33  ;;  %v5697_v13 = vadd.f32 %v3960_v12, %v3589_v60  ;;  %v1548_v55 = vpop.f32.mrb[19].mxu1 }
 0x55b   : > { %v5699_v15 = vadd.f32 %v3589_v60, %v1548_v55 }
 0x55c   : > { %v1623_v41 = vsel %vm1619_vm3, %v5697_v13, 0.0 }
 0x55d   : > { %1642 = vadd.xlane.f32.xlu1 %v1623_v41  ;;  %v3963_v36 = vpop.f32.mrb[20].mxu1  ;;  %v1622_v30 = vsel %vm1619_vm3, %v5699_v15, 0.0 }
 0x55e   : > { %v5707_v57 = vadd.f32 %v3963_v36, %v3589_v60  ;;  %1640 = vadd.xlane.f32.xlu0 %v1622_v30  ;;  %v1558_v6 = vpop.f32.mrb[21].mxu1 }
 0x55f   : > { %v5709_v11 = vadd.f32 %v3589_v60, %v1558_v6 }
 0x560   : > { %v1625_v0 = vsel %vm1619_vm3, %v5707_v57, 0.0 }
 0x561   : > { %1646 = vadd.xlane.f32.xlu1 %v1625_v0  ;;  %v1624_v47 = vsel %vm1619_vm3, %v5709_v11, 0.0  ;;  %v3966_v38 = vpop.f32.mrb[22].mxu1 }
 0x562   : > { %1644 = vadd.xlane.f32.xlu0 %v1624_v47  ;;  %v5717_v21 = vadd.f32 %v3966_v38, %v3589_v60  ;;  %v1568_v58 = vpop.f32.mrb[23].mxu1 }
 0x563   : > { %v5719_v61 = vadd.f32 %v3589_v60, %v1568_v58 }
 0x564   : > { %v1627_v40 = vsel %vm1619_vm3, %v5717_v21, 0.0 }
 0x565   : > { %1650 = vadd.xlane.f32.xlu1 %v1627_v40  ;;  %v3969_v44 = vpop.f32.mrb[24].mxu1  ;;  %v1626_v16 = vsel %vm1619_vm3, %v5719_v61, 0.0 }
 0x566   : > { %v5727_v19 = vadd.f32 %v3969_v44, %v3589_v60  ;;  %1648 = vadd.xlane.f32.xlu0 %v1626_v16  ;;  %v1578_v26 = vpop.f32.mrb[25].mxu1 }
 0x567   : > { %v5729_v53 = vadd.f32 %v3589_v60, %v1578_v26 }
 0x568   : > { %v1629_v31 = vsel %vm1619_vm3, %v5727_v19, 0.0 }
 0x569   : > { %1654 = vadd.xlane.f32.xlu1 %v1629_v31  ;;  %v1628_v25 = vsel %vm1619_vm3, %v5729_v53, 0.0 }
 0x56a   : > { %v3972_v62 = vpop.f32.mrb[26].mxu1  ;;  %1652 = vadd.xlane.f32.xlu0 %v1628_v25 }
 0x56b   : > { %v5737_v56 = vadd.f32 %v3972_v62, %v3589_v60  ;;  %v1588_v51 = vpop.f32.mrb[27].mxu1 }
 0x56c   : > { %v5739_v33 = vadd.f32 %v3589_v60, %v1588_v51 }
 0x56d   : > { %v1631_v12 = vsel %vm1619_vm3, %v5737_v56, 0.0 }
 0x56e   : > { %1658 = vadd.xlane.f32.xlu1 %v1631_v12  ;;  %v3975_v55 = vpop.f32.mrb[28].mxu1  ;;  %v1630_v41 = vsel %vm1619_vm3, %v5739_v33, 0.0 }
 0x56f   : > { %v5747_v36 = vadd.f32 %v3975_v55, %v3589_v60  ;;  %1656 = vadd.xlane.f32.xlu0 %v1630_v41  ;;  %v1598_v30 = vpop.f32.mrb[29].mxu1 }
 0x570   : > { %v5749_v6 = vadd.f32 %v3589_v60, %v1598_v30 }
 0x571   : > { %v1633_v0 = vsel %vm1619_vm3, %v5747_v36, 0.0 }
 0x572   : > { %1662 = vadd.xlane.f32.xlu1 %v1633_v0  ;;  %v1632_v38 = vsel %vm1619_vm3, %v5749_v6, 0.0 }
 0x573   : > { %v3978_v47 = vpop.f32.mrb[30].mxu1  ;;  %1660 = vadd.xlane.f32.xlu0 %v1632_v38 }
 0x574   : > { %v5757_v58 = vadd.f32 %v3978_v47, %v3589_v60  ;;  %v1608_v40 = vpop.f32.mrb[31].mxu1 }
 0x575   : > { %v5759_v44 = vadd.f32 %v3589_v60, %v1608_v40 }
 0x576   : > { %v1635_v16 = vsel %vm1619_vm3, %v5757_v58, 0.0 }
 0x577   : > { %1666 = vadd.xlane.f32.xlu1 %v1635_v16  ;;  %v1634_v26 = vsel %vm1619_vm3, %v5759_v44, 0.0 }
 0x578   : > { %1664 = vadd.xlane.f32.xlu0 %v1634_v26 }
 0x5e6   : > { %v1639_v31 = vpop.xlane.xlu1 %1638 }
 0x5e7   : > { %v1669_v62 = vmul.f32 0.010416667, %v1639_v31  ;;  %v1637_v25 = vpop.xlane.xlu0 %1636 }
 0x5e8   : > { %v1668_v51 = vmul.f32 0.010416667, %v1637_v25 }
 0x5e9   : > { %v1685_v12 = vsub.f32 %v5687_v52, %v1669_v62 }
 0x5ea   : > { %v1684_v55 = vsub.f32 %v5689_v18, %v1668_v51  ;;  %v1643_v60 = vpop.xlane.xlu1 %1642 }
 0x5eb   : > { %v5771_v41 = vsel %vm1619_vm3, %v1685_v12, 0.0  ;;  %v1671_v30 = vmul.f32 0.010416667, %v1643_v60  ;;  %v1641_v0 = vpop.xlane.xlu0 %1640 }
 0x5ec   : > { %v1717_v47 = vmul.f32 %v5771_v41, %v5771_v41  ;;  %v5777_v38 = vsel %vm1619_vm3, %v1684_v55, 0.0  ;;  %v1670_v40 = vmul.f32 0.010416667, %v1641_v0 }
 0x5ed   : > { %v1716_v52 = vmul.f32 %v5777_v38, %v5777_v38  ;;  %v1687_v18 = vsub.f32 %v5697_v13, %v1671_v30 }
 0x5ee   : > { %1734 = vadd.xlane.f32.xlu1 %v1717_v47  ;;  %v1686_v16 = vsub.f32 %v5699_v15, %v1670_v40  ;;  %v1647_v26 = vpop.xlane.xlu1 %1646 }
 0x5ef   : > { %1732 = vadd.xlane.f32.xlu0 %v1716_v52  ;;  %v1673_v31 = vmul.f32 0.010416667, %v1647_v26  ;;  %v1645_v62 = vpop.xlane.xlu0 %1644  ;;  %v5785_v25 = vsel %vm1619_vm3, %v1687_v18, 0.0 }
 0x5f0   : > { %v1672_v51 = vmul.f32 0.010416667, %v1645_v62  ;;  %v1719_v12 = vmul.f32 %v5785_v25, %v5785_v25  ;;  %v5791_v55 = vsel %vm1619_vm3, %v1686_v16, 0.0 }
 0x5f1   : > { %v1689_v13 = vsub.f32 %v5707_v57, %v1673_v31  ;;  %v1718_v15 = vmul.f32 %v5791_v55, %v5791_v55 }
 0x5f2   : > { %v1688_v60 = vsub.f32 %v5709_v11, %v1672_v51  ;;  %1738 = vadd.xlane.f32.xlu1 %v1719_v12  ;;  %v1651_v30 = vpop.xlane.xlu1 %1650 }
 0x5f3   : > { %1736 = vadd.xlane.f32.xlu0 %v1718_v15  ;;  %v5799_v0 = vsel %vm1619_vm3, %v1689_v13, 0.0  ;;  %v1675_v47 = vmul.f32 0.010416667, %v1651_v30  ;;  %v1649_v40 = vpop.xlane.xlu0 %1648 }
 0x5f4   : > { %v1721_v52 = vmul.f32 %v5799_v0, %v5799_v0  ;;  %v5805_v57 = vsel %vm1619_vm3, %v1688_v60, 0.0  ;;  %v1674_v18 = vmul.f32 0.010416667, %v1649_v40 }
 0x5f5   : > { %v1720_v11 = vmul.f32 %v5805_v57, %v5805_v57  ;;  %v1691_v16 = vsub.f32 %v5717_v21, %v1675_v47 }
 0x5f6   : > { %1742 = vadd.xlane.f32.xlu1 %v1721_v52  ;;  %v1690_v26 = vsub.f32 %v5719_v61, %v1674_v18  ;;  %v1655_v31 = vpop.xlane.xlu1 %1654 }
 0x5f7   : > { %1740 = vadd.xlane.f32.xlu0 %v1720_v11  ;;  %v1677_v62 = vmul.f32 0.010416667, %v1655_v31  ;;  %v1653_v51 = vpop.xlane.xlu0 %1652  ;;  %v5813_v12 = vsel %vm1619_vm3, %v1691_v16, 0.0 }
 0x5f8   : > { %v1676_v13 = vmul.f32 0.010416667, %v1653_v51  ;;  %v1723_v15 = vmul.f32 %v5813_v12, %v5813_v12  ;;  %v5819_v60 = vsel %vm1619_vm3, %v1690_v26, 0.0 }
 0x5f9   : > { %v1693_v21 = vsub.f32 %v5727_v19, %v1677_v62  ;;  %v1722_v61 = vmul.f32 %v5819_v60, %v5819_v60 }
 0x5fa   : > { %v1692_v30 = vsub.f32 %v5729_v53, %v1676_v13  ;;  %1746 = vadd.xlane.f32.xlu1 %v1723_v15 }
 0x5fb   : > { %v1659_v47 = vpop.xlane.xlu1 %1658  ;;  %1744 = vadd.xlane.f32.xlu0 %v1722_v61  ;;  %v5827_v18 = vsel %vm1619_vm3, %v1693_v21, 0.0 }
 0x5fc   : > { %v1679_v40 = vmul.f32 0.010416667, %v1659_v47  ;;  %v1657_v52 = vpop.xlane.xlu0 %1656  ;;  %v1725_v16 = vmul.f32 %v5827_v18, %v5827_v18  ;;  %v5833_v19 = vsel %vm1619_vm3, %v1692_v30, 0.0 }
 0x5fd   : > { %v1678_v11 = vmul.f32 0.010416667, %v1657_v52  ;;  %v1724_v53 = vmul.f32 %v5833_v19, %v5833_v19 }
 0x5fe   : > { %v1695_v26 = vsub.f32 %v5737_v56, %v1679_v40  ;;  %1750 = vadd.xlane.f32.xlu1 %v1725_v16 }
 0x5ff   : > { %v1694_v31 = vsub.f32 %v5739_v33, %v1678_v11  ;;  %v1663_v62 = vpop.xlane.xlu1 %1662  ;;  %1748 = vadd.xlane.f32.xlu0 %v1724_v53  ;;  %v1949_v53 = vld [vmem:[#allocation2 + $0x148] sm:$0xff] }
 0x600   : > { %v1681_v51 = vmul.f32 0.010416667, %v1663_v62  ;;  %v1661_v13 = vpop.xlane.xlu0 %1660  ;;  %v5841_v15 = vsel %vm1619_vm3, %v1695_v26, 0.0  ;;  %v1948_v26 = vld [vmem:[#allocation2 + $0x140] sm:$0xff] }
 0x601   : > { %v1680_v21 = vmul.f32 0.010416667, %v1661_v13  ;;  %v1727_v61 = vmul.f32 %v5841_v15, %v5841_v15  ;;  %v5847_v56 = vsel %vm1619_vm3, %v1694_v31, 0.0 }
 0x602   : > { %v1697_v30 = vsub.f32 %v5747_v36, %v1681_v51  ;;  %v1726_v33 = vmul.f32 %v5847_v56, %v5847_v56 }
 0x603   : > { %v1696_v47 = vsub.f32 %v5749_v6, %v1680_v21  ;;  %1754 = vadd.xlane.f32.xlu1 %v1727_v61  ;;  %v4227_v6 = vpack.c.bf16 %v1949_v53, %v1948_v26  ;;  %v1954_v53 = vld [vmem:[#allocation2 + $0x170] sm:$0xff] }
 0x604   : > { %v1667_v40 = vpop.xlane.xlu1 %1666  ;;  %1752 = vadd.xlane.f32.xlu0 %v1726_v33  ;;  %v5855_v16 = vsel %vm1619_vm3, %v1697_v30, 0.0  ;;  %v1950_v30 = vld [vmem:[#allocation2 + $0x150] sm:$0xff]  ;;  %v1951_v33 = vld [vmem:[#allocation2 + $0x158] sm:$0xff] }
 0x605   : > { %v1683_v52 = vmul.f32 0.010416667, %v1667_v40  ;;  %v1665_v11 = vpop.xlane.xlu0 %1664  ;;  %v1729_v36 = vmul.f32 %v5855_v16, %v5855_v16  ;;  %v5861_v62 = vsel %vm1619_vm3, %v1696_v47, 0.0  ;;  %4228 = vmatprep.subr.bf16.mxu0 %v4227_v6  ;;  %v4231_v40 = vpack.c.bf16 %v1951_v33, %v1950_v30  ;;  %v1959_v30 = vld [vmem:[#allocation2 + $0x198] sm:$0xff] }
 0x606   : > { %v1682_v31 = vmul.f32 0.010416667, %v1665_v11  ;;  %v1728_v13 = vmul.f32 %v5861_v62, %v5861_v62  ;;  %4230 = vmatpush3.bf16.msra.mxu0 %v4227_v6  ;;  %v1953_v11 = vld [vmem:[#allocation2 + $0x168] sm:$0xff]  ;;  %v1956_v6 = vld [vmem:[#allocation2 + $0x180] sm:$0xff] }
 0x607   : > { %v1699_v51 = vsub.f32 %v5757_v58, %v1683_v52  ;;  %1758 = vadd.xlane.f32.xlu1 %v1729_v36  ;;  %4232 = vmatprep.subr.bf16.mxu0 %v4231_v40  ;;  %v1952_v52 = vld [vmem:[#allocation2 + $0x160] sm:$0xff] }
 0x608   : > { %v1698_v21 = vsub.f32 %v5759_v44, %v1682_v31  ;;  %1756 = vadd.xlane.f32.xlu0 %v1728_v13  ;;  %v4235_v26 = vpack.c.bf16 %v1953_v11, %v1952_v52  ;;  %v1955_v31 = vld [vmem:[#allocation2 + $0x178] sm:$0xff]  ;;  %v1962_v52 = vld [vmem:[#allocation2 + $0x1b0] sm:$0xff] }
 0x609   : > { %v5869_v61 = vsel %vm1619_vm3, %v1699_v51, 0.0  ;;  %v4239_v36 = vpack.c.bf16 %v1955_v31, %v1954_v53  ;;  %v1957_v51 = vld [vmem:[#allocation2 + $0x188] sm:$0xff]  ;;  %v1963_v11 = vld [vmem:[#allocation2 + $0x1b8] sm:$0xff] }
 0x60a   : > { %v1731_v47 = vmul.f32 %v5869_v61, %v5869_v61  ;;  %v5875_v58 = vsel %vm1619_vm3, %v1698_v21, 0.0  ;;  %4234 = vmatpush3.bf16.msra.mxu0 %v4231_v40  ;;  %v4243_v13 = vpack.c.bf16 %v1957_v51, %v1956_v6  ;;  %v1958_v21 = vld [vmem:[#allocation2 + $0x190] sm:$0xff]  ;;  %v1961_v40 = vld [vmem:[#allocation2 + $0x1a8] sm:$0xff] }
 0x60b   : > { %v1730_v44 = vmul.f32 %v5875_v58, %v5875_v58  ;;  %4236 = vmatprep.subr.bf16.mxu0 %v4235_v26  ;;  %v4247_v33 = vpack.c.bf16 %v1959_v30, %v1958_v21 }
 0x60c   : > { %1762 = vadd.xlane.f32.xlu1 %v1731_v47  ;;  %v1960_v47 = vld [vmem:[#allocation2 + $0x1a0] sm:$0xff] }
 0x60d   : > { %1760 = vadd.xlane.f32.xlu0 %v1730_v44  ;;  %v4251_v44 = vpack.c.bf16 %v1961_v40, %v1960_v47 }
 0x60e   : > { %4238 = vmatpush3.bf16.msra.mxu0 %v4235_v26  ;;  %v4255_v26 = vpack.c.bf16 %v1963_v11, %v1962_v52 }
 0x60f   : > { %4240 = vmatprep.subr.bf16.mxu0 %v4239_v36 }
 0x612   : > { %4242 = vmatpush3.bf16.msra.mxu0 %v4239_v36 }
 0x613   : > { %4244 = vmatprep.subr.bf16.mxu0 %v4243_v13 }
 0x616   : > { %4246 = vmatpush3.bf16.msra.mxu0 %v4243_v13 }
 0x617   : > { %4248 = vmatprep.subr.bf16.mxu0 %v4247_v33 }
 0x61a   : > { %4250 = vmatpush3.bf16.msra.mxu0 %v4247_v33 }
 0x61b   : > { %4252 = vmatprep.subr.bf16.mxu0 %v4251_v44 }
 0x61e   : > { %4254 = vmatpush3.bf16.msra.mxu0 %v4251_v44 }
 0x61f   : > { %4256 = vmatprep.subr.bf16.mxu0 %v4255_v26 }
 0x622   : > { %4258 = vmatpush3.bf16.msra.mxu0 %v4255_v26 }
 0x67b   : > { %v1735_v53 = vpop.xlane.xlu1 %1734 }
 0x67c   : > { %v1765_v31 = vmul.f32 0.010416667, %v1735_v53  ;;  %v1733_v36 = vpop.xlane.xlu0 %1732 }
 0x67d   : > { %v1764_v6 = vmul.f32 0.010416667, %v1733_v36 }
 0x67e   : > { %v1781_v51 = vadd.f32 1e-05, %v1765_v31 }
 0x67f   : > { %v1780_v13 = vadd.f32 1e-05, %v1764_v6  ;;  %v1739_v21 = vpop.xlane.xlu1 %1738  ;;  %v5882_v6 = vld [vmem:[%s6908_s2 + $0x7] ss:$0 sm:$0xff] }
 0x680   : > { %4488 = vrsqrt.f32 %v1781_v51  ;;  %v1767_v30 = vmul.f32 0.010416667, %v1739_v21  ;;  %v1737_v33 = vpop.xlane.xlu0 %1736 }
 0x681   : > { %4490 = vrsqrt.f32 %v1780_v13  ;;  %v1766_v32 = vmul.f32 0.010416667, %v1737_v33  ;;  %v5888_v33 = vld [vmem:[%s6908_s2 + $0x8] ss:$0 sm:$0xff] }
 0x682   : > { %v1783_v47 = vadd.f32 1e-05, %v1767_v30 }
 0x683   : > { %v1782_v40 = vadd.f32 1e-05, %v1766_v32  ;;  %v1743_v43 = vpop.xlane.xlu1 %1742 }
 0x684   : > { %4492 = vrsqrt.f32 %v1783_v47  ;;  %v1769_v52 = vmul.f32 0.010416667, %v1743_v43  ;;  %v1741_v44 = vpop.xlane.xlu0 %1740 }
 0x685   : > { %4494 = vrsqrt.f32 %v1782_v40  ;;  %v1768_v11 = vmul.f32 0.010416667, %v1741_v44 }
 0x686   : > { %v1785_v26 = vadd.f32 1e-05, %v1769_v52 }
 0x687   : > { %v1784_v53 = vadd.f32 1e-05, %v1768_v11  ;;  %v1747_v36 = vpop.xlane.xlu1 %1746 }
 0x688   : > { %4496 = vrsqrt.f32 %v1785_v26  ;;  %v1771_v51 = vmul.f32 0.010416667, %v1747_v36  ;;  %v1745_v13 = vpop.xlane.xlu0 %1744 }
 0x689   : > { %4498 = vrsqrt.f32 %v1784_v53  ;;  %v1770_v43 = vmul.f32 0.010416667, %v1745_v13 }
 0x68a   : > { %v4489_v31 = vpop.eup %4488  ;;  %v1787_v30 = vadd.f32 1e-05, %v1771_v51 }
 0x68b   : > { %v4491_v32 = vpop.eup %4490  ;;  %v1813_v21 = vmul.f32 %v4489_v31, %v5771_v41  ;;  %v1786_v52 = vadd.f32 1e-05, %v1770_v43  ;;  %v1751_v44 = vpop.xlane.xlu1 %1750 }
 0x68c   : > { %v1812_v47 = vmul.f32 %v4491_v32, %v5777_v38  ;;  %4500 = vrsqrt.f32 %v1787_v30  ;;  %v1773_v11 = vmul.f32 0.010416667, %v1751_v44  ;;  %v1749_v26 = vpop.xlane.xlu0 %1748 }
 0x68d   : > { %v1833_v40 = vmul.f32 %v5882_v6, %v1813_v21  ;;  %4502 = vrsqrt.f32 %v1786_v52  ;;  %v1772_v41 = vmul.f32 0.010416667, %v1749_v26 }
 0x68e   : > { %v1832_v53 = vmul.f32 %v5882_v6, %v1812_v47  ;;  %v4493_v36 = vpop.eup %4492  ;;  %v1789_v13 = vadd.f32 1e-05, %v1773_v11 }
 0x68f   : > { %v1853_v31 = vadd.f32 %v5888_v33, %v1833_v40  ;;  %v4495_v51 = vpop.eup %4494  ;;  %v1815_v38 = vmul.f32 %v4493_v36, %v5785_v25  ;;  %v1788_v32 = vadd.f32 1e-05, %v1772_v41 }
 0x690   : > { %v1852_v10 = vadd.f32 %v5888_v33, %v1832_v53  ;;  %v1755_v21 = vpop.xlane.xlu1 %1754  ;;  %v1814_v30 = vmul.f32 %v4495_v51, %v5791_v55  ;;  %4504 = vrsqrt.f32 %v1789_v13 }
 0x691   : > { %v1885_v43 = vmul.f32 0.70710677, %v1853_v31  ;;  %v1775_v44 = vmul.f32 0.010416667, %v1755_v21  ;;  %v1753_v2 = vpop.xlane.xlu0 %1752  ;;  %4506 = vrsqrt.f32 %v1788_v32  ;;  %v1835_v11 = vmul.f32 %v5882_v6, %v1815_v38 }
 0x692   : > { %v1884_v47 = vmul.f32 0.70710677, %v1852_v10  ;;  %v4497_v35 = vpop.eup %4496  ;;  %v1774_v52 = vmul.f32 0.010416667, %v1753_v2  ;;  %v1834_v40 = vmul.f32 %v5882_v6, %v1814_v30 }
 0x693   : > { %v4499_v26 = vpop.eup %4498  ;;  %v1791_v53 = vadd.f32 1e-05, %v1775_v44  ;;  %v1817_v25 = vmul.f32 %v4497_v35, %v5799_v0  ;;  %v5904_v51 = vadd.f32 %v5888_v33, %v1835_v11 }
 0x694   : > { %4508 = verf.f32 %v1884_v47  ;;  %v1790_v36 = vadd.f32 1e-05, %v1774_v52  ;;  %v1759_v41 = vpop.xlane.xlu1 %1758  ;;  %v5901_v55 = vadd.f32 %v5888_v33, %v1834_v40  ;;  %v1816_v32 = vmul.f32 %v4499_v26, %v5805_v57 }
 0x695   : > { %4510 = verf.f32 %v1885_v43  ;;  %v1777_v2 = vmul.f32 0.010416667, %v1759_v41  ;;  %v1757_v13 = vpop.xlane.xlu0 %1756  ;;  %v1837_v38 = vmul.f32 %v5882_v6, %v1817_v25  ;;  %v1887_v43 = vmul.f32 0.70710677, %v5904_v51 }
 0x696   : > { %4512 = vrsqrt.f32 %v1791_v53  ;;  %v1776_v21 = vmul.f32 0.010416667, %v1757_v13  ;;  %v1886_v35 = vmul.f32 0.70710677, %v5901_v55  ;;  %v4501_v0 = vpop.eup %4500  ;;  %v1836_v44 = vmul.f32 %v5882_v6, %v1816_v32 }
 0x697   : > { %4514 = vrsqrt.f32 %v1790_v36  ;;  %v1793_v30 = vadd.f32 1e-05, %v1777_v2  ;;  %v4503_v47 = vpop.eup %4502  ;;  %v5912_v11 = vadd.f32 %v5888_v33, %v1837_v38  ;;  %v1819_v57 = vmul.f32 %v4501_v0, %v5813_v12 }
 0x698   : > { %v1792_v52 = vadd.f32 1e-05, %v1776_v21  ;;  %4516 = verf.f32 %v1886_v35  ;;  %v5916_v25 = vadd.f32 %v5888_v33, %v1836_v44  ;;  %v1818_v36 = vmul.f32 %v4503_v47, %v5819_v60 }
 0x699   : > { %v1763_v40 = vpop.xlane.xlu1 %1762  ;;  %4518 = vrsqrt.f32 %v1793_v30  ;;  %v1889_v2 = vmul.f32 0.70710677, %v5912_v11  ;;  %v1869_v21 = vmul.f32 0.5, %v1853_v31  ;;  %v1839_v30 = vmul.f32 %v5882_v6, %v1819_v57 }
 0x69a   : > { %v1779_v26 = vmul.f32 0.010416667, %v1763_v40  ;;  %v1761_v53 = vpop.xlane.xlu0 %1760  ;;  %4520 = vrsqrt.f32 %v1792_v52  ;;  %v4505_v13 = vpop.eup %4504  ;;  %v1888_v38 = vmul.f32 0.70710677, %v5916_v25  ;;  %v1838_v0 = vmul.f32 %v5882_v6, %v1818_v36 }
 0x69b   : > { %v1778_v41 = vmul.f32 0.010416667, %v1761_v53  ;;  %4522 = verf.f32 %v1887_v43  ;;  %v4507_v35 = vpop.eup %4506  ;;  %v1868_v60 = vmul.f32 0.5, %v1852_v10  ;;  %v1821_v52 = vmul.f32 %v4505_v13, %v5827_v18 }
 0x69c   : > { %v1795_v32 = vadd.f32 1e-05, %v1779_v26  ;;  %4524 = verf.f32 %v1889_v2  ;;  %v1820_v47 = vmul.f32 %v4507_v35, %v5833_v19  ;;  %v5926_v43 = vadd.f32 %v5888_v33, %v1838_v0 }
 0x69d   : > { %v1794_v12 = vadd.f32 1e-05, %v1778_v41  ;;  %v5929_v26 = vadd.f32 %v5888_v33, %v1839_v30  ;;  %v1841_v10 = vmul.f32 %v5882_v6, %v1821_v52  ;;  %v1871_v52 = vmul.f32 0.5, %v5904_v51 }
 0x69e   : > { %v4509_v44 = vpop.eup %4508  ;;  %4526 = vrsqrt.f32 %v1795_v32  ;;  %v1840_v57 = vmul.f32 %v5882_v6, %v1820_v47  ;;  %v1890_v18 = vmul.f32 0.70710677, %v5926_v43 }
 0x69f   : > { %v4511_v40 = vpop.eup %4510  ;;  %4528 = vrsqrt.f32 %v1794_v12  ;;  %v1916_v31 = vadd.f32 1.0, %v4509_v44  ;;  %v1891_v13 = vmul.f32 0.70710677, %v5929_v26  ;;  %v5939_v35 = vadd.f32 %v5888_v33, %v1841_v10 }
 0x6a0   : > { %v4513_v53 = vpop.eup %4512  ;;  %v1917_v36 = vadd.f32 1.0, %v4511_v40  ;;  %4530 = verf.f32 %v1888_v38  ;;  %v5936_v32 = vadd.f32 %v5888_v33, %v1840_v57  ;;  %v1870_v44 = vmul.f32 0.5, %v5901_v55 }
 0x6a1   : > { %v4515_v41 = vpop.eup %4514  ;;  %v1932_v19 = vmul.f32 %v1916_v31, %v1868_v60  ;;  %4532 = verf.f32 %v1890_v18  ;;  %v1823_v0 = vmul.f32 %v4513_v53, %v5841_v15  ;;  %v1893_v40 = vmul.f32 0.70710677, %v5939_v35 }
 0x6a2   : > { %v1933_v2 = vmul.f32 %v1917_v36, %v1869_v21  ;;  %v4517_v12 = vpop.eup %4516  ;;  %v1822_v38 = vmul.f32 %v4515_v41, %v5847_v56  ;;  %4534 = verf.f32 %v1891_v13  ;;  %v1892_v60 = vmul.f32 0.70710677, %v5936_v32 }
 0x6a3   : > { %4011 = vmatprep.mubr.f32.mxu0 %v1932_v19  ;;  %v4519_v30 = vpop.eup %4518  ;;  %v1918_v21 = vadd.f32 1.0, %v4517_v12  ;;  %v1843_v36 = vmul.f32 %v5882_v6, %v1823_v0 }
 0x6a4   : > { %4012 = vmatmul.mubr.f32.vlgmr.msra.gmra.mrb[32].mxu0 %v1933_v2  ;;  %v4521_v47 = vpop.eup %4520  ;;  %v1842_v31 = vmul.f32 %v5882_v6, %v1822_v38  ;;  %4536 = verf.f32 %v1892_v60  ;;  %v1825_v55 = vmul.f32 %v4519_v30, %v5855_v16 }
 0x6a5   : > { %v4523_v56 = vpop.eup %4522  ;;  %v1934_v57 = vmul.f32 %v1918_v21, %v1870_v44  ;;  %v1824_v15 = vmul.f32 %v4521_v47, %v5861_v62  ;;  %4538 = verf.f32 %v1893_v40  ;;  %v5953_v51 = vadd.f32 %v5888_v33, %v1843_v36 }
 0x6a6   : > { %v4525_v53 = vpop.eup %4524  ;;  %v1919_v10 = vadd.f32 1.0, %v4523_v56  ;;  %v1862_v41 = vadd.f32 %v5888_v33, %v1842_v31  ;;  %v1845_v2 = vmul.f32 %v5882_v6, %v1825_v55  ;;  %v1872_v62 = vmul.f32 0.5, %v5916_v25 }
 0x6a7   : > { %4014 = vmatprep.mubr.f32.mxu0 %v1934_v57  ;;  %v1844_v18 = vmul.f32 %v5882_v6, %v1824_v15  ;;  %v1921_v0 = vadd.f32 1.0, %v4525_v53  ;;  %v1895_v30 = vmul.f32 0.70710677, %v5953_v51 }
 0x6a8   : > { %v4527_v19 = vpop.eup %4526  ;;  %v1935_v12 = vmul.f32 %v1919_v10, %v1871_v52  ;;  %v1894_v38 = vmul.f32 0.70710677, %v1862_v41  ;;  %v1865_v21 = vadd.f32 %v5888_v33, %v1845_v2  ;;  %v1873_v52 = vmul.f32 0.5, %v5912_v11 }
 0x6a9   : > { %v4529_v13 = vpop.eup %4528  ;;  %v1864_v44 = vadd.f32 %v5888_v33, %v1844_v18  ;;  %v1827_v40 = vmul.f32 %v4527_v19, %v5869_v61  ;;  %v1874_v10 = vmul.f32 0.5, %v5926_v43 }
 0x6aa   : > { %v4531_v16 = vpop.eup %4530  ;;  %4015 = vmatmul.mubr.f32.gmra.mrb[34].mxu0 %v1935_v12  ;;  %4540 = verf.f32 %v1894_v38  ;;  %v1826_v47 = vmul.f32 %v4529_v13, %v5875_v58  ;;  %v1897_v56 = vmul.f32 0.70710677, %v1865_v21  ;;  %v1937_v53 = vmul.f32 %v1921_v0, %v1873_v52 }
 0x6ab   : > { %v1920_v60 = vadd.f32 1.0, %v4531_v16  ;;  %4542 = verf.f32 %v1895_v30  ;;  %v1896_v25 = vmul.f32 0.70710677, %v1864_v44  ;;  %v4533_v31 = vpop.eup %4532  ;;  %v1847_v15 = vmul.f32 %v5882_v6, %v1827_v40 }
 0x6ac   : > { %v1846_v57 = vmul.f32 %v5882_v6, %v1826_v47  ;;  %v4535_v55 = vpop.eup %4534  ;;  %v1922_v18 = vadd.f32 1.0, %v4533_v31  ;;  %v1875_v13 = vmul.f32 0.5, %v5929_v26  ;;  %v1876_v6 = vmul.f32 0.5, %v5936_v32 }
 0x6ad   : > { %v1936_v36 = vmul.f32 %v1920_v60, %v1872_v62  ;;  %4544 = verf.f32 %v1896_v25  ;;  %v1923_v58 = vadd.f32 1.0, %v4535_v55  ;;  %v1867_v11 = vadd.f32 %v5888_v33, %v1847_v15 }
 0x6ae   : > { %4546 = verf.f32 %v1897_v56  ;;  %v1866_v61 = vadd.f32 %v5888_v33, %v1846_v57  ;;  %v4537_v19 = vpop.eup %4536  ;;  %v1938_v2 = vmul.f32 %v1922_v18, %v1874_v10  ;;  %v1877_v60 = vmul.f32 0.5, %v5939_v35 }
 0x6af   : > { %4017 = vmatprep.mubr.f32.mxu0 %v1936_v36  ;;  %v4539_v12 = vpop.eup %4538  ;;  %v1924_v62 = vadd.f32 1.0, %v4537_v19  ;;  %v1939_v43 = vmul.f32 %v1923_v58, %v1875_v13  ;;  %v1899_v0 = vmul.f32 0.70710677, %v1867_v11  ;;  %v1878_v26 = vmul.f32 0.5, %v1862_v41 }
 0x6b0   : > { %4018 = vmatmul.mubr.f32.gmra.mrb[36].mxu0 %v1937_v53  ;;  %v1898_v38 = vmul.f32 0.70710677, %v1866_v61  ;;  %v1925_v16 = vadd.f32 1.0, %v4539_v12  ;;  %v1879_v36 = vmul.f32 0.5, %v5953_v51  ;;  %v1880_v57 = vmul.f32 0.5, %v1864_v44 }
 0x6b1   : > { %4020 = vmatprep.mubr.f32.mxu0 %v1938_v2  ;;  %v1940_v30 = vmul.f32 %v1924_v62, %v1876_v6  ;;  %v1881_v10 = vmul.f32 0.5, %v1865_v21  ;;  %v1882_v19 = vmul.f32 0.5, %v1866_v61  ;;  %v1883_v6 = vmul.f32 0.5, %v1867_v11 }
 0x6b2   : > { %4548 = verf.f32 %v1898_v38  ;;  %v1941_v40 = vmul.f32 %v1925_v16, %v1877_v60  ;;  %v2111_v21 = vsel %vm2109_vm4, %v5251_v63, 0.0  ;;  %v2110_v11 = vsel %vm2109_vm4, %v5253_v5, 0.0 }
 0x6b3   : > { %4550 = verf.f32 %v1899_v0 }
 0x6b4   : > { %4021 = vmatmul.mubr.f32.gmra.mrb[38].mxu0 %v1939_v43  ;;  %v4541_v33 = vpop.eup %4540  ;;  %v5982_v43 = vld [vmem:[%s6908_s2 + $0x9] ss:$0 sm:$0xff] }
 0x6b5   : > { %4023 = vmatprep.mubr.f32.mxu0 %v1940_v30  ;;  %v4543_v47 = vpop.eup %4542  ;;  %v1926_v52 = vadd.f32 1.0, %v4541_v33 }
 0x6b6   : > { %v1927_v25 = vadd.f32 1.0, %v4543_v47  ;;  %v2113_v47 = vsel %vm2109_vm4, %v5255_v45, 0.0  ;;  %v2115_v45 = vsel %vm2109_vm4, %v5259_v50, 0.0 }
 0x6b7   : > { %v4545_v32 = vpop.eup %4544  ;;  %v1942_v31 = vmul.f32 %v1926_v52, %v1878_v26  ;;  %v2112_v26 = vsel %vm2109_vm4, %v5257_v37, 0.0 }
 0x6b8   : > { %4024 = vmatmul.mubr.f32.gmra.mrb[40].mxu0 %v1941_v40  ;;  %v4547_v56 = vpop.eup %4546  ;;  %v1928_v15 = vadd.f32 1.0, %v4545_v32  ;;  %v1943_v55 = vmul.f32 %v1927_v25, %v1879_v36 }
 0x6b9   : > { %4026 = vmatprep.mubr.f32.mxu0 %v1942_v31  ;;  %v1929_v53 = vadd.f32 1.0, %v4547_v56 }
 0x6ba   : > { %v1944_v35 = vmul.f32 %v1928_v15, %v1880_v57  ;;  %v2114_v57 = vsel %vm2109_vm4, %v5261_v42, 0.0 }
 0x6bb   : > { %v1945_v41 = vmul.f32 %v1929_v53, %v1881_v10  ;;  %v2117_v10 = vsel %vm2109_vm4, %v5263_v8, 0.0 }
 0x6bc   : > { %4027 = vmatmul.mubr.f32.gmra.mrb[42].mxu0 %v1943_v55  ;;  %v4549_v18 = vpop.eup %4548 }
 0x6bd   : > { %4029 = vmatprep.mubr.f32.mxu0 %v1944_v35  ;;  %v4551_v58 = vpop.eup %4550  ;;  %v1930_v2 = vadd.f32 1.0, %v4549_v18 }
 0x6be   : > { %v1931_v13 = vadd.f32 1.0, %v4551_v58  ;;  %v2116_v58 = vsel %vm2109_vm4, %v5265_v4, 0.0  ;;  %v2119_v4 = vsel %vm2109_vm4, %v5267_v46, 0.0 }
 0x6bf   : > { %v1946_v12 = vmul.f32 %v1930_v2, %v1882_v19 }
 0x6c0   : > { %4030 = vmatmul.mubr.f32.gmra.mrb[44].mxu0 %v1945_v41  ;;  %v1947_v51 = vmul.f32 %v1931_v13, %v1883_v6 }
 0x6c1   : > { %4032 = vmatprep.mubr.f32.mxu0 %v1946_v12 }
 0x6c4   : > { %4033 = vmatmul.mubr.f32.gmra.mrb[46].mxu0 %v1947_v51 }
 0x777   : > { %v4013_v44 = vpop.f32.mrb[32].mxu0 }
 0x778   : > { %v2127_v62 = vadd.f32 %v4013_v44, %v5610_v7  ;;  %v2030_v38 = vpop.f32.mrb[33].mxu0  ;;  %v2118_v44 = vsel %vm2109_vm4, %v5269_v9, 0.0  ;;  %v2121_v9 = vsel %vm2109_vm4, %v5271_v27, 0.0 }
 0x779   : > { %v2126_v61 = vadd.f32 %v2030_v38, %v5601_v14 }
 0x77a   : > { %v2143_v16 = vadd.f32 %v2127_v62, %v2111_v21 }
 0x77b   : > { %v2142_v0 = vadd.f32 %v2126_v61, %v2110_v11 }
 0x77c   : > { %v5988_v7 = vadd.f32 %v5982_v43, %v2143_v16 }
 0x77d   : > { %v5991_v30 = vadd.f32 %v5982_v43, %v2142_v0  ;;  %v4016_v63 = vpop.f32.mrb[34].mxu0 }
 0x77e   : > { %v2182_v14 = vsel %vm577_vm1, %v5988_v7, 0.0  ;;  %v2129_v60 = vadd.f32 %v4016_v63, %v5627_v3  ;;  %v2040_v33 = vpop.f32.mrb[35].mxu0  ;;  %v2120_v63 = vsel %vm2109_vm4, %v5273_v34, 0.0  ;;  %v2123_v34 = vsel %vm2109_vm4, %v5275_v49, 0.0 }
 0x77f   : > { %2199 = vadd.xlane.f32.xlu1 %v2182_v14  ;;  %v2181_v5 = vsel %vm577_vm1, %v5991_v30, 0.0  ;;  %v2128_v40 = vadd.f32 %v2040_v33, %v5623_v59 }
 0x780   : > { %2197 = vadd.xlane.f32.xlu0 %v2181_v5  ;;  %v2145_v52 = vadd.f32 %v2129_v60, %v2113_v47 }
 0x781   : > { %v2144_v25 = vadd.f32 %v2128_v40, %v2112_v26 }
 0x782   : > { %v6008_v32 = vadd.f32 %v5982_v43, %v2145_v52  ;;  %v6935_v52 = vld [vmem:[#allocation5_spill] sm:$0xff] }
 0x783   : > { %v4019_v3 = vpop.f32.mrb[36].mxu0  ;;  %v6012_v56 = vadd.f32 %v5982_v43, %v2144_v25  ;;  %v2122_v25 = vsel %vm2109_vm4, %v6935_v52, 0.0 }
 0x784   : > { %v2131_v31 = vadd.f32 %v4019_v3, %v5641_v39  ;;  %v2050_v36 = vpop.f32.mrb[37].mxu0  ;;  %v2184_v37 = vsel %vm577_vm1, %v6008_v32, 0.0 }
 0x785   : > { %v2130_v59 = vadd.f32 %v2050_v36, %v5634_v1  ;;  %2203 = vadd.xlane.f32.xlu1 %v2184_v37  ;;  %v2183_v39 = vsel %vm577_vm1, %v6012_v56, 0.0 }
 0x786   : > { %v2147_v15 = vadd.f32 %v2131_v31, %v2115_v45  ;;  %2201 = vadd.xlane.f32.xlu0 %v2183_v39  ;;  %v6938_v39 = vld [vmem:[#allocation8_spill] sm:$0xff] }
 0x787   : > { %v2146_v55 = vadd.f32 %v2130_v59, %v2114_v57  ;;  %v4022_v53 = vpop.f32.mrb[38].mxu0  ;;  %v6937_v57 = vld [vmem:[#allocation6_spill] sm:$0xff] }
 0x788   : > { %v2133_v50 = vadd.f32 %v4022_v53, %v5653_v22  ;;  %v2060_v1 = vpop.f32.mrb[39].mxu0  ;;  %v6029_v35 = vadd.f32 %v5982_v43, %v2147_v15  ;;  %v2125_v15 = vsel %vm2109_vm4, %v6937_v57, 0.0 }
 0x789   : > { %v2132_v42 = vadd.f32 %v2060_v1, %v5650_v17  ;;  %v6036_v18 = vadd.f32 %v5982_v43, %v2146_v55 }
 0x78a   : > { %v2149_v41 = vadd.f32 %v2133_v50, %v2117_v10  ;;  %v2186_v22 = vsel %vm577_vm1, %v6029_v35, 0.0  ;;  %v6939_v50 = vld [vmem:[#allocation7_spill] sm:$0xff] }
 0x78b   : > { %v2148_v19 = vadd.f32 %v2132_v42, %v2116_v58  ;;  %2207 = vadd.xlane.f32.xlu1 %v2186_v22  ;;  %v4025_v2 = vpop.f32.mrb[40].mxu0  ;;  %v2185_v8 = vsel %vm577_vm1, %v6036_v18, 0.0  ;;  %v2124_v1 = vsel %vm2109_vm4, %v6939_v50, 0.0 }
 0x78c   : > { %v2135_v17 = vadd.f32 %v4025_v2, %v5662_v48  ;;  %2205 = vadd.xlane.f32.xlu0 %v2185_v8  ;;  %v2070_v13 = vpop.f32.mrb[41].mxu0  ;;  %v6049_v12 = vadd.f32 %v5982_v43, %v2149_v41 }
 0x78d   : > { %v2134_v6 = vadd.f32 %v2070_v13, %v5658_v54  ;;  %v6056_v51 = vadd.f32 %v5982_v43, %v2148_v19 }
 0x78e   : > { %v2151_v62 = vadd.f32 %v2135_v17, %v2119_v4  ;;  %v2188_v48 = vsel %vm577_vm1, %v6049_v12, 0.0 }
 0x78f   : > { %v2150_v38 = vadd.f32 %v2134_v6, %v2118_v44  ;;  %2211 = vadd.xlane.f32.xlu1 %v2188_v48  ;;  %v4028_v21 = vpop.f32.mrb[42].mxu0  ;;  %v2187_v46 = vsel %vm577_vm1, %v6056_v51, 0.0 }
 0x790   : > { %v2137_v54 = vadd.f32 %v4028_v21, %v5667_v20  ;;  %2209 = vadd.xlane.f32.xlu0 %v2187_v46  ;;  %v2080_v61 = vpop.f32.mrb[43].mxu0  ;;  %v6069_v11 = vadd.f32 %v5982_v43, %v2151_v62 }
 0x791   : > { %v2136_v16 = vadd.f32 %v2080_v61, %v5665_v28  ;;  %v6076_v0 = vadd.f32 %v5982_v43, %v2150_v38 }
 0x792   : > { %v2153_v14 = vadd.f32 %v2137_v54, %v2121_v9  ;;  %v2190_v20 = vsel %vm577_vm1, %v6069_v11, 0.0 }
 0x793   : > { %v2152_v60 = vadd.f32 %v2136_v16, %v2120_v63  ;;  %2215 = vadd.xlane.f32.xlu1 %v2190_v20  ;;  %v4031_v33 = vpop.f32.mrb[44].mxu0  ;;  %v2189_v27 = vsel %vm577_vm1, %v6076_v0, 0.0 }
 0x794   : > { %v2139_v28 = vadd.f32 %v4031_v33, %v5673_v24  ;;  %2213 = vadd.xlane.f32.xlu0 %v2189_v27  ;;  %v2090_v5 = vpop.f32.mrb[45].mxu0  ;;  %v6089_v47 = vadd.f32 %v5982_v43, %v2153_v14 }
 0x795   : > { %v2138_v40 = vadd.f32 %v2090_v5, %v5671_v29  ;;  %v6096_v26 = vadd.f32 %v5982_v43, %v2152_v60  ;;  %v6936_v29 = vld [vmem:[#allocation9_spill] sm:$0xff] }
 0x796   : > { %v2155_v3 = vadd.f32 %v2139_v28, %v2123_v34  ;;  %v2192_v24 = vsel %vm577_vm1, %v6089_v47, 0.0 }
 0x797   : > { %v2154_v31 = vadd.f32 %v2138_v40, %v2122_v25  ;;  %2219 = vadd.xlane.f32.xlu1 %v2192_v24  ;;  %v4034_v36 = vpop.f32.mrb[46].mxu0  ;;  %v2191_v49 = vsel %vm577_vm1, %v6096_v26, 0.0 }
 0x798   : > { %v2141_v45 = vadd.f32 %v4034_v36, %v6936_v29  ;;  %2217 = vadd.xlane.f32.xlu0 %v2191_v49  ;;  %v2100_v59 = vpop.f32.mrb[47].mxu0  ;;  %v6109_v37 = vadd.f32 %v5982_v43, %v2155_v3 }
 0x799   : > { %v2140_v55 = vadd.f32 %v2100_v59, %v6938_v39  ;;  %v6116_v53 = vadd.f32 %v5982_v43, %v2154_v31 }
 0x79a   : > { %v2157_v10 = vadd.f32 %v2141_v45, %v2125_v15  ;;  %v2194_v42 = vsel %vm577_vm1, %v6109_v37, 0.0 }
 0x79b   : > { %v2156_v58 = vadd.f32 %v2140_v55, %v2124_v1  ;;  %2223 = vadd.xlane.f32.xlu1 %v2194_v42  ;;  %v2193_v41 = vsel %vm577_vm1, %v6116_v53, 0.0 }
 0x79c   : > { %2221 = vadd.xlane.f32.xlu0 %v2193_v41  ;;  %v6128_v22 = vadd.f32 %v5982_v43, %v2157_v10 }
 0x79d   : > { %v6131_v19 = vadd.f32 %v5982_v43, %v2156_v58 }
 0x79e   : > { %v2196_v2 = vsel %vm577_vm1, %v6128_v22, 0.0 }
 0x79f   : > { %2227 = vadd.xlane.f32.xlu1 %v2196_v2  ;;  %v2195_v8 = vsel %vm577_vm1, %v6131_v19, 0.0 }
 0x7a0   : > { %2225 = vadd.xlane.f32.xlu0 %v2195_v8 }
 0x80c   : > { %v2200_v17 = vpop.xlane.xlu1 %2199 }
 0x80d   : > { %v2230_v13 = vmul.f32 0.015625, %v2200_v17  ;;  %v2198_v4 = vpop.xlane.xlu0 %2197 }
 0x80e   : > { %v2229_v6 = vmul.f32 0.015625, %v2198_v4 }
 0x80f   : > { %v2246_v44 = vsub.f32 %v5988_v7, %v2230_v13 }
 0x810   : > { %v2245_v62 = vsub.f32 %v5991_v30, %v2229_v6 }
 0x811   : > { %v6143_v43 = vsel %vm577_vm1, %v2246_v44, 0.0 }
 0x812   : > { %v6147_v48 = vsel %vm577_vm1, %v2245_v62, 0.0  ;;  %v2278_v38 = vmul.f32 %v6143_v43, %v6143_v43  ;;  %v2204_v21 = vpop.xlane.xlu1 %2203 }
 0x813   : > { %v2277_v46 = vmul.f32 %v6147_v48, %v6147_v48  ;;  %v2232_v54 = vmul.f32 0.015625, %v2204_v21  ;;  %v2202_v61 = vpop.xlane.xlu0 %2201 }
 0x814   : > { %2295 = vadd.xlane.f32.xlu1 %v2278_v38  ;;  %v2231_v7 = vmul.f32 0.015625, %v2202_v61 }
 0x815   : > { %2293 = vadd.xlane.f32.xlu0 %v2277_v46  ;;  %v2248_v30 = vsub.f32 %v6008_v32, %v2232_v54  ;;  %v2509_v46 = vld [vmem:[#allocation2 + $0x1c0] sm:$0xff]  ;;  %v2510_v54 = vld [vmem:[#allocation2 + $0x1c8] sm:$0xff] }
 0x816   : > { %v2247_v9 = vsub.f32 %v6012_v56, %v2231_v7 }
 0x817   : > { %v6157_v16 = vsel %vm577_vm1, %v2248_v30, 0.0 }
 0x818   : > { %v2208_v63 = vpop.xlane.xlu1 %2207  ;;  %v6161_v14 = vsel %vm577_vm1, %v2247_v9, 0.0  ;;  %v2280_v33 = vmul.f32 %v6157_v16, %v6157_v16  ;;  %v4259_v9 = vpack.c.bf16 %v2510_v54, %v2509_v46 }
 0x819   : > { %v2234_v20 = vmul.f32 0.015625, %v2208_v63  ;;  %v2206_v60 = vpop.xlane.xlu0 %2205  ;;  %v2279_v32 = vmul.f32 %v6161_v14, %v6161_v14 }
 0x81a   : > { %v2233_v27 = vmul.f32 0.015625, %v2206_v60  ;;  %2299 = vadd.xlane.f32.xlu1 %v2280_v33  ;;  %4260 = vmatprep.subr.bf16.mxu1 %v4259_v9 }
 0x81b   : > { %v2250_v56 = vsub.f32 %v6029_v35, %v2234_v20  ;;  %2297 = vadd.xlane.f32.xlu0 %v2279_v32  ;;  %4262 = vmatpush3.bf16.msra.mxu1 %v4259_v9  ;;  %v2512_v32 = vld [vmem:[#allocation2 + $0x1d8] sm:$0xff] }
 0x81c   : > { %v2249_v28 = vsub.f32 %v6036_v18, %v2233_v27  ;;  %v2212_v5 = vpop.xlane.xlu1 %2211  ;;  %v2511_v27 = vld [vmem:[#allocation2 + $0x1d0] sm:$0xff] }
 0x81d   : > { %v6171_v34 = vsel %vm577_vm1, %v2250_v56, 0.0  ;;  %v2236_v40 = vmul.f32 0.015625, %v2212_v5  ;;  %v2210_v52 = vpop.xlane.xlu0 %2209 }
 0x81e   : > { %v6175_v25 = vsel %vm577_vm1, %v2249_v28, 0.0  ;;  %v2235_v3 = vmul.f32 0.015625, %v2210_v52  ;;  %v2282_v24 = vmul.f32 %v6171_v34, %v6171_v34  ;;  %v4263_v28 = vpack.c.bf16 %v2512_v32, %v2511_v27  ;;  %v2514_v52 = vld [vmem:[#allocation2 + $0x1e8] sm:$0xff] }
 0x81f   : > { %v2252_v35 = vsub.f32 %v6049_v12, %v2236_v40  ;;  %v2281_v18 = vmul.f32 %v6175_v25, %v6175_v25  ;;  %v2513_v40 = vld [vmem:[#allocation2 + $0x1e0] sm:$0xff]  ;;  %v6260_v32 = vld [vmem:[%s6908_s2 + $0xb] ss:$0 sm:$0xff] }
 0x820   : > { %v2251_v31 = vsub.f32 %v6056_v51, %v2235_v3  ;;  %v2216_v36 = vpop.xlane.xlu1 %2215  ;;  %2303 = vadd.xlane.f32.xlu1 %v2282_v24  ;;  %4264 = vmatprep.subr.bf16.mxu1 %v4263_v28  ;;  %v4267_v3 = vpack.c.bf16 %v2514_v52, %v2513_v40  ;;  %v2515_v24 = vld [vmem:[#allocation2 + $0x1f0] sm:$0xff] }
 0x821   : > { %v6185_v49 = vsel %vm577_vm1, %v2252_v35, 0.0  ;;  %v2238_v29 = vmul.f32 0.015625, %v2216_v36  ;;  %2301 = vadd.xlane.f32.xlu0 %v2281_v18  ;;  %v2214_v45 = vpop.xlane.xlu0 %2213  ;;  %4266 = vmatpush3.bf16.msra.mxu1 %v4263_v28  ;;  %v2516_v35 = vld [vmem:[#allocation2 + $0x1f8] sm:$0xff]  ;;  %v2518_v36 = vld [vmem:[#allocation2 + $0x208] sm:$0xff] }
 0x822   : > { %v6189_v59 = vsel %vm577_vm1, %v2251_v31, 0.0  ;;  %v2237_v57 = vmul.f32 0.015625, %v2214_v45  ;;  %v2284_v12 = vmul.f32 %v6185_v49, %v6185_v49  ;;  %4268 = vmatprep.subr.bf16.mxu1 %v4267_v3  ;;  %v4271_v18 = vpack.c.bf16 %v2516_v35, %v2515_v24  ;;  %v2517_v31 = vld [vmem:[#allocation2 + $0x200] sm:$0xff]  ;;  %v2519_v45 = vld [vmem:[#allocation2 + $0x210] sm:$0xff] }
 0x823   : > { %v2254_v15 = vsub.f32 %v6069_v11, %v2238_v29  ;;  %v2283_v51 = vmul.f32 %v6189_v59, %v6189_v59  ;;  %v4275_v29 = vpack.c.bf16 %v2518_v36, %v2517_v31 }
 0x824   : > { %v2253_v39 = vsub.f32 %v6076_v0, %v2237_v57  ;;  %v2220_v55 = vpop.xlane.xlu1 %2219  ;;  %2307 = vadd.xlane.f32.xlu1 %v2284_v12  ;;  %v2520_v57 = vld [vmem:[#allocation2 + $0x218] sm:$0xff] }
 0x825   : > { %v6199_v50 = vsel %vm577_vm1, %v2254_v15, 0.0  ;;  %v2240_v1 = vmul.f32 0.015625, %v2220_v55  ;;  %2305 = vadd.xlane.f32.xlu0 %v2283_v51  ;;  %v2218_v10 = vpop.xlane.xlu0 %2217  ;;  %4270 = vmatpush3.bf16.msra.mxu1 %v4267_v3  ;;  %v4279_v12 = vpack.c.bf16 %v2520_v57, %v2519_v45  ;;  %v2521_v15 = vld [vmem:[#allocation2 + $0x220] sm:$0xff]  ;;  %v2522_v51 = vld [vmem:[#allocation2 + $0x228] sm:$0xff]  ;;  %v2523_v55 = vld [vmem:[#allocation2 + $0x230] sm:$0xff] }
 0x826   : > { %v6203_v42 = vsel %vm577_vm1, %v2253_v39, 0.0  ;;  %v2239_v58 = vmul.f32 0.015625, %v2218_v10  ;;  %v2286_v11 = vmul.f32 %v6199_v50, %v6199_v50  ;;  %4272 = vmatprep.subr.bf16.mxu1 %v4271_v18  ;;  %v4283_v39 = vpack.c.bf16 %v2522_v51, %v2521_v15 }
 0x827   : > { %v2256_v41 = vsub.f32 %v6089_v47, %v2240_v1  ;;  %v2285_v0 = vmul.f32 %v6203_v42, %v6203_v42  ;;  %v2524_v1 = vld [vmem:[#allocation2 + $0x238] sm:$0xff] }
 0x828   : > { %v2255_v2 = vsub.f32 %v6096_v26, %v2239_v58  ;;  %v2224_v8 = vpop.xlane.xlu1 %2223  ;;  %2311 = vadd.xlane.f32.xlu1 %v2286_v11  ;;  %v4287_v10 = vpack.c.bf16 %v2524_v1, %v2523_v55 }
 0x829   : > { %v6213_v17 = vsel %vm577_vm1, %v2256_v41, 0.0  ;;  %v2242_v13 = vmul.f32 0.015625, %v2224_v8  ;;  %2309 = vadd.xlane.f32.xlu0 %v2285_v0  ;;  %v2222_v4 = vpop.xlane.xlu0 %2221  ;;  %4274 = vmatpush3.bf16.msra.mxu1 %v4271_v18 }
 0x82a   : > { %v6217_v6 = vsel %vm577_vm1, %v2255_v2, 0.0  ;;  %v2241_v44 = vmul.f32 0.015625, %v2222_v4  ;;  %v2288_v47 = vmul.f32 %v6213_v17, %v6213_v17  ;;  %4276 = vmatprep.subr.bf16.mxu1 %v4275_v29 }
 0x82b   : > { %v2258_v62 = vsub.f32 %v6109_v37, %v2242_v13  ;;  %v2287_v26 = vmul.f32 %v6217_v6, %v6217_v6 }
 0x82c   : > { %v2257_v38 = vsub.f32 %v6116_v53, %v2241_v44  ;;  %2315 = vadd.xlane.f32.xlu1 %v2288_v47  ;;  %v2228_v21 = vpop.xlane.xlu1 %2227 }
 0x82d   : > { %v6227_v61 = vsel %vm577_vm1, %v2258_v62, 0.0  ;;  %v2244_v7 = vmul.f32 0.015625, %v2228_v21  ;;  %2313 = vadd.xlane.f32.xlu0 %v2287_v26  ;;  %v2226_v30 = vpop.xlane.xlu0 %2225  ;;  %4278 = vmatpush3.bf16.msra.mxu1 %v4275_v29 }
 0x82e   : > { %v6231_v37 = vsel %vm577_vm1, %v2257_v38, 0.0  ;;  %v2243_v63 = vmul.f32 0.015625, %v2226_v30  ;;  %v2290_v53 = vmul.f32 %v6227_v61, %v6227_v61  ;;  %4280 = vmatprep.subr.bf16.mxu1 %v4279_v12  ;;  %v6254_v30 = vld [vmem:[%s6908_s2 + $0xa] ss:$0 sm:$0xff] }
 0x82f   : > { %v2260_v20 = vsub.f32 %v6128_v22, %v2244_v7  ;;  %v2289_v60 = vmul.f32 %v6231_v37, %v6231_v37 }
 0x830   : > { %v2259_v33 = vsub.f32 %v6131_v19, %v2243_v63  ;;  %2319 = vadd.xlane.f32.xlu1 %v2290_v53 }
 0x831   : > { %v6241_v56 = vsel %vm577_vm1, %v2260_v20, 0.0  ;;  %2317 = vadd.xlane.f32.xlu0 %v2289_v60  ;;  %4282 = vmatpush3.bf16.msra.mxu1 %v4279_v12 }
 0x832   : > { %v6245_v5 = vsel %vm577_vm1, %v2259_v33, 0.0  ;;  %v2292_v22 = vmul.f32 %v6241_v56, %v6241_v56  ;;  %4284 = vmatprep.subr.bf16.mxu1 %v4283_v39 }
 0x833   : > { %v2291_v19 = vmul.f32 %v6245_v5, %v6245_v5 }
 0x834   : > { %2323 = vadd.xlane.f32.xlu1 %v2292_v22 }
 0x835   : > { %2321 = vadd.xlane.f32.xlu0 %v2291_v19  ;;  %4286 = vmatpush3.bf16.msra.mxu1 %v4283_v39 }
 0x836   : > { %4288 = vmatprep.subr.bf16.mxu1 %v4287_v10 }
 0x839   : > { %4290 = vmatpush3.bf16.msra.mxu1 %v4287_v10 }
 0x8a1   : > { %v2296_v58 = vpop.xlane.xlu1 %2295 }
 0x8a2   : > { %v2326_v11 = vmul.f32 0.015625, %v2296_v58  ;;  %v2294_v41 = vpop.xlane.xlu0 %2293 }
 0x8a3   : > { %v2325_v0 = vmul.f32 0.015625, %v2294_v41 }
 0x8a4   : > { %v2342_v2 = vadd.f32 1e-05, %v2326_v11 }
 0x8a5   : > { %v2341_v8 = vadd.f32 1e-05, %v2325_v0 }
 0x8a6   : > { %4552 = vrsqrt.f32 %v2342_v2 }
 0x8a7   : > { %4554 = vrsqrt.f32 %v2341_v8  ;;  %v2300_v13 = vpop.xlane.xlu1 %2299 }
 0x8a8   : > { %v2328_v4 = vmul.f32 0.015625, %v2300_v13  ;;  %v2298_v44 = vpop.xlane.xlu0 %2297 }
 0x8a9   : > { %v2327_v47 = vmul.f32 0.015625, %v2298_v44 }
 0x8aa   : > { %v2344_v62 = vadd.f32 1e-05, %v2328_v4 }
 0x8ab   : > { %v2343_v26 = vadd.f32 1e-05, %v2327_v47 }
 0x8ac   : > { %4556 = vrsqrt.f32 %v2344_v62 }
 0x8ad   : > { %v2304_v38 = vpop.xlane.xlu1 %2303  ;;  %4558 = vrsqrt.f32 %v2343_v26 }
 0x8ae   : > { %v2330_v21 = vmul.f32 0.015625, %v2304_v38  ;;  %v2302_v46 = vpop.xlane.xlu0 %2301 }
 0x8af   : > { %v2329_v54 = vmul.f32 0.015625, %v2302_v46 }
 0x8b0   : > { %v4553_v7 = vpop.eup %4552  ;;  %v2346_v9 = vadd.f32 1e-05, %v2330_v21 }
 0x8b1   : > { %v4555_v63 = vpop.eup %4554  ;;  %v2374_v53 = vmul.f32 %v4553_v7, %v6143_v43  ;;  %v2345_v20 = vadd.f32 1e-05, %v2329_v54  ;;  %v2308_v60 = vpop.xlane.xlu1 %2307 }
 0x8b2   : > { %4560 = vrsqrt.f32 %v2346_v9  ;;  %v2332_v33 = vmul.f32 0.015625, %v2308_v60  ;;  %v2306_v27 = vpop.xlane.xlu0 %2305  ;;  %v2373_v28 = vmul.f32 %v4555_v63, %v6147_v48 }
 0x8b3   : > { %v2394_v22 = vmul.f32 %v6254_v30, %v2374_v53  ;;  %4562 = vrsqrt.f32 %v2345_v20  ;;  %v2331_v19 = vmul.f32 0.015625, %v2306_v27 }
 0x8b4   : > { %v2348_v40 = vadd.f32 1e-05, %v2332_v33  ;;  %v2393_v52 = vmul.f32 %v6254_v30, %v2373_v28 }
 0x8b5   : > { %v2347_v43 = vadd.f32 1e-05, %v2331_v19  ;;  %v2312_v3 = vpop.xlane.xlu1 %2311  ;;  %v6266_v24 = vadd.f32 %v6260_v32, %v2394_v22 }
 0x8b6   : > { %4564 = vrsqrt.f32 %v2348_v40  ;;  %v2334_v35 = vmul.f32 0.015625, %v2312_v3  ;;  %v2310_v18 = vpop.xlane.xlu0 %2309  ;;  %v6269_v31 = vadd.f32 %v6260_v32, %v2393_v52  ;;  %v4557_v36 = vpop.eup %4556 }
 0x8b7   : > { %4566 = vrsqrt.f32 %v2347_v43  ;;  %v2333_v48 = vmul.f32 0.015625, %v2310_v18  ;;  %v2446_v29 = vmul.f32 0.70710677, %v6266_v24  ;;  %v4559_v45 = vpop.eup %4558  ;;  %v2376_v15 = vmul.f32 %v4557_v36, %v6157_v16 }
 0x8b8   : > { %v2350_v57 = vadd.f32 1e-05, %v2334_v35  ;;  %v2445_v12 = vmul.f32 0.70710677, %v6269_v31  ;;  %v2375_v55 = vmul.f32 %v4559_v45, %v6161_v14 }
 0x8b9   : > { %v2349_v51 = vadd.f32 1e-05, %v2333_v48  ;;  %v2316_v39 = vpop.xlane.xlu1 %2315  ;;  %4568 = verf.f32 %v2446_v29  ;;  %v2396_v58 = vmul.f32 %v6254_v30, %v2376_v15 }
 0x8ba   : > { %4570 = vrsqrt.f32 %v2350_v57  ;;  %v2336_v1 = vmul.f32 0.015625, %v2316_v39  ;;  %v2314_v10 = vpop.xlane.xlu0 %2313  ;;  %v2395_v41 = vmul.f32 %v6254_v30, %v2375_v55  ;;  %v2430_v57 = vmul.f32 0.5, %v6266_v24 }
 0x8bb   : > { %4572 = vrsqrt.f32 %v2349_v51  ;;  %v2335_v11 = vmul.f32 0.015625, %v2314_v10  ;;  %v2416_v8 = vadd.f32 %v6260_v32, %v2396_v58 }
 0x8bc   : > { %v4561_v0 = vpop.eup %4560  ;;  %v2352_v2 = vadd.f32 1e-05, %v2336_v1  ;;  %4574 = verf.f32 %v2445_v12  ;;  %v6279_v44 = vadd.f32 %v6260_v32, %v2395_v41 }
 0x8bd   : > { %v4563_v16 = vpop.eup %4562  ;;  %v2351_v13 = vadd.f32 1e-05, %v2335_v11  ;;  %v2320_v4 = vpop.xlane.xlu1 %2319  ;;  %v2378_v14 = vmul.f32 %v4561_v0, %v6171_v34  ;;  %v2448_v26 = vmul.f32 0.70710677, %v2416_v8  ;;  %v2432_v51 = vmul.f32 0.5, %v2416_v8 }
 0x8be   : > { %4576 = vrsqrt.f32 %v2352_v2  ;;  %v2338_v47 = vmul.f32 0.015625, %v2320_v4  ;;  %v2318_v62 = vpop.xlane.xlu0 %2317  ;;  %v2447_v21 = vmul.f32 0.70710677, %v6279_v44  ;;  %v2377_v7 = vmul.f32 %v4563_v16, %v6175_v25 }
 0x8bf   : > { %4578 = vrsqrt.f32 %v2351_v13  ;;  %v2337_v38 = vmul.f32 0.015625, %v2318_v62  ;;  %v2398_v9 = vmul.f32 %v6254_v30, %v2378_v14 }
 0x8c0   : > { %v4565_v46 = vpop.eup %4564  ;;  %v2354_v54 = vadd.f32 1e-05, %v2338_v47  ;;  %4580 = verf.f32 %v2448_v26  ;;  %v2397_v27 = vmul.f32 %v6254_v30, %v2377_v7 }
 0x8c1   : > { %v4567_v63 = vpop.eup %4566  ;;  %v2353_v53 = vadd.f32 1e-05, %v2337_v38  ;;  %v2324_v20 = vpop.xlane.xlu1 %2323  ;;  %4582 = verf.f32 %v2447_v21  ;;  %v2380_v34 = vmul.f32 %v4565_v46, %v6185_v49  ;;  %v6288_v28 = vadd.f32 %v6260_v32, %v2398_v9 }
 0x8c2   : > { %4584 = vrsqrt.f32 %v2354_v54  ;;  %v2340_v60 = vmul.f32 0.015625, %v2324_v20  ;;  %v2322_v33 = vpop.xlane.xlu0 %2321  ;;  %v2379_v25 = vmul.f32 %v4567_v63, %v6189_v59  ;;  %v6293_v49 = vadd.f32 %v6260_v32, %v2397_v27 }
 0x8c3   : > { %v4569_v22 = vpop.eup %4568  ;;  %4586 = vrsqrt.f32 %v2353_v53  ;;  %v2339_v19 = vmul.f32 0.015625, %v2322_v33  ;;  %v2400_v40 = vmul.f32 %v6254_v30, %v2380_v34  ;;  %v2450_v36 = vmul.f32 0.70710677, %v6288_v28 }
 0x8c4   : > { %v4571_v52 = vpop.eup %4570  ;;  %v2356_v43 = vadd.f32 1e-05, %v2340_v60  ;;  %v2478_v3 = vadd.f32 1.0, %v4569_v22  ;;  %v2399_v48 = vmul.f32 %v6254_v30, %v2379_v25  ;;  %v2429_v59 = vmul.f32 0.5, %v6269_v31 }
 0x8c5   : > { %v4573_v35 = vpop.eup %4572  ;;  %v2355_v18 = vadd.f32 1e-05, %v2339_v19  ;;  %v6298_v29 = vadd.f32 %v6260_v32, %v2400_v40  ;;  %v2449_v12 = vmul.f32 0.70710677, %v6293_v49  ;;  %v2382_v58 = vmul.f32 %v4571_v52, %v6199_v50 }
 0x8c6   : > { %v4575_v45 = vpop.eup %4574  ;;  %4588 = vrsqrt.f32 %v2356_v43  ;;  %v6304_v39 = vadd.f32 %v6260_v32, %v2399_v48  ;;  %v2381_v10 = vmul.f32 %v4573_v35, %v6203_v42  ;;  %v2494_v41 = vmul.f32 %v2478_v3, %v2430_v57 }
 0x8c7   : > { %4590 = vrsqrt.f32 %v2355_v18  ;;  %v2477_v15 = vadd.f32 1.0, %v4575_v45  ;;  %v2452_v1 = vmul.f32 0.70710677, %v6298_v29  ;;  %v2402_v8 = vmul.f32 %v6254_v30, %v2382_v58 }
 0x8c8   : > { %v4577_v55 = vpop.eup %4576  ;;  %4592 = verf.f32 %v2449_v12  ;;  %v2451_v24 = vmul.f32 0.70710677, %v6304_v39  ;;  %v2401_v2 = vmul.f32 %v6254_v30, %v2381_v10  ;;  %v2431_v42 = vmul.f32 0.5, %v6279_v44 }
 0x8c9   : > { %v4579_v11 = vpop.eup %4578  ;;  %v2493_v31 = vmul.f32 %v2477_v15, %v2429_v59  ;;  %4594 = verf.f32 %v2450_v36  ;;  %v2384_v50 = vmul.f32 %v4577_v55, %v6213_v17  ;;  %v2422_v26 = vadd.f32 %v6260_v32, %v2402_v8 }
 0x8ca   : > { %v4581_v0 = vpop.eup %4580  ;;  %4596 = verf.f32 %v2452_v1  ;;  %v2383_v16 = vmul.f32 %v4579_v11, %v6217_v6  ;;  %v2421_v62 = vadd.f32 %v6260_v32, %v2401_v2  ;;  %v2434_v35 = vmul.f32 0.5, %v6288_v28 }
 0x8cb   : > { %v4583_v13 = vpop.eup %4582  ;;  %4067 = vmatprep.mubr.f32.mxu1 %v2493_v31  ;;  %v2480_v4 = vadd.f32 1.0, %v4581_v0  ;;  %4598 = verf.f32 %v2451_v24  ;;  %v2404_v6 = vmul.f32 %v6254_v30, %v2384_v50  ;;  %v2454_v9 = vmul.f32 0.70710677, %v2422_v26 }
 0x8cc   : > { %v4585_v14 = vpop.eup %4584  ;;  %4068 = vmatmul.mubr.f32.vlgmr.msra.gmra.mrb[32].mxu1 %v2494_v41  ;;  %v2479_v47 = vadd.f32 1.0, %v4583_v13  ;;  %v2403_v38 = vmul.f32 %v6254_v30, %v2383_v16  ;;  %v2453_v7 = vmul.f32 0.70710677, %v2421_v62  ;;  %v2435_v59 = vmul.f32 0.5, %v6304_v39 }
 0x8cd   : > { %v4587_v21 = vpop.eup %4586  ;;  %v2386_v46 = vmul.f32 %v4585_v14, %v6227_v61  ;;  %v2496_v44 = vmul.f32 %v2480_v4, %v2432_v51  ;;  %v6322_v63 = vadd.f32 %v6260_v32, %v2404_v6  ;;  %v2436_v1 = vmul.f32 0.5, %v6298_v29 }
 0x8ce   : > { %v2495_v54 = vmul.f32 %v2479_v47, %v2431_v42  ;;  %v2423_v17 = vadd.f32 %v6260_v32, %v2403_v38  ;;  %v2385_v53 = vmul.f32 %v4587_v21, %v6231_v37  ;;  %4600 = verf.f32 %v2453_v7 }
 0x8cf   : > { %v2406_v34 = vmul.f32 %v6254_v30, %v2386_v46  ;;  %4602 = verf.f32 %v2454_v9  ;;  %v2456_v27 = vmul.f32 0.70710677, %v6322_v63  ;;  %v2433_v37 = vmul.f32 0.5, %v6293_v49 }
 0x8d0   : > { %v4589_v20 = vpop.eup %4588  ;;  %4070 = vmatprep.mubr.f32.mxu1 %v2495_v54  ;;  %v2455_v61 = vmul.f32 0.70710677, %v2423_v17  ;;  %v2405_v22 = vmul.f32 %v6254_v30, %v2385_v53  ;;  %v2437_v41 = vmul.f32 0.5, %v2421_v62  ;;  %v2438_v2 = vmul.f32 0.5, %v2422_v26 }
 0x8d1   : > { %v4591_v60 = vpop.eup %4590  ;;  %4071 = vmatmul.mubr.f32.gmra.mrb[34].mxu1 %v2496_v44  ;;  %v2426_v19 = vadd.f32 %v6260_v32, %v2406_v34  ;;  %v2388_v43 = vmul.f32 %v4589_v20, %v6241_v56  ;;  %v2439_v42 = vmul.f32 0.5, %v2423_v17  ;;  %v2440_v14 = vmul.f32 0.5, %v6322_v63 }
 0x8d2   : > { %v4593_v33 = vpop.eup %4592  ;;  %v2387_v25 = vmul.f32 %v4591_v60, %v6245_v5  ;;  %4604 = verf.f32 %v2455_v61  ;;  %v2425_v36 = vadd.f32 %v6260_v32, %v2405_v22  ;;  %v6344_v61 = vld [vmem:[%s6908_s2 + $0xc] ss:$0 sm:$0xff] }
 0x8d3   : > { %v4595_v40 = vpop.eup %4594  ;;  %v2481_v52 = vadd.f32 1.0, %v4593_v33  ;;  %4606 = verf.f32 %v2456_v27  ;;  %v2458_v57 = vmul.f32 0.70710677, %v2426_v19  ;;  %v2408_v28 = vmul.f32 %v6254_v30, %v2388_v43 }
 0x8d4   : > { %v4597_v3 = vpop.eup %4596  ;;  %v2482_v18 = vadd.f32 1.0, %v4595_v40  ;;  %v2407_v5 = vmul.f32 %v6254_v30, %v2387_v25  ;;  %v2457_v51 = vmul.f32 0.70710677, %v2425_v36  ;;  %v2441_v26 = vmul.f32 0.5, %v2425_v36 }
 0x8d5   : > { %v4599_v48 = vpop.eup %4598  ;;  %v2497_v45 = vmul.f32 %v2481_v52, %v2433_v37  ;;  %v2484_v15 = vadd.f32 1.0, %v4597_v3  ;;  %4608 = verf.f32 %v2458_v57  ;;  %v2428_v39 = vadd.f32 %v6260_v32, %v2408_v28 }
 0x8d6   : > { %v2498_v12 = vmul.f32 %v2482_v18, %v2434_v35  ;;  %v2483_v49 = vadd.f32 1.0, %v4599_v48  ;;  %v2427_v56 = vadd.f32 %v6260_v32, %v2407_v5  ;;  %4610 = verf.f32 %v2457_v51 }
 0x8d7   : > { %4073 = vmatprep.mubr.f32.mxu1 %v2497_v45  ;;  %v2500_v11 = vmul.f32 %v2484_v15, %v2436_v1  ;;  %v2460_v0 = vmul.f32 0.70710677, %v2428_v39  ;;  %v2442_v46 = vmul.f32 0.5, %v2426_v19  ;;  %v2444_v34 = vmul.f32 0.5, %v2428_v39 }
 0x8d8   : > { %4074 = vmatmul.mubr.f32.gmra.mrb[36].mxu1 %v2498_v12  ;;  %v2499_v55 = vmul.f32 %v2483_v49, %v2435_v59  ;;  %v2459_v10 = vmul.f32 0.70710677, %v2427_v56  ;;  %v4601_v58 = vpop.eup %4600  ;;  %v2443_v9 = vmul.f32 0.5, %v2427_v56 }
 0x8d9   : > { %v4603_v31 = vpop.eup %4602  ;;  %v2485_v24 = vadd.f32 1.0, %v4601_v58 }
 0x8da   : > { %4076 = vmatprep.mubr.f32.mxu1 %v2499_v55  ;;  %4612 = verf.f32 %v2459_v10  ;;  %v2486_v8 = vadd.f32 1.0, %v4603_v31 }
 0x8db   : > { %v2501_v16 = vmul.f32 %v2485_v24, %v2437_v41  ;;  %4614 = verf.f32 %v2460_v0 }
 0x8dc   : > { %4077 = vmatmul.mubr.f32.gmra.mrb[38].mxu1 %v2500_v11  ;;  %v4605_v30 = vpop.eup %4604  ;;  %v2502_v29 = vmul.f32 %v2486_v8, %v2438_v2 }
 0x8dd   : > { %v4607_v13 = vpop.eup %4606  ;;  %v2487_v4 = vadd.f32 1.0, %v4605_v30  ;;  %4079 = vmatprep.mubr.f32.mxu1 %v2501_v16 }
 0x8de   : > { %v2488_v32 = vadd.f32 1.0, %v4607_v13 }
 0x8df   : > { %v2503_v50 = vmul.f32 %v2487_v4, %v2439_v42  ;;  %v4609_v47 = vpop.eup %4608 }
 0x8e0   : > { %4080 = vmatmul.mubr.f32.gmra.mrb[40].mxu1 %v2502_v29  ;;  %v4611_v62 = vpop.eup %4610  ;;  %v2504_v38 = vmul.f32 %v2488_v32, %v2440_v14  ;;  %v2490_v21 = vadd.f32 1.0, %v4609_v47 }
 0x8e1   : > { %4082 = vmatprep.mubr.f32.mxu1 %v2503_v50  ;;  %v2489_v6 = vadd.f32 1.0, %v4611_v62 }
 0x8e2   : > { %v2506_v7 = vmul.f32 %v2490_v21, %v2442_v46 }
 0x8e3   : > { %v2505_v44 = vmul.f32 %v2489_v6, %v2441_v26 }
 0x8e4   : > { %4083 = vmatmul.mubr.f32.gmra.mrb[42].mxu1 %v2504_v38  ;;  %v4613_v54 = vpop.eup %4612 }
 0x8e5   : > { %v2491_v17 = vadd.f32 1.0, %v4613_v54  ;;  %v4615_v53 = vpop.eup %4614  ;;  %4085 = vmatprep.mubr.f32.mxu1 %v2505_v44 }
 0x8e6   : > { %v2492_v63 = vadd.f32 1.0, %v4615_v53 }
 0x8e7   : > { %v2507_v20 = vmul.f32 %v2491_v17, %v2443_v9 }
 0x8e8   : > { %4086 = vmatmul.mubr.f32.gmra.mrb[44].mxu1 %v2506_v7  ;;  %v2508_v60 = vmul.f32 %v2492_v63, %v2444_v34 }
 0x8e9   : > { %4088 = vmatprep.mubr.f32.mxu1 %v2507_v20 }
 0x8ec   : > { %4089 = vmatmul.mubr.f32.gmra.mrb[46].mxu1 %v2508_v60 }
 0x99f   : > { %v4069_v33 = vpop.f32.mrb[32].mxu1 }
 0x9a0   : > { %v6348_v27 = vadd.f32 %v4069_v33, %v6344_v61  ;;  %v2596_v22 = vpop.f32.mrb[33].mxu1 }
 0x9a1   : > { %v6361_v52 = vadd.f32 %v6344_v61, %v2596_v22 }
 0x9a2   : > { %v2679_v19 = vsel %vm2677_vm5, %v6348_v27, 0.0  ;;  %v2931_v43 = vsel %vm6356_vm7, %v6348_v27, 0.0 }
 0x9a3   : > { %2696 = vadd.xlane.f32.xlu0 %v2679_v19  ;;  %v2678_v3 = vsel %vm2677_vm5, %v6361_v52, 0.0  ;;  %v2930_v48 = vsel %vm6356_vm7, %v6361_v52, 0.0 }
 0x9a4   : > { %v4072_v40 = vpop.f32.mrb[34].mxu1 }
 0x9a5   : > { %v2606_v37 = vpop.f32.mrb[35].mxu1  ;;  %v6370_v36 = vadd.f32 %v4072_v40, %v6344_v61 }
 0x9a6   : > { %v6382_v15 = vadd.f32 %v6344_v61, %v2606_v37 }
 0x9a7   : > { %2948 = vadd.xlane.f32.xlu0 %v2931_v43  ;;  %v2681_v57 = vsel %vm2677_vm5, %v6370_v36, 0.0  ;;  %v2933_v56 = vsel %vm6356_vm7, %v6370_v36, 0.0 }
 0x9a8   : > { %v2680_v39 = vsel %vm2677_vm5, %v6382_v15, 0.0  ;;  %v2932_v24 = vsel %vm6356_vm7, %v6382_v15, 0.0 }
 0x9ab   : > { %v4075_v35 = vpop.f32.mrb[36].mxu1  ;;  %2694 = vadd.xlane.f32.xlu0 %v2678_v3 }
 0x9ac   : > { %v2616_v18 = vpop.f32.mrb[37].mxu1  ;;  %v6400_v31 = vadd.f32 %v4075_v35, %v6344_v61 }
 0x9ad   : > { %v6424_v42 = vadd.f32 %v6344_v61, %v2616_v18 }
 0x9ae   : > { %v2683_v29 = vsel %vm2677_vm5, %v6400_v31, 0.0  ;;  %v2935_v32 = vsel %vm6356_vm7, %v6400_v31, 0.0 }
 0x9af   : > { %v4078_v45 = vpop.f32.mrb[38].mxu1  ;;  %2946 = vadd.xlane.f32.xlu0 %v2930_v48  ;;  %v2682_v47 = vsel %vm2677_vm5, %v6424_v42, 0.0  ;;  %v2934_v21 = vsel %vm6356_vm7, %v6424_v42, 0.0 }
 0x9b0   : > { %v2626_v59 = vpop.f32.mrb[39].mxu1  ;;  %v6442_v62 = vadd.f32 %v4078_v45, %v6344_v61 }
 0x9b1   : > { %v6451_v26 = vadd.f32 %v6344_v61, %v2626_v59 }
 0x9b2   : > { %6945 = vst [vmem:[#allocation8_spill] sm:$0xff] %v6442_v62  ;;  %v2685_v54 = vsel %vm2677_vm5, %v6442_v62, 0.0  ;;  %v2937_v34 = vsel %vm6356_vm7, %v6442_v62, 0.0 }
 0x9b3   : > { %v4081_v5 = vpop.f32.mrb[40].mxu1  ;;  %2700 = vadd.xlane.f32.xlu0 %v2681_v57  ;;  %6946 = vst [vmem:[#allocation7_spill] sm:$0xff] %v6451_v26  ;;  %v2684_v7 = vsel %vm2677_vm5, %v6451_v26, 0.0  ;;  %v2936_v53 = vsel %vm6356_vm7, %v6451_v26, 0.0 }
 0x9b4   : > { %v6379_v12 = vadd.f32 %v4081_v5, %v6344_v61  ;;  %v2636_v49 = vpop.f32.mrb[41].mxu1 }
 0x9b5   : > { %v6391_v1 = vadd.f32 %v6344_v61, %v2636_v49 }
 0x9b6   : > { %v2687_v51 = vsel %vm2677_vm5, %v6379_v12, 0.0  ;;  %v2939_v10 = vsel %vm6356_vm7, %v6379_v12, 0.0 }
 0x9b7   : > { %2712 = vadd.xlane.f32.xlu1 %v2687_v51  ;;  %v4084_v28 = vpop.f32.mrb[42].mxu1  ;;  %2952 = vadd.xlane.f32.xlu0 %v2933_v56  ;;  %v2686_v41 = vsel %vm2677_vm5, %v6391_v1, 0.0  ;;  %v2938_v13 = vsel %vm6356_vm7, %v6391_v1, 0.0 }
 0x9b8   : > { %v2646_v55 = vpop.f32.mrb[43].mxu1  ;;  %v6415_v16 = vadd.f32 %v4084_v28, %v6344_v61 }
 0x9b9   : > { %v6433_v50 = vadd.f32 %v6344_v61, %v2646_v55 }
 0x9ba   : > { %v2689_v4 = vsel %vm2677_vm5, %v6415_v16, 0.0  ;;  %v2941_v14 = vsel %vm6356_vm7, %v6415_v16, 0.0 }
 0x9bb   : > { %2964 = vadd.xlane.f32.xlu1 %v2939_v10  ;;  %v4087_v58 = vpop.f32.mrb[44].mxu1  ;;  %2698 = vadd.xlane.f32.xlu0 %v2680_v39  ;;  %6944 = vst [vmem:[#allocation6_spill] sm:$0xff] %v6433_v50  ;;  %v2688_v38 = vsel %vm2677_vm5, %v6433_v50, 0.0  ;;  %v2940_v46 = vsel %vm6356_vm7, %v6433_v50, 0.0 }
 0x9bc   : > { %v2656_v11 = vpop.f32.mrb[45].mxu1  ;;  %v6454_v6 = vadd.f32 %v4087_v58, %v6344_v61 }
 0x9bd   : > { %v6469_v9 = vadd.f32 %v6344_v61, %v2656_v11 }
 0x9be   : > { %6947 = vst [vmem:[#allocation10_spill] sm:$0xff] %v6454_v6  ;;  %v2691_v44 = vsel %vm2677_vm5, %v6454_v6, 0.0  ;;  %v2943_v17 = vsel %vm6356_vm7, %v6454_v6, 0.0 }
 0x9bf   : > { %2710 = vadd.xlane.f32.xlu1 %v2686_v41  ;;  %v4090_v0 = vpop.f32.mrb[46].mxu1  ;;  %2950 = vadd.xlane.f32.xlu0 %v2932_v24  ;;  %6948 = vst [vmem:[#allocation11_spill] sm:$0xff] %v6469_v9  ;;  %v2690_v20 = vsel %vm2677_vm5, %v6469_v9, 0.0  ;;  %v2942_v63 = vsel %vm6356_vm7, %v6469_v9, 0.0 }
 0x9c0   : > { %v6409_v2 = vadd.f32 %v4090_v0, %v6344_v61  ;;  %v2666_v8 = vpop.f32.mrb[47].mxu1 }
 0x9c1   : > { %v6412_v30 = vadd.f32 %v6344_v61, %v2666_v8 }
 0x9c2   : > { %6942 = vst [vmem:[#allocation5_spill] sm:$0xff] %v6409_v2  ;;  %v2693_v60 = vsel %vm2677_vm5, %v6409_v2, 0.0  ;;  %v2945_v22 = vsel %vm6356_vm7, %v6409_v2, 0.0 }
 0x9c3   : > { %6943 = vst [vmem:[#allocation9_spill] sm:$0xff] %v6412_v30  ;;  %2962 = vadd.xlane.f32.xlu1 %v2938_v13  ;;  %2704 = vadd.xlane.f32.xlu0 %v2683_v29  ;;  %v2692_v61 = vsel %vm2677_vm5, %v6412_v30, 0.0  ;;  %v2944_v33 = vsel %vm6356_vm7, %v6412_v30, 0.0 }
 0x9c7   : > { %2716 = vadd.xlane.f32.xlu1 %v2689_v4  ;;  %2956 = vadd.xlane.f32.xlu0 %v2935_v32 }
 0x9cb   : > { %2968 = vadd.xlane.f32.xlu1 %v2941_v14  ;;  %2702 = vadd.xlane.f32.xlu0 %v2682_v47 }
 0x9cf   : > { %2714 = vadd.xlane.f32.xlu1 %v2688_v38  ;;  %2954 = vadd.xlane.f32.xlu0 %v2934_v21 }
 0x9d3   : > { %2966 = vadd.xlane.f32.xlu1 %v2940_v46  ;;  %2708 = vadd.xlane.f32.xlu0 %v2685_v54 }
 0x9d7   : > { %2720 = vadd.xlane.f32.xlu1 %v2691_v44  ;;  %2706 = vadd.xlane.f32.xlu0 %v2684_v7 }
 0x9db   : > { %2972 = vadd.xlane.f32.xlu1 %v2943_v17  ;;  %2958 = vadd.xlane.f32.xlu0 %v2936_v53 }
 0x9df   : > { %2718 = vadd.xlane.f32.xlu1 %v2690_v20  ;;  %2960 = vadd.xlane.f32.xlu0 %v2937_v34 }
 0x9e3   : > { %2970 = vadd.xlane.f32.xlu1 %v2942_v63 }
 0x9e7   : > { %2724 = vadd.xlane.f32.xlu1 %v2693_v60 }
 0x9eb   : > { %2722 = vadd.xlane.f32.xlu1 %v2692_v61 }
 0x9ef   : > { %2974 = vadd.xlane.f32.xlu1 %v2944_v33 }
 0x9f3   : > { %2976 = vadd.xlane.f32.xlu1 %v2945_v22 }
 0xa30   : > { %v2697_v19 = vpop.xlane.xlu0 %2696 }
 0xa31   : > { %v2727_v40 = vmul.f32 0.03125, %v2697_v19 }
 0xa33   : > { %v2743_v37 = vsub.f32 %v6348_v27, %v2727_v40 }
 0xa34   : > { %v2949_v43 = vpop.xlane.xlu0 %2948 }
 0xa35   : > { %v6501_v3 = vsel %vm2677_vm5, %v2743_v37, 0.0  ;;  %v2979_v35 = vmul.f32 0.03125, %v2949_v43 }
 0xa36   : > { %v2775_v18 = vmul.f32 %v6501_v3, %v6501_v3 }
 0xa37   : > { %v2995_v48 = vsub.f32 %v6348_v27, %v2979_v35 }
 0xa38   : > { %2792 = vadd.xlane.f32.xlu0 %v2775_v18  ;;  %v2695_v45 = vpop.xlane.xlu0 %2694 }
 0xa39   : > { %v6508_v59 = vsel %vm6356_vm7, %v2995_v48, 0.0  ;;  %v2726_v57 = vmul.f32 0.03125, %v2695_v45 }
 0xa3a   : > { %v3027_v5 = vmul.f32 %v6508_v59, %v6508_v59 }
 0xa3b   : > { %v2742_v49 = vsub.f32 %v6361_v52, %v2726_v57 }
 0xa3c   : > { %3044 = vadd.xlane.f32.xlu0 %v3027_v5  ;;  %v2947_v51 = vpop.xlane.xlu0 %2946 }
 0xa3d   : > { %v6515_v56 = vsel %vm2677_vm5, %v2742_v49, 0.0  ;;  %v2978_v28 = vmul.f32 0.03125, %v2947_v51 }
 0xa3e   : > { %v2774_v55 = vmul.f32 %v6515_v56, %v6515_v56 }
 0xa3f   : > { %v2994_v10 = vsub.f32 %v6361_v52, %v2978_v28 }
 0xa40   : > { %2790 = vadd.xlane.f32.xlu0 %v2774_v55  ;;  %v2701_v39 = vpop.xlane.xlu0 %2700 }
 0xa41   : > { %v6522_v58 = vsel %vm6356_vm7, %v2994_v10, 0.0  ;;  %v2729_v11 = vmul.f32 0.03125, %v2701_v39 }
 0xa42   : > { %v3026_v41 = vmul.f32 %v6522_v58, %v6522_v58 }
 0xa43   : > { %v2745_v24 = vsub.f32 %v6370_v36, %v2729_v11 }
 0xa44   : > { %v2713_v0 = vpop.xlane.xlu1 %2712  ;;  %3042 = vadd.xlane.f32.xlu0 %v3026_v41  ;;  %v2953_v8 = vpop.xlane.xlu0 %2952 }
 0xa45   : > { %v2735_v13 = vmul.f32 0.03125, %v2713_v0  ;;  %v6529_v29 = vsel %vm2677_vm5, %v2745_v24, 0.0  ;;  %v2981_v4 = vmul.f32 0.03125, %v2953_v8 }
 0xa46   : > { %v2777_v32 = vmul.f32 %v6529_v29, %v6529_v29 }
 0xa47   : > { %v2751_v14 = vsub.f32 %v6379_v12, %v2735_v13  ;;  %v2997_v47 = vsub.f32 %v6370_v36, %v2981_v4 }
 0xa48   : > { %v2965_v38 = vpop.xlane.xlu1 %2964  ;;  %2796 = vadd.xlane.f32.xlu0 %v2777_v32  ;;  %v2699_v21 = vpop.xlane.xlu0 %2698 }
 0xa49   : > { %v6537_v46 = vsel %vm2677_vm5, %v2751_v14, 0.0  ;;  %v2987_v54 = vmul.f32 0.03125, %v2965_v38  ;;  %v6541_v44 = vsel %vm6356_vm7, %v2997_v47, 0.0  ;;  %v2728_v7 = vmul.f32 0.03125, %v2699_v21 }
 0xa4a   : > { %v2783_v17 = vmul.f32 %v6537_v46, %v6537_v46  ;;  %v3029_v53 = vmul.f32 %v6541_v44, %v6541_v44 }
 0xa4b   : > { %v3003_v20 = vsub.f32 %v6379_v12, %v2987_v54  ;;  %v2744_v34 = vsub.f32 %v6382_v15, %v2728_v7 }
 0xa4c   : > { %v2711_v63 = vpop.xlane.xlu1 %2710  ;;  %2808 = vadd.xlane.f32.xlu1 %v2783_v17  ;;  %3048 = vadd.xlane.f32.xlu0 %v3029_v53  ;;  %v2951_v60 = vpop.xlane.xlu0 %2950 }
 0xa4d   : > { %v6551_v61 = vsel %vm6356_vm7, %v3003_v20, 0.0  ;;  %v2734_v33 = vmul.f32 0.03125, %v2711_v63  ;;  %v6555_v22 = vsel %vm2677_vm5, %v2744_v34, 0.0  ;;  %v2980_v19 = vmul.f32 0.03125, %v2951_v60 }
 0xa4e   : > { %v3035_v40 = vmul.f32 %v6551_v61, %v6551_v61  ;;  %v2776_v37 = vmul.f32 %v6555_v22, %v6555_v22 }
 0xa4f   : > { %v2750_v43 = vsub.f32 %v6391_v1, %v2734_v33  ;;  %v2996_v35 = vsub.f32 %v6382_v15, %v2980_v19 }
 0xa50   : > { %v2963_v18 = vpop.xlane.xlu1 %2962  ;;  %3060 = vadd.xlane.f32.xlu1 %v3035_v40  ;;  %2794 = vadd.xlane.f32.xlu0 %v2776_v37  ;;  %v2705_v48 = vpop.xlane.xlu0 %2704 }
 0xa51   : > { %v6565_v45 = vsel %vm2677_vm5, %v2750_v43, 0.0  ;;  %v2986_v57 = vmul.f32 0.03125, %v2963_v18  ;;  %v6569_v5 = vsel %vm6356_vm7, %v2996_v35, 0.0  ;;  %v2731_v49 = vmul.f32 0.03125, %v2705_v48  ;;  %v3274_v48 = vld [vmem:[#allocation2 + $0x240] sm:$0xff] }
 0xa52   : > { %v2782_v51 = vmul.f32 %v6565_v45, %v6565_v45  ;;  %v3028_v28 = vmul.f32 %v6569_v5, %v6569_v5 }
 0xa53   : > { %v3002_v55 = vsub.f32 %v6391_v1, %v2986_v57  ;;  %v2747_v10 = vsub.f32 %v6400_v31, %v2731_v49  ;;  %v3275_v57 = vld [vmem:[#allocation2 + $0x248] sm:$0xff] }
 0xa54   : > { %v2717_v39 = vpop.xlane.xlu1 %2716  ;;  %2806 = vadd.xlane.f32.xlu1 %v2782_v51  ;;  %3046 = vadd.xlane.f32.xlu0 %v3028_v28  ;;  %v2957_v11 = vpop.xlane.xlu0 %2956  ;;  %v4291_v28 = vpack.c.bf16 %v3275_v57, %v3274_v48 }
 0xa55   : > { %v6579_v41 = vsel %vm6356_vm7, %v3002_v55, 0.0  ;;  %v2737_v24 = vmul.f32 0.03125, %v2717_v39  ;;  %v6583_v0 = vsel %vm2677_vm5, %v2747_v10, 0.0  ;;  %v2983_v8 = vmul.f32 0.03125, %v2957_v11 }
 0xa56   : > { %v3034_v13 = vmul.f32 %v6579_v41, %v6579_v41  ;;  %v2779_v4 = vmul.f32 %v6583_v0, %v6583_v0  ;;  %4292 = vmatprep.subr.bf16.mxu0 %v4291_v28  ;;  %4323 = vmatprep.subr.bf16.mxu1 %v4291_v28 }
 0xa57   : > { %v2753_v32 = vsub.f32 %v6415_v16, %v2737_v24  ;;  %v2999_v14 = vsub.f32 %v6400_v31, %v2983_v8  ;;  %4294 = vmatpush3.bf16.msra.mxu0 %v4291_v28  ;;  %4331 = vmatpush3.bf16.msra.mxu1 %v4291_v28 }
 0xa58   : > { %v2969_v47 = vpop.xlane.xlu1 %2968  ;;  %3058 = vadd.xlane.f32.xlu1 %v3034_v13  ;;  %2800 = vadd.xlane.f32.xlu0 %v2779_v4  ;;  %v2703_v38 = vpop.xlane.xlu0 %2702 }
 0xa59   : > { %v6593_v21 = vsel %vm2677_vm5, %v2753_v32, 0.0  ;;  %v2989_v54 = vmul.f32 0.03125, %v2969_v47  ;;  %v6597_v7 = vsel %vm6356_vm7, %v2999_v14, 0.0  ;;  %v2730_v17 = vmul.f32 0.03125, %v2703_v38  ;;  %v3276_v32 = vld [vmem:[#allocation2 + $0x250] sm:$0xff]  ;;  %v3277_v14 = vld [vmem:[#allocation2 + $0x258] sm:$0xff] }
 0xa5a   : > { %v2785_v53 = vmul.f32 %v6593_v21, %v6593_v21  ;;  %v3031_v20 = vmul.f32 %v6597_v7, %v6597_v7 }
 0xa5b   : > { %v3005_v34 = vsub.f32 %v6415_v16, %v2989_v54  ;;  %v2746_v63 = vsub.f32 %v6424_v42, %v2730_v17  ;;  %v4295_v54 = vpack.c.bf16 %v3277_v14, %v3276_v32  ;;  %v3281_v32 = vld [vmem:[#allocation2 + $0x278] sm:$0xff] }
 0xa5c   : > { %v2715_v60 = vpop.xlane.xlu1 %2714  ;;  %2812 = vadd.xlane.f32.xlu1 %v2785_v53  ;;  %3052 = vadd.xlane.f32.xlu0 %v3031_v20  ;;  %v2955_v33 = vpop.xlane.xlu0 %2954 }
 0xa5d   : > { %v6607_v19 = vsel %vm6356_vm7, %v3005_v34, 0.0  ;;  %v2736_v40 = vmul.f32 0.03125, %v2715_v60  ;;  %v6611_v37 = vsel %vm2677_vm5, %v2746_v63, 0.0  ;;  %v2982_v43 = vmul.f32 0.03125, %v2955_v33  ;;  %4296 = vmatprep.subr.bf16.mxu0 %v4295_v54  ;;  %4324 = vmatprep.subr.bf16.mxu1 %v4295_v54 }
 0xa5e   : > { %v3037_v35 = vmul.f32 %v6607_v19, %v6607_v19  ;;  %v2778_v18 = vmul.f32 %v6611_v37, %v6611_v37  ;;  %4298 = vmatpush3.bf16.msra.mxu0 %v4295_v54  ;;  %4332 = vmatpush3.bf16.msra.mxu1 %v4295_v54 }
 0xa5f   : > { %v2752_v49 = vsub.f32 %v6433_v50, %v2736_v40  ;;  %v2998_v51 = vsub.f32 %v6424_v42, %v2982_v43  ;;  %v3278_v43 = vld [vmem:[#allocation2 + $0x260] sm:$0xff] }
 0xa60   : > { %v2967_v55 = vpop.xlane.xlu1 %2966  ;;  %3064 = vadd.xlane.f32.xlu1 %v3037_v35  ;;  %2798 = vadd.xlane.f32.xlu0 %v2778_v18  ;;  %v2709_v10 = vpop.xlane.xlu0 %2708  ;;  %v3279_v35 = vld [vmem:[#allocation2 + $0x268] sm:$0xff] }
 0xa61   : > { %v6621_v39 = vsel %vm2677_vm5, %v2752_v49, 0.0  ;;  %v2988_v11 = vmul.f32 0.03125, %v2967_v55  ;;  %v6625_v24 = vsel %vm6356_vm7, %v2998_v51, 0.0  ;;  %v2733_v8 = vmul.f32 0.03125, %v2709_v10 }
 0xa62   : > { %v2784_v13 = vmul.f32 %v6621_v39, %v6621_v39  ;;  %v3030_v4 = vmul.f32 %v6625_v24, %v6625_v24  ;;  %v4299_v57 = vpack.c.bf16 %v3279_v35, %v3278_v43  ;;  %v3282_v35 = vld [vmem:[#allocation2 + $0x280] sm:$0xff] }
 0xa63   : > { %v3004_v47 = vsub.f32 %v6433_v50, %v2988_v11  ;;  %v2749_v38 = vsub.f32 %v6442_v62, %v2733_v8 }
 0xa64   : > { %v2721_v17 = vpop.xlane.xlu1 %2720  ;;  %2810 = vadd.xlane.f32.xlu1 %v2784_v13  ;;  %3050 = vadd.xlane.f32.xlu0 %v3030_v4  ;;  %v2707_v53 = vpop.xlane.xlu0 %2706  ;;  %v3280_v4 = vld [vmem:[#allocation2 + $0x270] sm:$0xff] }
 0xa65   : > { %v6635_v20 = vsel %vm6356_vm7, %v3004_v47, 0.0  ;;  %v2739_v34 = vmul.f32 0.03125, %v2721_v17  ;;  %v6639_v63 = vsel %vm2677_vm5, %v2749_v38, 0.0  ;;  %v2732_v60 = vmul.f32 0.03125, %v2707_v53  ;;  %4300 = vmatprep.subr.bf16.mxu0 %v4299_v57  ;;  %4325 = vmatprep.subr.bf16.mxu1 %v4299_v57 }
 0xa66   : > { %v3036_v33 = vmul.f32 %v6635_v20, %v6635_v20  ;;  %v2781_v40 = vmul.f32 %v6639_v63, %v6639_v63  ;;  %4302 = vmatpush3.bf16.msra.mxu0 %v4299_v57  ;;  %4333 = vmatpush3.bf16.msra.mxu1 %v4299_v57  ;;  %v4303_v38 = vpack.c.bf16 %v3281_v32, %v3280_v4  ;;  %v3284_v32 = vld [vmem:[#allocation2 + $0x290] sm:$0xff] }
 0xa67   : > { %v2755_v18 = vsub.f32 %v6454_v6, %v2739_v34  ;;  %v2748_v48 = vsub.f32 %v6451_v26, %v2732_v60 }
 0xa68   : > { %v2973_v49 = vpop.xlane.xlu1 %2972  ;;  %3062 = vadd.xlane.f32.xlu1 %v3036_v33  ;;  %2804 = vadd.xlane.f32.xlu0 %v2781_v40  ;;  %v2959_v51 = vpop.xlane.xlu0 %2958 }
 0xa69   : > { %v6649_v28 = vsel %vm2677_vm5, %v2755_v18, 0.0  ;;  %v2991_v55 = vmul.f32 0.03125, %v2973_v49  ;;  %v6653_v10 = vsel %vm2677_vm5, %v2748_v48, 0.0  ;;  %v2984_v11 = vmul.f32 0.03125, %v2959_v51  ;;  %4304 = vmatprep.subr.bf16.mxu0 %v4303_v38  ;;  %4326 = vmatprep.subr.bf16.mxu1 %v4303_v38  ;;  %v3283_v18 = vld [vmem:[#allocation2 + $0x288] sm:$0xff] }
 0xa6a   : > { %v2787_v8 = vmul.f32 %v6649_v28, %v6649_v28  ;;  %v2780_v13 = vmul.f32 %v6653_v10, %v6653_v10  ;;  %4306 = vmatpush3.bf16.msra.mxu0 %v4303_v38  ;;  %4334 = vmatpush3.bf16.msra.mxu1 %v4303_v38  ;;  %v4307_v49 = vpack.c.bf16 %v3283_v18, %v3282_v35 }
 0xa6b   : > { %v3007_v14 = vsub.f32 %v6454_v6, %v2991_v55  ;;  %v3000_v47 = vsub.f32 %v6451_v26, %v2984_v11 }
 0xa6c   : > { %v2719_v54 = vpop.xlane.xlu1 %2718  ;;  %2816 = vadd.xlane.f32.xlu1 %v2787_v8  ;;  %2802 = vadd.xlane.f32.xlu0 %v2780_v13  ;;  %v2961_v17 = vpop.xlane.xlu0 %2960 }
 0xa6d   : > { %v6663_v53 = vsel %vm6356_vm7, %v3007_v14, 0.0  ;;  %v2738_v34 = vmul.f32 0.03125, %v2719_v54  ;;  %v6667_v60 = vsel %vm6356_vm7, %v3000_v47, 0.0  ;;  %v2985_v33 = vmul.f32 0.03125, %v2961_v17  ;;  %4308 = vmatprep.subr.bf16.mxu0 %v4307_v49  ;;  %4327 = vmatprep.subr.bf16.mxu1 %v4307_v49  ;;  %v3285_v14 = vld [vmem:[#allocation2 + $0x298] sm:$0xff] }
 0xa6e   : > { %v3039_v40 = vmul.f32 %v6663_v53, %v6663_v53  ;;  %v3032_v43 = vmul.f32 %v6667_v60, %v6667_v60  ;;  %4310 = vmatpush3.bf16.msra.mxu0 %v4307_v49  ;;  %4335 = vmatpush3.bf16.msra.mxu1 %v4307_v49  ;;  %v4311_v38 = vpack.c.bf16 %v3285_v14, %v3284_v32 }
 0xa6f   : > { %v2754_v48 = vsub.f32 %v6469_v9, %v2738_v34  ;;  %v3001_v57 = vsub.f32 %v6442_v62, %v2985_v33 }
 0xa70   : > { %v2971_v51 = vpop.xlane.xlu1 %2970  ;;  %3068 = vadd.xlane.f32.xlu1 %v3039_v40  ;;  %3054 = vadd.xlane.f32.xlu0 %v3032_v43  ;;  %v3286_v40 = vld [vmem:[#allocation2 + $0x2a0] sm:$0xff]  ;;  %v3287_v43 = vld [vmem:[#allocation2 + $0x2a8] sm:$0xff] }
 0xa71   : > { %v6677_v55 = vsel %vm2677_vm5, %v2754_v48, 0.0  ;;  %v2990_v11 = vmul.f32 0.03125, %v2971_v51  ;;  %v6681_v8 = vsel %vm6356_vm7, %v3001_v57, 0.0  ;;  %4312 = vmatprep.subr.bf16.mxu0 %v4311_v38  ;;  %4328 = vmatprep.subr.bf16.mxu1 %v4311_v38  ;;  %v4315_v18 = vpack.c.bf16 %v3287_v43, %v3286_v40 }
 0xa72   : > { %v2786_v13 = vmul.f32 %v6677_v55, %v6677_v55  ;;  %v3033_v4 = vmul.f32 %v6681_v8, %v6681_v8  ;;  %4314 = vmatpush3.bf16.msra.mxu0 %v4311_v38  ;;  %4336 = vmatpush3.bf16.msra.mxu1 %v4311_v38 }
 0xa73   : > { %v3006_v47 = vsub.f32 %v6469_v9, %v2990_v11  ;;  %4316 = vmatprep.subr.bf16.mxu0 %v4315_v18  ;;  %4329 = vmatprep.subr.bf16.mxu1 %v4315_v18  ;;  %v3288_v11 = vld [vmem:[#allocation2 + $0x2b0] sm:$0xff] }
 0xa74   : > { %v2725_v54 = vpop.xlane.xlu1 %2724  ;;  %2814 = vadd.xlane.f32.xlu1 %v2786_v13  ;;  %3056 = vadd.xlane.f32.xlu0 %v3033_v4  ;;  %v3289_v13 = vld [vmem:[#allocation2 + $0x2b8] sm:$0xff] }
 0xa75   : > { %v6690_v17 = vsel %vm6356_vm7, %v3006_v47, 0.0  ;;  %v2741_v34 = vmul.f32 0.03125, %v2725_v54  ;;  %v4319_v32 = vpack.c.bf16 %v3289_v13, %v3288_v11 }
 0xa76   : > { %v3038_v33 = vmul.f32 %v6690_v17, %v6690_v17  ;;  %4318 = vmatpush3.bf16.msra.mxu0 %v4315_v18  ;;  %4337 = vmatpush3.bf16.msra.mxu1 %v4315_v18 }
 0xa77   : > { %v2757_v35 = vsub.f32 %v6409_v2, %v2741_v34  ;;  %4320 = vmatprep.subr.bf16.mxu0 %v4319_v32  ;;  %4330 = vmatprep.subr.bf16.mxu1 %v4319_v32 }
 0xa78   : > { %3066 = vadd.xlane.f32.xlu1 %v3038_v33  ;;  %v2723_v48 = vpop.xlane.xlu1 %2722 }
 0xa79   : > { %v6697_v57 = vsel %vm2677_vm5, %v2757_v35, 0.0  ;;  %v2740_v49 = vmul.f32 0.03125, %v2723_v48 }
 0xa7a   : > { %v2789_v51 = vmul.f32 %v6697_v57, %v6697_v57  ;;  %4322 = vmatpush3.bf16.msra.mxu0 %v4319_v32  ;;  %4338 = vmatpush3.bf16.msra.mxu1 %v4319_v32 }
 0xa7b   : > { %v2756_v4 = vsub.f32 %v6412_v30, %v2740_v49 }
 0xa7c   : > { %2820 = vadd.xlane.f32.xlu1 %v2789_v51  ;;  %v2975_v14 = vpop.xlane.xlu1 %2974 }
 0xa7d   : > { %v6704_v47 = vsel %vm2677_vm5, %v2756_v4, 0.0  ;;  %v2992_v38 = vmul.f32 0.03125, %v2975_v14 }
 0xa7e   : > { %v2788_v54 = vmul.f32 %v6704_v47, %v6704_v47 }
 0xa7f   : > { %v3008_v34 = vsub.f32 %v6412_v30, %v2992_v38 }
 0xa80   : > { %2818 = vadd.xlane.f32.xlu1 %v2788_v54  ;;  %v2977_v33 = vpop.xlane.xlu1 %2976 }
 0xa81   : > { %v6711_v40 = vsel %vm6356_vm7, %v3008_v34, 0.0  ;;  %v2993_v43 = vmul.f32 0.03125, %v2977_v33 }
 0xa82   : > { %v3040_v23 = vmul.f32 %v6711_v40, %v6711_v40 }
 0xa83   : > { %v3009_v35 = vsub.f32 %v6409_v2, %v2993_v43 }
 0xa84   : > { %3070 = vadd.xlane.f32.xlu1 %v3040_v23 }
 0xa85   : > { %v6718_v18 = vsel %vm6356_vm7, %v3009_v35, 0.0 }
 0xa86   : > { %v3041_v48 = vmul.f32 %v6718_v18, %v6718_v18 }
 0xa88   : > { %3072 = vadd.xlane.f32.xlu1 %v3041_v48 }
 0xac5   : > { %v2793_v49 = vpop.xlane.xlu0 %2792 }
 0xac6   : > { %v2823_v51 = vmul.f32 0.03125, %v2793_v49  ;;  %v6726_v49 = vld [vmem:[%s6908_s2 + $0xd] ss:$0 sm:$0xff] }
 0xac8   : > { %v2839_v11 = vadd.f32 1e-05, %v2823_v51 }
 0xac9   : > { %v3045_v13 = vpop.xlane.xlu0 %3044 }
 0xaca   : > { %4616 = vrsqrt.f32 %v2839_v11  ;;  %v3075_v4 = vmul.f32 0.03125, %v3045_v13  ;;  %v6731_v11 = vld [vmem:[%s6908_s2 + $0xf] ss:$0 sm:$0xff] }
 0xacc   : > { %v3091_v32 = vadd.f32 1e-05, %v3075_v4 }
 0xacd   : > { %v2791_v14 = vpop.xlane.xlu0 %2790 }
 0xace   : > { %4618 = vrsqrt.f32 %v3091_v32  ;;  %v2822_v38 = vmul.f32 0.03125, %v2791_v14 }
 0xad0   : > { %v2838_v54 = vadd.f32 1e-05, %v2822_v38  ;;  %v6738_v38 = vld [vmem:[%s6908_s2 + $0x10] ss:$0 sm:$0xff] }
 0xad1   : > { %v3043_v34 = vpop.xlane.xlu0 %3042 }
 0xad2   : > { %4620 = vrsqrt.f32 %v2838_v54  ;;  %v3074_v25 = vmul.f32 0.03125, %v3043_v34 }
 0xad4   : > { %v4617_v33 = vpop.eup %4616  ;;  %v3090_v43 = vadd.f32 1e-05, %v3074_v25  ;;  %v6743_v25 = vld [vmem:[%s6908_s2 + $0xe] ss:$0 sm:$0xff] }
 0xad5   : > { %v2797_v23 = vpop.xlane.xlu0 %2796  ;;  %v2871_v35 = vmul.f32 %v4617_v33, %v6501_v3 }
 0xad6   : > { %4622 = vrsqrt.f32 %v3090_v43  ;;  %v2825_v48 = vmul.f32 0.03125, %v2797_v23 }
 0xad7   : > { %v2891_v3 = vmul.f32 %v6726_v49, %v2871_v35 }
 0xad8   : > { %v4619_v51 = vpop.eup %4618  ;;  %v2841_v13 = vadd.f32 1e-05, %v2825_v48 }
 0xad9   : > { %v3123_v4 = vmul.f32 %v4619_v51, %v6508_v59  ;;  %v2809_v32 = vpop.xlane.xlu1 %2808  ;;  %v3049_v14 = vpop.xlane.xlu0 %3048 }
 0xada   : > { %v2831_v54 = vmul.f32 0.03125, %v2809_v32  ;;  %4624 = vrsqrt.f32 %v2841_v13  ;;  %v3077_v34 = vmul.f32 0.03125, %v3049_v14  ;;  %v2911_v32 = vadd.f32 %v6743_v25, %v2891_v3 }
 0xadb   : > { %v3143_v33 = vmul.f32 %v6731_v11, %v3123_v4 }
 0xadc   : > { %v4621_v59 = vpop.eup %4620  ;;  %v2847_v43 = vadd.f32 1e-05, %v2831_v54  ;;  %v3093_v23 = vadd.f32 1e-05, %v3077_v34 }
 0xadd   : > { %v3163_v35 = vadd.f32 %v6738_v38, %v3143_v33  ;;  %v2870_v48 = vmul.f32 %v4621_v59, %v6515_v56  ;;  %v3061_v51 = vpop.xlane.xlu1 %3060  ;;  %v2795_v30 = vpop.xlane.xlu0 %2794 }
 0xade   : > { %4626 = vrsqrt.f32 %v2847_v43  ;;  %v3083_v13 = vmul.f32 0.03125, %v3061_v51  ;;  %v2824_v14 = vmul.f32 0.03125, %v2795_v30 }
 0xadf   : > { %4628 = vrsqrt.f32 %v3093_v23  ;;  %v3179_v26 = vadd.f32 %v3163_v35, %v2911_v32  ;;  %v2890_v33 = vmul.f32 %v6726_v49, %v2870_v48 }
 0xae0   : > { %v4623_v2 = vpop.eup %4622  ;;  %v3099_v9 = vadd.f32 1e-05, %v3083_v13  ;;  %v2840_v6 = vadd.f32 1e-05, %v2824_v14 }
 0xae1   : > { %v3122_v4 = vmul.f32 %v4623_v2, %v6522_v58  ;;  %v2807_v54 = vpop.xlane.xlu1 %2806  ;;  %v3047_v34 = vpop.xlane.xlu0 %3046  ;;  %v3211_v23 = vmul.f32 0.70710677, %v3179_v26  ;;  %v2910_v35 = vadd.f32 %v6743_v25, %v2890_v33 }
 0xae2   : > { %4630 = vrsqrt.f32 %v3099_v9  ;;  %v2830_v56 = vmul.f32 0.03125, %v2807_v54  ;;  %v3076_v59 = vmul.f32 0.03125, %v3047_v34 }
 0xae3   : > { %4632 = vrsqrt.f32 %v2840_v6  ;;  %v3142_v3 = vmul.f32 %v6731_v11, %v3122_v4 }
 0xae4   : > { %v4625_v43 = vpop.eup %4624  ;;  %v2846_v51 = vadd.f32 1e-05, %v2830_v56  ;;  %v3092_v30 = vadd.f32 1e-05, %v3076_v59 }
 0xae5   : > { %v3059_v62 = vpop.xlane.xlu1 %3058  ;;  %v2801_v13 = vpop.xlane.xlu0 %2800  ;;  %v3162_v2 = vadd.f32 %v6738_v38, %v3142_v3  ;;  %v2873_v9 = vmul.f32 %v4625_v43, %v6529_v29 }
 0xae6   : > { %4634 = vrsqrt.f32 %v2846_v51  ;;  %v3082_v58 = vmul.f32 0.03125, %v3059_v62  ;;  %v2827_v32 = vmul.f32 0.03125, %v2801_v13 }
 0xae7   : > { %4636 = vrsqrt.f32 %v3092_v30  ;;  %v3178_v48 = vadd.f32 %v3162_v2, %v2910_v35  ;;  %v2893_v29 = vmul.f32 %v6726_v49, %v2873_v9 }
 0xae8   : > { %v4627_v6 = vpop.eup %4626  ;;  %v3098_v14 = vadd.f32 1e-05, %v3082_v58  ;;  %v2843_v4 = vadd.f32 1e-05, %v2827_v32  ;;  %4638 = verf.f32 %v3211_v23 }
 0xae9   : > { %v4629_v54 = vpop.eup %4628  ;;  %v2813_v34 = vpop.xlane.xlu1 %2812  ;;  %v3210_v59 = vmul.f32 0.70710677, %v3178_v48  ;;  %v2879_v62 = vmul.f32 %v4627_v6, %v6537_v46  ;;  %v2913_v9 = vadd.f32 %v6743_v25, %v2893_v29 }
 0xaea   : > { %v3053_v56 = vpop.xlane.xlu0 %3052  ;;  %v3125_v50 = vmul.f32 %v4629_v54, %v6541_v44  ;;  %4640 = vrsqrt.f32 %v3098_v14  ;;  %v2833_v33 = vmul.f32 0.03125, %v2813_v34  ;;  %v3195_v34 = vmul.f32 0.5, %v3179_v26 }
 0xaeb   : > { %v3079_v3 = vmul.f32 0.03125, %v3053_v56  ;;  %4642 = vrsqrt.f32 %v2843_v4  ;;  %v2899_v46 = vmul.f32 %v6726_v49, %v2879_v62  ;;  %v3194_v26 = vmul.f32 0.5, %v3178_v48 }
 0xaec   : > { %v4631_v43 = vpop.eup %4630  ;;  %v2849_v51 = vadd.f32 1e-05, %v2833_v33  ;;  %4644 = verf.f32 %v3210_v59  ;;  %v3145_v23 = vmul.f32 %v6731_v11, %v3125_v50 }
 0xaed   : > { %v3095_v30 = vadd.f32 1e-05, %v3079_v3  ;;  %v4633_v13 = vpop.eup %4632  ;;  %v3131_v35 = vmul.f32 %v4631_v43, %v6551_v61  ;;  %v3065_v2 = vpop.xlane.xlu1 %3064 }
 0xaee   : > { %v2799_v58 = vpop.xlane.xlu0 %2798  ;;  %v2872_v44 = vmul.f32 %v4633_v13, %v6555_v22  ;;  %v3085_v32 = vmul.f32 0.03125, %v3065_v2  ;;  %v3165_v6 = vadd.f32 %v6738_v38, %v3145_v23 }
 0xaef   : > { %v2826_v14 = vmul.f32 0.03125, %v2799_v58  ;;  %4646 = vrsqrt.f32 %v3095_v30  ;;  %v3151_v61 = vmul.f32 %v6731_v11, %v3131_v35 }
 0xaf0   : > { %v4635_v4 = vpop.eup %4634  ;;  %4648 = vrsqrt.f32 %v2849_v51  ;;  %v3101_v54 = vadd.f32 1e-05, %v3085_v32  ;;  %v2892_v3 = vmul.f32 %v6726_v49, %v2872_v44  ;;  %v3181_v62 = vadd.f32 %v3165_v6, %v2913_v9 }
 0xaf1   : > { %v2842_v50 = vadd.f32 1e-05, %v2826_v14  ;;  %v4637_v56 = vpop.eup %4636  ;;  %v2878_v59 = vmul.f32 %v4635_v4, %v6565_v45  ;;  %v2811_v22 = vpop.xlane.xlu1 %2810  ;;  %v2919_v51 = vadd.f32 %v6743_v25, %v2899_v46  ;;  %v3171_v14 = vadd.f32 %v6738_v38, %v3151_v61 }
 0xaf2   : > { %v3051_v33 = vpop.xlane.xlu0 %3050  ;;  %v4639_v43 = vpop.eup %4638  ;;  %v3124_v29 = vmul.f32 %v4637_v56, %v6569_v5  ;;  %4650 = vrsqrt.f32 %v3101_v54  ;;  %v2832_v30 = vmul.f32 0.03125, %v2811_v22  ;;  %v3213_v32 = vmul.f32 0.70710677, %v3181_v62 }
 0xaf3   : > { %v3078_v23 = vmul.f32 0.03125, %v3051_v33  ;;  %4652 = vrsqrt.f32 %v2842_v50  ;;  %v2898_v13 = vmul.f32 %v6726_v49, %v2878_v59  ;;  %v3243_v4 = vadd.f32 1.0, %v4639_v43 }
 0xaf4   : > { %v4641_v35 = vpop.eup %4640  ;;  %v2848_v2 = vadd.f32 1e-05, %v2832_v30  ;;  %v3144_v58 = vmul.f32 %v6731_v11, %v3124_v29  ;;  %v2912_v46 = vadd.f32 %v6743_v25, %v2892_v3 }
 0xaf5   : > { %v3094_v45 = vadd.f32 1e-05, %v3078_v23  ;;  %v4643_v44 = vpop.eup %4642  ;;  %v3130_v5 = vmul.f32 %v4641_v35, %v6579_v41  ;;  %v3063_v9 = vpop.xlane.xlu1 %3062  ;;  %v2918_v56 = vadd.f32 %v6743_v25, %v2898_v13 }
 0xaf6   : > { %v2805_v6 = vpop.xlane.xlu0 %2804  ;;  %v4645_v54 = vpop.eup %4644  ;;  %4654 = vrsqrt.f32 %v2848_v2  ;;  %v3084_v48 = vmul.f32 0.03125, %v3063_v9  ;;  %v3164_v22 = vadd.f32 %v6738_v38, %v3144_v58  ;;  %v2875_v61 = vmul.f32 %v4643_v44, %v6583_v0 }
 0xaf7   : > { %v2829_v50 = vmul.f32 0.03125, %v2805_v6  ;;  %4656 = vrsqrt.f32 %v3094_v45  ;;  %v3242_v59 = vadd.f32 1.0, %v4645_v54  ;;  %v3150_v33 = vmul.f32 %v6731_v11, %v3130_v5 }
 0xaf8   : > { %v3100_v41 = vadd.f32 1e-05, %v3084_v48  ;;  %4658 = verf.f32 %v3213_v32  ;;  %v3180_v35 = vadd.f32 %v3164_v22, %v2912_v46  ;;  %v3187_v9 = vadd.f32 %v3171_v14, %v2919_v51 }
 0xaf9   : > { %v2845_v29 = vadd.f32 1e-05, %v2829_v50  ;;  %v4647_v43 = vpop.eup %4646  ;;  %v2817_v30 = vpop.xlane.xlu1 %2816  ;;  %v3258_v23 = vmul.f32 %v3242_v59, %v3194_v26  ;;  %v3170_v2 = vadd.f32 %v6738_v38, %v3150_v33  ;;  %v3259_v58 = vmul.f32 %v3243_v4, %v3195_v34 }
 0xafa   : > { %v2803_v3 = vpop.xlane.xlu0 %2802  ;;  %v4649_v13 = vpop.eup %4648  ;;  %4660 = vrsqrt.f32 %v3100_v41  ;;  %v2835_v45 = vmul.f32 0.03125, %v2817_v30  ;;  %v3127_v5 = vmul.f32 %v4647_v43, %v6597_v7  ;;  %v3212_v0 = vmul.f32 0.70710677, %v3180_v35 }
 0xafb   : > { %v2828_v6 = vmul.f32 0.03125, %v2803_v3  ;;  %4123 = vmatprep.mubr.f32.mxu0 %v3258_v23  ;;  %v3186_v44 = vadd.f32 %v3170_v2, %v2918_v56  ;;  %4662 = vrsqrt.f32 %v2845_v29  ;;  %v2895_v26 = vmul.f32 %v6726_v49, %v2875_v61 }
 0xafc   : > { %v4651_v54 = vpop.eup %4650  ;;  %v2851_v32 = vadd.f32 1e-05, %v2835_v45  ;;  %4124 = vmatmul.mubr.f32.vlgmr.msra.gmra.mrb[48].mxu0 %v3259_v58  ;;  %4664 = verf.f32 %v3212_v0  ;;  %v6781_v59 = vmul.f32 0.5, %v3181_v62  ;;  %v3219_v34 = vmul.f32 0.70710677, %v3187_v9 }
 0xafd   : > { %v2844_v48 = vadd.f32 1e-05, %v2828_v6  ;;  %v4653_v46 = vpop.eup %4652  ;;  %v3069_v50 = vpop.xlane.xlu1 %3068  ;;  %v3218_v14 = vmul.f32 0.70710677, %v3186_v44  ;;  %v2881_v22 = vmul.f32 %v4649_v13, %v6593_v21  ;;  %v3133_v33 = vmul.f32 %v4651_v54, %v6607_v19 }
 0xafe   : > { %v3055_v51 = vpop.xlane.xlu0 %3054  ;;  %v2874_v7 = vmul.f32 %v4653_v46, %v6611_v37  ;;  %4666 = vrsqrt.f32 %v2851_v32  ;;  %v3087_v4 = vmul.f32 0.03125, %v3069_v50  ;;  %v3147_v61 = vmul.f32 %v6731_v11, %v3127_v5 }
 0xaff   : > { %v3080_v56 = vmul.f32 0.03125, %v3055_v51  ;;  %4668 = vrsqrt.f32 %v2844_v48  ;;  %v2915_v62 = vadd.f32 %v6743_v25, %v2895_v26  ;;  %v3196_v58 = vmul.f32 0.5, %v3180_v35 }
 0xb00   : > { %v4655_v41 = vpop.eup %4654  ;;  %v3103_v29 = vadd.f32 1e-05, %v3087_v4  ;;  %4670 = verf.f32 %v3218_v14  ;;  %v2894_v2 = vmul.f32 %v6726_v49, %v2874_v7  ;;  %v3167_v21 = vadd.f32 %v6738_v38, %v3147_v61 }
 0xb01   : > { %v3096_v43 = vadd.f32 1e-05, %v3080_v56  ;;  %v4657_v30 = vpop.eup %4656  ;;  %v2880_v3 = vmul.f32 %v4655_v41, %v6621_v39  ;;  %v2815_v37 = vpop.xlane.xlu1 %2814  ;;  %4672 = verf.f32 %v3219_v34  ;;  %v3203_v5 = vmul.f32 0.5, %v3187_v9 }
 0xb02   : > { %v3057_v23 = vpop.xlane.xlu0 %3056  ;;  %v4659_v19 = vpop.eup %4658  ;;  %v3126_v13 = vmul.f32 %v4657_v30, %v6625_v24  ;;  %4674 = vrsqrt.f32 %v3103_v29  ;;  %v2834_v45 = vmul.f32 0.03125, %v2815_v37  ;;  %v2901_v0 = vmul.f32 %v6726_v49, %v2881_v22 }
 0xb03   : > { %v3081_v6 = vmul.f32 0.03125, %v3057_v23  ;;  %4676 = vrsqrt.f32 %v3096_v43  ;;  %v6794_v26 = vadd.f32 %v3167_v21, %v2915_v62  ;;  %v3245_v51 = vadd.f32 1.0, %v4659_v19 }
 0xb04   : > { %v4661_v54 = vpop.eup %4660  ;;  %v2850_v39 = vadd.f32 1e-05, %v2834_v45  ;;  %v3146_v48 = vmul.f32 %v6731_v11, %v3126_v13  ;;  %v2900_v24 = vmul.f32 %v6726_v49, %v2880_v3  ;;  %v3153_v14 = vmul.f32 %v6731_v11, %v3133_v33 }
 0xb05   : > { %v3097_v32 = vadd.f32 1e-05, %v3081_v6  ;;  %v3132_v46 = vmul.f32 %v4661_v54, %v6635_v20  ;;  %v3067_v50 = vpop.xlane.xlu1 %3066  ;;  %v4663_v34 = vpop.eup %4662  ;;  %v2914_v9 = vadd.f32 %v6743_v25, %v2894_v2  ;;  %v3202_v56 = vmul.f32 0.5, %v3186_v44 }
 0xb06   : > { %4678 = vrsqrt.f32 %v2850_v39  ;;  %v3086_v35 = vmul.f32 0.03125, %v3067_v50  ;;  %v3166_v7 = vadd.f32 %v6738_v38, %v3146_v48  ;;  %v4665_v4 = vpop.eup %4664  ;;  %v3215_v20 = vmul.f32 0.70710677, %v6794_v26 }
 0xb07   : > { %4680 = vrsqrt.f32 %v3097_v32  ;;  %v3152_v22 = vmul.f32 %v6731_v11, %v3132_v46  ;;  %v3244_v29 = vadd.f32 1.0, %v4665_v4  ;;  %v3173_v33 = vadd.f32 %v6738_v38, %v3153_v14 }
 0xb08   : > { %v4667_v61 = vpop.eup %4666  ;;  %v3102_v41 = vadd.f32 1e-05, %v3086_v35  ;;  %v6803_v43 = vadd.f32 %v3166_v7, %v2914_v9  ;;  %v2920_v3 = vadd.f32 %v6743_v25, %v2900_v24  ;;  %4682 = verf.f32 %v3215_v20 }
 0xb09   : > { %v4669_v62 = vpop.eup %4668  ;;  %v2821_v30 = vpop.xlane.xlu1 %2820  ;;  %v3172_v37 = vadd.f32 %v6738_v38, %v3152_v22  ;;  %v2921_v44 = vadd.f32 %v6743_v25, %v2901_v0  ;;  %v3260_v21 = vmul.f32 %v3244_v29, %v3196_v58  ;;  %v3261_v19 = vmul.f32 %v3245_v51, %v6781_v59 }
 0xb0a   : > { %v4671_v23 = vpop.eup %4670  ;;  %v2876_v2 = vmul.f32 %v4669_v62, %v6653_v10  ;;  %4684 = vrsqrt.f32 %v3102_v41  ;;  %v2877_v45 = vmul.f32 %v4663_v34, %v6639_v63  ;;  %v3214_v54 = vmul.f32 0.70710677, %v6803_v43 }
 0xb0b   : > { %v4673_v13 = vpop.eup %4672  ;;  %v3250_v6 = vadd.f32 1.0, %v4671_v23  ;;  %v6813_v39 = vadd.f32 %v3172_v37, %v2920_v3  ;;  %v2883_v48 = vmul.f32 %v4667_v61, %v6649_v28  ;;  %v2837_v46 = vmul.f32 0.03125, %v2821_v30  ;;  %4126 = vmatprep.mubr.f32.mxu0 %v3260_v21 }
 0xb0c   : > { %v4675_v32 = vpop.eup %4674  ;;  %v3251_v0 = vadd.f32 1.0, %v4673_v13  ;;  %v6816_v50 = vadd.f32 %v3173_v33, %v2921_v44  ;;  %4127 = vmatmul.mubr.f32.gmra.mrb[50].mxu0 %v3261_v19  ;;  %4686 = verf.f32 %v3214_v54  ;;  %v2896_v63 = vmul.f32 %v6726_v49, %v2876_v2 }
 0xb0d   : > { %v4677_v10 = vpop.eup %4676  ;;  %v3135_v58 = vmul.f32 %v4675_v32, %v6663_v53  ;;  %v2819_v59 = vpop.xlane.xlu1 %2818  ;;  %v3266_v51 = vmul.f32 %v3250_v6, %v3202_v56  ;;  %v3220_v28 = vmul.f32 0.70710677, %v6813_v39  ;;  %v2897_v9 = vmul.f32 %v6726_v49, %v2877_v45 }
 0xb0e   : > { %v3128_v24 = vmul.f32 %v4677_v10, %v6667_v60  ;;  %v2836_v14 = vmul.f32 0.03125, %v2819_v59  ;;  %v3267_v34 = vmul.f32 %v3251_v0, %v3203_v5  ;;  %v3221_v35 = vmul.f32 0.70710677, %v6816_v50 }
 0xb0f   : > { %4135 = vmatprep.mubr.f32.mxu1 %v3266_v51  ;;  %v2853_v4 = vadd.f32 1e-05, %v2837_v46  ;;  %v2903_v22 = vmul.f32 %v6726_v49, %v2883_v48  ;;  %4688 = verf.f32 %v3220_v28  ;;  %v2916_v5 = vadd.f32 %v6743_v25, %v2896_v63 }
 0xb10   : > { %v4679_v7 = vpop.eup %4678  ;;  %v2852_v53 = vadd.f32 1e-05, %v2836_v14  ;;  %4136 = vmatmul.mubr.f32.vlgmr.msra.gmra.mrb[48].mxu1 %v3267_v34  ;;  %v3148_v56 = vmul.f32 %v6731_v11, %v3128_v24  ;;  %v3155_v41 = vmul.f32 %v6731_v11, %v3135_v58  ;;  %v3199_v6 = vmul.f32 0.5, %v6794_v26 }
 0xb11   : > { %v4681_v20 = vpop.eup %4680  ;;  %v2882_v60 = vmul.f32 %v4679_v7, %v6677_v55  ;;  %v3071_v61 = vpop.xlane.xlu1 %3070  ;;  %v2923_v3 = vadd.f32 %v6743_v25, %v2903_v22  ;;  %v2917_v54 = vadd.f32 %v6743_v25, %v2897_v9 }
 0xb12   : > { %v3129_v29 = vmul.f32 %v4681_v20, %v6681_v8  ;;  %4690 = vrsqrt.f32 %v2852_v53  ;;  %v3088_v33 = vmul.f32 0.03125, %v3071_v61  ;;  %v3168_v62 = vadd.f32 %v6738_v38, %v3148_v56  ;;  %v4683_v30 = vpop.eup %4682 }
 0xb13   : > { %4692 = verf.f32 %v3221_v35  ;;  %v3175_v37 = vadd.f32 %v6738_v38, %v3155_v41  ;;  %v2902_v8 = vmul.f32 %v6726_v49, %v2882_v60  ;;  %v3247_v48 = vadd.f32 1.0, %v4683_v30 }
 0xb14   : > { %v4685_v44 = vpop.eup %4684  ;;  %4694 = vrsqrt.f32 %v2853_v4  ;;  %v3104_v55 = vadd.f32 1e-05, %v3088_v33  ;;  %v3184_v23 = vadd.f32 %v3168_v62, %v2916_v5  ;;  %v3149_v2 = vmul.f32 %v6731_v11, %v3129_v29 }
 0xb15   : > { %v3134_v21 = vmul.f32 %v4685_v44, %v6690_v17  ;;  %v3073_v19 = vpop.xlane.xlu1 %3072  ;;  %v6836_v13 = vadd.f32 %v3175_v37, %v2923_v3  ;;  %v3198_v17 = vmul.f32 0.5, %v6803_v43  ;;  %v2922_v24 = vadd.f32 %v6743_v25, %v2902_v8 }
 0xb16   : > { %4696 = vrsqrt.f32 %v3104_v55  ;;  %v3089_v45 = vmul.f32 0.03125, %v3073_v19  ;;  %v4687_v32 = vpop.eup %4686  ;;  %v3216_v46 = vmul.f32 0.70710677, %v3184_v23  ;;  %v3169_v0 = vadd.f32 %v6738_v38, %v3149_v2 }
 0xb17   : > { %v3154_v10 = vmul.f32 %v6731_v11, %v3134_v21  ;;  %v3246_v59 = vadd.f32 1.0, %v4687_v32  ;;  %v3223_v51 = vmul.f32 0.70710677, %v6836_v13  ;;  %v3263_v28 = vmul.f32 %v3247_v48, %v3199_v6 }
 0xb18   : > { %v3105_v58 = vadd.f32 1e-05, %v3089_v45  ;;  %4698 = verf.f32 %v3216_v46  ;;  %v3185_v63 = vadd.f32 %v3169_v0, %v2917_v54  ;;  %v3204_v4 = vmul.f32 0.5, %v6813_v39 }
 0xb19   : > { %v3174_v26 = vadd.f32 %v6738_v38, %v3154_v10  ;;  %v3262_v14 = vmul.f32 %v3246_v59, %v3198_v17  ;;  %v4689_v34 = vpop.eup %4688  ;;  %v3205_v61 = vmul.f32 0.5, %v6816_v50  ;;  %v3200_v37 = vmul.f32 0.5, %v3184_v23 }
 0xb1a   : > { %4700 = vrsqrt.f32 %v3105_v58  ;;  %v3217_v35 = vmul.f32 0.70710677, %v3185_v63  ;;  %v3252_v43 = vadd.f32 1.0, %v4689_v34  ;;  %v3201_v6 = vmul.f32 0.5, %v3185_v63 }
 0xb1b   : > { %v3190_v9 = vadd.f32 %v3174_v26, %v2922_v24  ;;  %4129 = vmatprep.mubr.f32.mxu0 %v3262_v14  ;;  %4702 = verf.f32 %v3223_v51 }
 0xb1c   : > { %v4691_v7 = vpop.eup %4690  ;;  %4130 = vmatmul.mubr.f32.gmra.mrb[52].mxu0 %v3263_v28  ;;  %4704 = verf.f32 %v3217_v35  ;;  %v3268_v60 = vmul.f32 %v3252_v43, %v3204_v4  ;;  %v3600_v35 = vld [vmem:[%s6908_s2 + $0x11] ss:$0 sm:$0xff] }
 0xb1d   : > { %v4693_v53 = vpop.eup %4692  ;;  %v2884_v56 = vmul.f32 %v4691_v7, %v6704_v47  ;;  %v3222_v22 = vmul.f32 0.70710677, %v3190_v9  ;;  %v3206_v10 = vmul.f32 0.5, %v3190_v9 }
 0xb1e   : > { %v4695_v20 = vpop.eup %4694  ;;  %v3253_v5 = vadd.f32 1.0, %v4693_v53  ;;  %4138 = vmatprep.mubr.f32.mxu1 %v3268_v60 }
 0xb1f   : > { %4706 = verf.f32 %v3222_v22  ;;  %v2885_v33 = vmul.f32 %v4695_v20, %v6697_v57  ;;  %v2904_v62 = vmul.f32 %v6726_v49, %v2884_v56 }
 0xb20   : > { %v4697_v41 = vpop.eup %4696  ;;  %v3269_v29 = vmul.f32 %v3253_v5, %v3205_v61 }
 0xb21   : > { %v3136_v39 = vmul.f32 %v4697_v41, %v6711_v40  ;;  %v2924_v55 = vadd.f32 %v6743_v25, %v2904_v62  ;;  %v2905_v21 = vmul.f32 %v6726_v49, %v2885_v33  ;;  %v3207_v49 = vmul.f32 0.5, %v6836_v13 }
 0xb22   : > { %4139 = vmatmul.mubr.f32.gmra.mrb[50].mxu1 %v3269_v29  ;;  %v4699_v47 = vpop.eup %4698 }
 0xb23   : > { %v3156_v30 = vmul.f32 %v6731_v11, %v3136_v39  ;;  %v3248_v44 = vadd.f32 1.0, %v4699_v47 }
 0xb24   : > { %v4701_v3 = vpop.eup %4700 }
 0xb25   : > { %v3137_v50 = vmul.f32 %v4701_v3, %v6718_v18  ;;  %v3176_v2 = vadd.f32 %v6738_v38, %v3156_v30  ;;  %v4703_v57 = vpop.eup %4702  ;;  %v3264_v19 = vmul.f32 %v3248_v44, %v3200_v37  ;;  %v2925_v18 = vadd.f32 %v6743_v25, %v2905_v21  ;;  %v6949_v44 = vld [vmem:[#allocation6_spill] sm:$0xff] }
 0xb26   : > { %v4705_v40 = vpop.eup %4704  ;;  %v3255_v23 = vadd.f32 1.0, %v4703_v57 }
 0xb27   : > { %v3192_v8 = vadd.f32 %v3176_v2, %v2924_v55  ;;  %v3157_v45 = vmul.f32 %v6731_v11, %v3137_v50  ;;  %4132 = vmatprep.mubr.f32.mxu0 %v3264_v19  ;;  %v3249_v54 = vadd.f32 1.0, %v4705_v40  ;;  %v6951_v19 = vld [vmem:[#allocation7_spill] sm:$0xff] }
 0xb28   : > { %v3271_v11 = vmul.f32 %v3255_v23, %v3207_v49  ;;  %v6953_v23 = vld [vmem:[#allocation11_spill] sm:$0xff] }
 0xb29   : > { %v4707_v32 = vpop.eup %4706  ;;  %v3224_v48 = vmul.f32 0.70710677, %v3192_v8  ;;  %v3177_v46 = vadd.f32 %v6738_v38, %v3157_v45  ;;  %v3265_v0 = vmul.f32 %v3249_v54, %v3201_v6  ;;  %v3208_v24 = vmul.f32 0.5, %v3192_v8  ;;  %v6952_v6 = vld [vmem:[#allocation10_spill] sm:$0xff] }
 0xb2a   : > { %v3254_v58 = vadd.f32 1.0, %v4707_v32 }
 0xb2b   : > { %4708 = verf.f32 %v3224_v48  ;;  %v3193_v17 = vadd.f32 %v3177_v46, %v2925_v18  ;;  %4133 = vmatmul.mubr.f32.gmra.mrb[54].mxu0 %v3265_v0 }
 0xb2c   : > { %v3270_v59 = vmul.f32 %v3254_v58, %v3206_v10  ;;  %v6954_v10 = vld [vmem:[#allocation5_spill] sm:$0xff] }
 0xb2d   : > { %v3225_v51 = vmul.f32 0.70710677, %v3193_v17  ;;  %v3209_v14 = vmul.f32 0.5, %v3193_v17  ;;  %v6955_v17 = vld [vmem:[#allocation9_spill] sm:$0xff] }
 0xb2e   : > { %4141 = vmatprep.mubr.f32.mxu1 %v3270_v59 }
 0xb2f   : > { %4142 = vmatmul.mubr.f32.gmra.mrb[52].mxu1 %v3271_v11  ;;  %4710 = verf.f32 %v3225_v51 }
 0xb35   : > { %v4709_v63 = vpop.eup %4708 }
 0xb36   : > { %v3256_v25 = vadd.f32 1.0, %v4709_v63 }
 0xb38   : > { %v3272_v26 = vmul.f32 %v3256_v25, %v3208_v24 }
 0xb39   : > { %v4711_v38 = vpop.eup %4710 }
 0xb3a   : > { %4144 = vmatprep.mubr.f32.mxu1 %v3272_v26  ;;  %v3257_v34 = vadd.f32 1.0, %v4711_v38 }
 0xb3c   : > { %v3273_v28 = vmul.f32 %v3257_v34, %v3209_v14 }
 0xb3e   : > { %4145 = vmatmul.mubr.f32.gmra.mrb[54].mxu1 %v3273_v28 }
 0xbcf   : > { %v4125_v13 = vpop.f32.mrb[48].mxu0 }
 0xbd0   : > { %v3362_v9 = vadd.f32 %v4125_v13, %v6348_v27  ;;  %v3356_v7 = vpop.f32.mrb[49].mxu0 }
 0xbd1   : > { %v3357_v4 = vadd.f32 %v3356_v7, %v6361_v52 }
 0xbd2   : > { %v3441_v43 = vadd.f32 %v3600_v35, %v3362_v9 }
 0xbd3   : > { %v3440_v53 = vadd.f32 %v3600_v35, %v3357_v4 }
 0xbd4   : > { %3457 = vst [vmem:[%s6870_s24 + $0x8] sm:$0xff] %v3441_v43 }
 0xbd5   : > { %3456 = vst [vmem:[%s6870_s24] sm:$0xff] %v3440_v53 }
 0xbdf   : > { %v4128_v27 = vpop.f32.mrb[50].mxu0 }
 0xbe0   : > { %v3372_v56 = vadd.f32 %v4128_v27, %v6370_v36  ;;  %v3366_v22 = vpop.f32.mrb[51].mxu0 }
 0xbe1   : > { %v3367_v20 = vadd.f32 %v3366_v22, %v6382_v15 }
 0xbe2   : > { %v3443_v60 = vadd.f32 %v3600_v35, %v3372_v56 }
 0xbe3   : > { %v4137_v61 = vpop.f32.mrb[48].mxu1  ;;  %v3442_v41 = vadd.f32 %v3600_v35, %v3367_v20 }
 0xbe4   : > { %v3402_v5 = vadd.f32 %v4137_v61, %v6379_v12  ;;  %v3396_v52 = vpop.f32.mrb[49].mxu1  ;;  %3459 = vst [vmem:[%s6870_s24 + $0x18] sm:$0xff] %v3443_v60 }
 0xbe5   : > { %v3397_v29 = vadd.f32 %v3396_v52, %v6391_v1  ;;  %3458 = vst [vmem:[%s6870_s24 + $0x10] sm:$0xff] %v3442_v41 }
 0xbe6   : > { %v3449_v33 = vadd.f32 %v3600_v35, %v3402_v5 }
 0xbe7   : > { %v3448_v39 = vadd.f32 %v3600_v35, %v3397_v29 }
 0xbe8   : > { %3465 = vst [vmem:[%s6870_s24 + $0x48] sm:$0xff] %v3449_v33 }
 0xbe9   : > { %3464 = vst [vmem:[%s6870_s24 + $0x40] sm:$0xff] %v3448_v39 }
 0xbef   : > { %v4131_v36 = vpop.f32.mrb[52].mxu0 }
 0xbf0   : > { %v3382_v15 = vadd.f32 %v4131_v36, %v6400_v31  ;;  %v3376_v62 = vpop.f32.mrb[53].mxu0 }
 0xbf1   : > { %v3377_v12 = vadd.f32 %v3376_v62, %v6424_v42  ;;  %v6950_v42 = vld [vmem:[#allocation8_spill] sm:$0xff] }
 0xbf2   : > { %v3445_v47 = vadd.f32 %v3600_v35, %v3382_v15 }
 0xbf3   : > { %v3444_v30 = vadd.f32 %v3600_v35, %v3377_v12 }
 0xbf4   : > { %3461 = vst [vmem:[%s6870_s24 + $0x28] sm:$0xff] %v3445_v47 }
 0xbf5   : > { %v4140_v3 = vpop.f32.mrb[50].mxu1  ;;  %3460 = vst [vmem:[%s6870_s24 + $0x20] sm:$0xff] %v3444_v30 }
 0xbf6   : > { %v3412_v37 = vadd.f32 %v4140_v3, %v6415_v16  ;;  %v3406_v1 = vpop.f32.mrb[51].mxu1 }
 0xbf7   : > { %v3407_v50 = vadd.f32 %v3406_v1, %v6949_v44 }
 0xbf8   : > { %v3451_v55 = vadd.f32 %v3600_v35, %v3412_v37 }
 0xbf9   : > { %v3450_v2 = vadd.f32 %v3600_v35, %v3407_v50 }
 0xbfa   : > { %3467 = vst [vmem:[%s6870_s24 + $0x58] sm:$0xff] %v3451_v55 }
 0xbfb   : > { %3466 = vst [vmem:[%s6870_s24 + $0x50] sm:$0xff] %v3450_v2 }
 0xbfe   : > { %v4134_v31 = vpop.f32.mrb[54].mxu0 }
 0xbff   : > { %v3392_v21 = vadd.f32 %v4134_v31, %v6950_v42  ;;  %v3386_v57 = vpop.f32.mrb[55].mxu0 }
 0xc00   : > { %v3387_v40 = vadd.f32 %v3386_v57, %v6951_v19 }
 0xc01   : > { %v3447_v8 = vadd.f32 %v3600_v35, %v3392_v21 }
 0xc02   : > { %v4143_v16 = vpop.f32.mrb[52].mxu1  ;;  %v3446_v45 = vadd.f32 %v3600_v35, %v3387_v40 }
 0xc03   : > { %v3422_v54 = vadd.f32 %v4143_v16, %v6952_v6  ;;  %v3416_v32 = vpop.f32.mrb[53].mxu1  ;;  %3463 = vst [vmem:[%s6870_s24 + $0x38] sm:$0xff] %v3447_v8 }
 0xc04   : > { %v3417_v48 = vadd.f32 %v3416_v32, %v6953_v23  ;;  %3462 = vst [vmem:[%s6870_s24 + $0x30] sm:$0xff] %v3446_v45 }
 0xc05   : > { %v3453_v18 = vadd.f32 %v3600_v35, %v3422_v54 }
 0xc06   : > { %v3452_v46 = vadd.f32 %v3600_v35, %v3417_v48 }
 0xc07   : > { %3469 = vst [vmem:[%s6870_s24 + $0x68] sm:$0xff] %v3453_v18 }
 0xc08   : > { %3468 = vst [vmem:[%s6870_s24 + $0x60] sm:$0xff] %v3452_v46 }
 0xc11   : > { %v4146_v0 = vpop.f32.mrb[54].mxu1 }
 0xc12   : > { %v3432_v58 = vadd.f32 %v4146_v0, %v6954_v10  ;;  %v3426_v49 = vpop.f32.mrb[55].mxu1 }
 0xc13   : > { %v3427_v59 = vadd.f32 %v3426_v49, %v6955_v17 }
 0xc14   : > { %v3455_v11 = vadd.f32 %v3600_v35, %v3432_v58 }
 0xc15   : > { %v3454_v51 = vadd.f32 %v3600_v35, %v3427_v59 }
 0xc16   : > { %3471 = vst [vmem:[%s6870_s24 + $0x78] sm:$0xff] %v3455_v11 }
 0xc17   : > { %3470 = vst [vmem:[%s6870_s24 + $0x70] sm:$0xff] %v3454_v51 }
 0xc18 PF: > { %s14_s12 = sadd.s32 1, %s4766_s12  }
 0xc19   : > { %p11_p3 = scmp.ge.s32.totalorder %s14_s12, 4  }
 0xc1b   :  { %13 = sbr.rel (!%p11_p3) target bundleno = 1 (0x1), region = 67 }
 0xc22   :  { %3494 = vsyncpa [#allocation3], 1 }
 0xc23   :  { %3496 = vsyncpa [#allocation3 + $0x1], 1 }

</bundles_post_ra>
